<compile_context>
chip_gen: v5e
topology: v5e:2x2
jax: 0.10.0
libtpu: 0.0.40
codegen_flags: <defaults>
</compile_context>

<pallas_src>
import functools

import numpy as np
import jax
import jax.numpy as jnp
from jax import lax
from jax.experimental import pallas as pl
from jax.experimental.pallas import tpu as pltpu


def _round_up(x, m):
    return (x + m - 1) // m * m


# ---------------------------------------------------------------------------
# Wrapper-side weight packing: ConvTranspose2d(k=3, s=2, p=1, op=1) as one
# banded lane-map matrix [E | A | B] acting on (rows = y, lanes = x*C + c)
# activations, plus a [bias | bias | 0] row.
# ---------------------------------------------------------------------------
def _selection_matrices(w_in):
    """0/1 routing matrices (compile-time numpy constants).

    Output column 2x   <- kernel tap kx=1 of input column x.
    Output column 2x+1 <- kernel tap kx=2 of input column x and
                          kernel tap kx=0 of input column x+1.
    """
    s_c = np.zeros((w_in, 2 * w_in), np.float32)   # kx=1 -> x' = 2x
    s_r = np.zeros((w_in, 2 * w_in), np.float32)   # kx=2 -> x' = 2x+1
    s_l = np.zeros((w_in, 2 * w_in), np.float32)   # kx=0 -> x' = 2x-1
    for x in range(w_in):
        s_c[x, 2 * x] = 1.0
        s_r[x, 2 * x + 1] = 1.0
        if x >= 1:
            s_l[x, 2 * x - 1] = 1.0
    return s_c, s_r, s_l


def _pack_layer(weight, bias, w_in, k_pad, lout_pad, mat_dtype):
    """weight: (Cin, Cout, 3, 3)  (PyTorch ConvTranspose2d layout).

    Returns
      w_cat    : (k_pad, 3*lout_pad) bf16  = [E | A | B]
      bias_row : (1, 3*lout_pad)     f32   = [bias | bias | 0]
    so that  even output rows = X[y] @ E + bias,
             odd  output rows = X[y] @ A + X[y+1] @ B + bias.
    """
    cin, cout = weight.shape[0], weight.shape[1]
    s_c, s_r, s_l = _selection_matrices(w_in)

    def band(ky):
        m = (jnp.kron(s_c, weight[:, :, ky, 1])
             + jnp.kron(s_r, weight[:, :, ky, 2])
             + jnp.kron(s_l, weight[:, :, ky, 0]))
        return jnp.pad(m, ((0, k_pad - w_in * cin),
                           (0, lout_pad - 2 * w_in * cout)))

    w_cat = jnp.concatenate([band(1), band(2), band(0)],
                            axis=1).astype(mat_dtype)
    b_row = jnp.pad(jnp.tile(bias, 2 * w_in), (0, lout_pad - 2 * w_in * cout))
    bias_row = jnp.concatenate(
        [b_row, b_row, jnp.zeros((lout_pad,), jnp.float32)]
    ).reshape(1, 3 * lout_pad).astype(jnp.float32)
    return w_cat, bias_row


# ---------------------------------------------------------------------------
# The fused kernel: all layers of the decoder; `bblk` images per grid step.
# ---------------------------------------------------------------------------
def _fused_decoder_kernel(x_ref, *refs, num_layers, h0, bblk, rpads,
                          lout_pads, acts):
    w_refs = refs[:2 * num_layers]
    out_ref = refs[2 * num_layers]
    scratch = refs[2 * num_layers + 1:]

    # "last image row has no next row" mask, generated in-kernel (no DMA).
    mask = (lax.broadcasted_iota(jnp.int32, (h0, 1), 0)
            < (h0 - 1)).astype(jnp.float32)

    def act_fn(name, v):
        if name == "sigmoid":
            return 1.0 / (1.0 + jnp.exp(-v))   # exact; final layer is tiny
        return jnp.maximum(v, 0.0)

    r_in = h0
    for l in range(num_layers):
        lout = lout_pads[l]
        rpad_in, rpad_out = rpads[l], rpads[l + 1]
        src = x_ref if l == 0 else scratch[l - 1]
        dst = out_ref if l == num_layers - 1 else scratch[l]

        # ONE full-height MXU matmul per layer over the whole batch block:
        #   Y = X @ [E | A | B]   (M = bblk*rpad_in, N = 3*lout, f32 acc)
        # plus a single broadcast bias add ([bias | bias | 0]).
        y = jnp.dot(src[...], w_refs[2 * l][...],
                    preferred_element_type=jnp.float32)
        y = y + w_refs[2 * l + 1][...]

        for b in range(bblk):            # static unroll; bblk is small
            ib = b * rpad_in             # this image's rows in X / Y
            ob = b * rpad_out            # this image's rows in the output

            # Even output rows (y' = 2y): stored block [ob, ob + r_in).
            dst[ob:ob + r_in, :] = act_fn(
                acts[l], y[ib:ib + r_in, 0:lout]).astype(dst.dtype)

            # Odd output rows (y' = 2y+1) = YA[row y] + YB[row y+1].  With
            # the even-block-first storage order, "row y+1" is a telescoping
            # sequence of contiguous block copies of the f32 product, so the
            # assembly is pure VPU slice-adds (no extra matmuls).
            def _odd(blk_lo, blk_sz, nxt_lo, row_mask=None):
                ya = y[ib + blk_lo:ib + blk_lo + blk_sz, lout:2 * lout]
                yb = y[ib + nxt_lo:ib + nxt_lo + blk_sz, 2 * lout:3 * lout]
                if row_mask is not None:
                    yb = yb * row_mask
                o0 = ob + r_in + blk_lo
                dst[o0:o0 + blk_sz, :] = act_fn(
                    acts[l], ya + yb).astype(dst.dtype)

            blk_lo, blk_sz = 0, r_in // 2
            while blk_sz >= h0:
                _odd(blk_lo, blk_sz, blk_sz)
                blk_lo += blk_sz
                blk_sz //= 2
            # Recursion base: next rows sit at [1, 1+h0); the last row of
            # every image has no next row -> masked to zero.
            _odd(r_in - h0, h0, 1, mask)

        r_in *= 2


# ---------------------------------------------------------------------------
# Wrapper (NCHW in / NCHW out, like the PyTorch module).
# ---------------------------------------------------------------------------
def decoder_forward(x_nchw, params, out_shapes, *, batch_block=None,
                    mat_dtype=jnp.bfloat16, act_dtype=jnp.bfloat16):
    n, c0, h0, w0 = x_nchw.shape
    num_layers = len(params)

    # ---- geometry, crop checks, weight packing -----------------------------
    acts, w_cats, bias_rows, lout_pads = [], [], [], []
    k_pad0 = _round_up(w0 * c0, 128)
    h, w, c = h0, w0, c0
    for li, (wt, b) in enumerate(params):
        cout = wt.shape[1]
        k_pad = _round_up(w * c, 128)
        lout_pad = _round_up(2 * w * cout, 128)
        wc, br = _pack_layer(wt, b, w, k_pad, lout_pad, mat_dtype)
        w_cats.append(wc)
        bias_rows.append(br)
        lout_pads.append(lout_pad)
        acts.append("sigmoid" if li == num_layers - 1 else "relu")

        target = out_shapes[-(li + 1)]
        if (2 * h != target[0]) and (2 * w != target[1]):
            if li != num_layers - 1:
                # TODO(synk): intermediate crops (non exact-2x out_shapes) are
                # not expressible in the fused single-kernel layout.
                raise NotImplementedError(
                    "fused decoder kernel requires exact-2x out_shapes for "
                    "intermediate layers")
        h, w, c = 2 * h, 2 * w, cout

    # Per-image padded row counts (multiples of 8 so every image base is
    # sublane-aligned; layer 0 keeps one spare zero row for the base-block
    # "next row" read).
    rpads = [_round_up(h0 + 1, 8)]
    r = h0
    for _ in range(num_layers):
        r *= 2
        rpads.append(_round_up(r, 8))

    # ---- batch folding: stack `batch_block` images along the matmul M dim --
    if batch_block is None:
        # Enough rows to feed the MXU, but keep >= 2 grid blocks when
        # possible so both v7x TensorCores get work.
        cap = max(1, 256 // rpads[num_layers - 1])
        good = [d for d in range(1, n + 1)
                if n % d == 0 and d <= cap and n // d >= 2]
        batch_block = max(good) if good else 1
    assert n % batch_block == 0, "batch must be divisible by batch_block"
    grid_n = n // batch_block

    # ---- kernel inputs ------------------------------------------------------
    # NCHW -> (rows = y, lanes = x*C + c); images stacked along rows.
    x_pack = jnp.transpose(x_nchw, (0, 2, 3, 1)).reshape(n, h0, w0 * c0)
    x_pack = jnp.pad(x_pack, ((0, 0), (0, rpads[0] - h0),
                              (0, k_pad0 - w0 * c0)))
    x_pack = x_pack.reshape(n * rpads[0], k_pad0).astype(act_dtype)

    rows_out = rpads[-1]
    lout_last = lout_pads[-1]

    in_specs = [pl.BlockSpec((batch_block * rpads[0], k_pad0),
                             lambda i: (i, 0))]
    weight_inputs = []
    for l in range(num_layers):
        weight_inputs += [w_cats[l], bias_rows[l]]
        # Constant index maps: the packed weights are DMA'd once and revisited
        # every grid step (one [E|A|B] matrix + one bias row per layer).
        in_specs += [pl.BlockSpec(w_cats[l].shape, lambda i: (0, 0)),
                     pl.BlockSpec(bias_rows[l].shape, lambda i: (0, 0))]

    scratch_shapes = [
        pltpu.VMEM((batch_block * rpads[l + 1], lout_pads[l]), act_dtype)
        for l in range(num_layers - 1)
    ]

    kernel = functools.partial(
        _fused_decoder_kernel, num_layers=num_layers, h0=h0,
        bblk=batch_block, rpads=tuple(rpads), lout_pads=tuple(lout_pads),
        acts=tuple(acts))

    y = pl.pallas_call(
        kernel,
        out_shape=jax.ShapeDtypeStruct((n * rows_out, lout_last),
                                       jnp.float32),
        grid_spec=pltpu.PrefetchScalarGridSpec(
            num_scalar_prefetch=0,
            grid=(grid_n,),
            in_specs=in_specs,
            out_specs=pl.BlockSpec((batch_block * rows_out, lout_last),
                                   lambda i: (i, 0)),
            scratch_shapes=scratch_shapes),
        compiler_params=pltpu.CompilerParams(
            dimension_semantics=("parallel",)),
    )(x_pack, *weight_inputs)

    # ---- undo the recursive row ordering, unpack lanes, final crop ----------
    r_final = h0 * (2 ** num_layers)
    perm = np.arange(h0)
    for _ in range(num_layers):
        perm = np.concatenate([2 * perm, 2 * perm + 1])
    inv = np.argsort(perm).astype(np.int32)       # inv[true_row] = stored pos

    h_f, w_f = r_final, w0 * (2 ** num_layers)
    c_out = params[-1][0].shape[1]
    y = y.reshape(n, rows_out, lout_last)
    y = jnp.take(y, jnp.asarray(inv), axis=1)                 # true row order
    y = y[:, :, :w_f * c_out].reshape(n, h_f, w_f, c_out)
    y = jnp.transpose(y, (0, 3, 1, 2))                        # NHWC -> NCHW

    target = out_shapes[-num_layers]
    if (h_f != target[0]) and (w_f != target[1]):
        # Same (both-dims-mismatch, trailing-window) crop as the PyTorch module.
        y = y[:, :, h_f - target[0]:, w_f - target[1]:]
    return y


# ---------------------------------------------------------------------------
# Pure-JAX reference (ConvTranspose2d == lhs-dilated conv with flipped kernel).
# ---------------------------------------------------------------------------
def _reference_decoder(x_nchw, params, out_shapes):
    x = jnp.transpose(x_nchw, (0, 2, 3, 1))                   # NCHW -> NHWC
    num_layers = len(params)
    for li, (wt, b) in enumerate(params):
        rhs = jnp.transpose(wt[:, :, ::-1, ::-1], (2, 3, 0, 1))   # HWIO
        y = lax.conv_general_dilated(
            x, rhs, window_strides=(1, 1), padding=((1, 2), (1, 2)),
            lhs_dilation=(2, 2), rhs_dilation=(1, 1),
            dimension_numbers=("NHWC", "HWIO", "NHWC")) + b
        t = out_shapes[-(li + 1)]
        if (y.shape[1] != t[0]) and (y.shape[2] != t[1]):
            y = y[:, y.shape[1] - t[0]:, y.shape[2] - t[1]:, :]
        x = jax.nn.sigmoid(y) if li == num_layers - 1 else jnp.maximum(y, 0.0)
    return jnp.transpose(x, (0, 3, 1, 2))


def init_decoder_params(key, in_channels=10, out_channels=1,
                        num_layers=4, num_maps=32):
    """Deterministic parameter init mirroring the DecoderLayer __init__ shapes."""
    chans = [(in_channels, num_maps)]
    for _ in range(2, num_layers):
        chans.append((num_maps, num_maps))
    chans.append((num_maps, out_channels))
    params = []
    for li, (cin, cout) in enumerate(chans):
        kw, kb = jax.random.split(jax.random.fold_in(key, li))
        bound = float(1.0 / np.sqrt(cin * 9))
        wt = jax.random.uniform(kw, (cin, cout, 3, 3), jnp.float32,
                                -bound, bound)
        b = jax.random.uniform(kb, (cout,), jnp.float32, -bound, bound)
        params.append((wt, b))
    return params


if __name__ == "__main__":
    key = jax.random.PRNGKey(0)

    n, c_in, h_in, w_in = 4, 10, 2, 2
    num_layers, num_maps, c_out = 4, 32, 1
    # out_shapes[-1] is the first layer's target, ..., out_shapes[-num_layers]
    # the last layer's target (all exact 2x doublings -> crops never trigger).
    out_shapes = [(32, 32), (16, 16), (8, 8), (4, 4)]

    kx, kp = jax.random.split(key)
    x = jax.random.normal(kx, (n, c_in, h_in, w_in), jnp.float32)
    params = init_decoder_params(kp, c_in, c_out, num_layers, num_maps)

    fwd = jax.jit(lambda xx, pp: decoder_forward(xx, pp, out_shapes))
    out = jax.block_until_ready(fwd(x, params))
    assert out.shape == (n, c_out, 32, 32), out.shape

    ref = jax.block_until_ready(_reference_decoder(x, params, out_shapes))
    err = float(jnp.max(jnp.abs(out - ref)))
    assert err < 5e-2, f"max |err| vs reference = {err}"

    print("KERNEL_OK")
</pallas_src>

<mosaic_0001>
module attributes {stable_mosaic.version = 11 : i64} {
  func.func @_fused_decoder_kernel(%arg0: i32, %arg1: memref<16x128xbf16, #tpu.memory_space<vmem>>, %arg2: memref<128x384xbf16, #tpu.memory_space<vmem>>, %arg3: memref<1x384xf32, #tpu.memory_space<vmem>>, %arg4: memref<128x768xbf16, #tpu.memory_space<vmem>>, %arg5: memref<1x768xf32, #tpu.memory_space<vmem>>, %arg6: memref<256x1536xbf16, #tpu.memory_space<vmem>>, %arg7: memref<1x1536xf32, #tpu.memory_space<vmem>>, %arg8: memref<512x384xbf16, #tpu.memory_space<vmem>>, %arg9: memref<1x384xf32, #tpu.memory_space<vmem>>, %arg10: memref<64x128xf32, #tpu.memory_space<vmem>>, %arg11: memref<16x128xbf16, #tpu.memory_space<vmem>>, %arg12: memref<16x256xbf16, #tpu.memory_space<vmem>>, %arg13: memref<32x512xbf16, #tpu.memory_space<vmem>>) attributes {dimension_semantics = [#tpu.dimension_semantics<parallel>], iteration_bounds = array<i64: 2>, scalar_prefetch = 0 : i64, scratch_operands = 3 : i64, tpu.core_type = #tpu.core_type<tc>, window_params = [{transform_indices = @transform_0, window_bounds = array<i64: 16, 128>}, {pipeline_mode = #tpu.pipeline_mode<synchronous>, transform_indices = @transform_1, window_bounds = array<i64: 128, 384>}, {pipeline_mode = #tpu.pipeline_mode<synchronous>, transform_indices = @transform_2, window_bounds = array<i64: 1, 384>}, {pipeline_mode = #tpu.pipeline_mode<synchronous>, transform_indices = @transform_3, window_bounds = array<i64: 128, 768>}, {pipeline_mode = #tpu.pipeline_mode<synchronous>, transform_indices = @transform_4, window_bounds = array<i64: 1, 768>}, {pipeline_mode = #tpu.pipeline_mode<synchronous>, transform_indices = @transform_5, window_bounds = array<i64: 256, 1536>}, {pipeline_mode = #tpu.pipeline_mode<synchronous>, transform_indices = @transform_6, window_bounds = array<i64: 1, 1536>}, {pipeline_mode = #tpu.pipeline_mode<synchronous>, transform_indices = @transform_7, window_bounds = array<i64: 512, 384>}, {pipeline_mode = #tpu.pipeline_mode<synchronous>, transform_indices = @transform_8, window_bounds = array<i64: 1, 384>}, {transform_indices = @transform_9, window_bounds = array<i64: 64, 128>}]} {
    %0 = tpu.iota {dimensions = array<i32: 0>} : vector<2x1xi32>
    %c1_i32 = arith.constant 1 : i32
    %1 = vector.broadcast %c1_i32 : i32 to vector<2x1xi32>
    %2 = arith.cmpi slt, %0, %1 : vector<2x1xi32>
    %3 = arith.extui %2 : vector<2x1xi1> to vector<2x1xi32>
    %4 = arith.sitofp %3 : vector<2x1xi32> to vector<2x1xf32>
    %c0 = arith.constant 0 : index
    %c0_0 = arith.constant 0 : index
    %5 = vector.load %arg1[%c0, %c0_0] : memref<16x128xbf16, #tpu.memory_space<vmem>>, vector<16x128xbf16>
    %c0_1 = arith.constant 0 : index
    %c0_2 = arith.constant 0 : index
    %6 = vector.load %arg2[%c0_1, %c0_2] : memref<128x384xbf16, #tpu.memory_space<vmem>>, vector<128x384xbf16>
    %cst = arith.constant dense<0.000000e+00> : vector<16x384xf32>
    %7 = tpu.matmul %5, %6, %cst {dimension_numbers = #tpu.dot_dimension_numbers<[1], [0], [0], [1], [0, 0, 1, 1], [], []>} : vector<16x128xbf16>, vector<128x384xbf16>, vector<16x384xf32> -> vector<16x384xf32>
    %c0_3 = arith.constant 0 : index
    %c0_4 = arith.constant 0 : index
    %8 = vector.load %arg3[%c0_3, %c0_4] : memref<1x384xf32, #tpu.memory_space<vmem>>, vector<1x384xf32>
    %9 = vector.broadcast %8 : vector<1x384xf32> to vector<16x384xf32>
    %10 = arith.addf %7, %9 : vector<16x384xf32>
    %11 = vector.extract_strided_slice %10 {offsets = [0, 0], sizes = [2, 128], strides = [1, 1]} : vector<16x384xf32> to vector<2x128xf32>
    %cst_5 = arith.constant 0.000000e+00 : f32
    %12 = vector.broadcast %cst_5 : f32 to vector<2x128xf32>
    %13 = arith.maximumf %11, %12 : vector<2x128xf32>
    %14 = arith.truncf %13 : vector<2x128xf32> to vector<2x128xbf16>
    %c0_6 = arith.constant 0 : index
    %c0_7 = arith.constant 0 : index
    %15 = vector.load %arg11[%c0_6, %c0_7] : memref<16x128xbf16, #tpu.memory_space<vmem>>, vector<2x128xbf16>
    tpu.vector_store %arg11[%c0_6, %c0_7], %14 {strides = array<i32>} : memref<16x128xbf16, #tpu.memory_space<vmem>>, vector<2x128xbf16>,
    %16 = vector.extract_strided_slice %10 {offsets = [0, 128], sizes = [2, 128], strides = [1, 1]} : vector<16x384xf32> to vector<2x128xf32>
    %17 = vector.extract_strided_slice %10 {offsets = [1, 256], sizes = [2, 128], strides = [1, 1]} : vector<16x384xf32> to vector<2x128xf32>
    %18 = vector.broadcast %4 : vector<2x1xf32> to vector<2x128xf32>
    %19 = arith.mulf %17, %18 : vector<2x128xf32>
    %20 = arith.addf %16, %19 : vector<2x128xf32>
    %cst_8 = arith.constant 0.000000e+00 : f32
    %21 = vector.broadcast %cst_8 : f32 to vector<2x128xf32>
    %22 = arith.maximumf %20, %21 : vector<2x128xf32>
    %23 = arith.truncf %22 : vector<2x128xf32> to vector<2x128xbf16>
    %c2 = arith.constant 2 : index
    %c0_9 = arith.constant 0 : index
    %24 = vector.load %arg11[%c2, %c0_9] : memref<16x128xbf16, #tpu.memory_space<vmem>>, vector<2x128xbf16>
    tpu.vector_store %arg11[%c2, %c0_9], %23 {strides = array<i32>} : memref<16x128xbf16, #tpu.memory_space<vmem>>, vector<2x128xbf16>,
    %25 = vector.extract_strided_slice %10 {offsets = [8, 0], sizes = [2, 128], strides = [1, 1]} : vector<16x384xf32> to vector<2x128xf32>
    %cst_10 = arith.constant 0.000000e+00 : f32
    %26 = vector.broadcast %cst_10 : f32 to vector<2x128xf32>
    %27 = arith.maximumf %25, %26 : vector<2x128xf32>
    %28 = arith.truncf %27 : vector<2x128xf32> to vector<2x128xbf16>
    %c8 = arith.constant 8 : index
    %c0_11 = arith.constant 0 : index
    %29 = vector.load %arg11[%c8, %c0_11] : memref<16x128xbf16, #tpu.memory_space<vmem>>, vector<2x128xbf16>
    tpu.vector_store %arg11[%c8, %c0_11], %28 {strides = array<i32>} : memref<16x128xbf16, #tpu.memory_space<vmem>>, vector<2x128xbf16>,
    %30 = vector.extract_strided_slice %10 {offsets = [8, 128], sizes = [2, 128], strides = [1, 1]} : vector<16x384xf32> to vector<2x128xf32>
    %31 = vector.extract_strided_slice %10 {offsets = [9, 256], sizes = [2, 128], strides = [1, 1]} : vector<16x384xf32> to vector<2x128xf32>
    %32 = vector.broadcast %4 : vector<2x1xf32> to vector<2x128xf32>
    %33 = arith.mulf %31, %32 : vector<2x128xf32>
    %34 = arith.addf %30, %33 : vector<2x128xf32>
    %cst_12 = arith.constant 0.000000e+00 : f32
    %35 = vector.broadcast %cst_12 : f32 to vector<2x128xf32>
    %36 = arith.maximumf %34, %35 : vector<2x128xf32>
    %37 = arith.truncf %36 : vector<2x128xf32> to vector<2x128xbf16>
    %c10 = arith.constant 10 : index
    %c0_13 = arith.constant 0 : index
    %38 = vector.load %arg11[%c10, %c0_13] : memref<16x128xbf16, #tpu.memory_space<vmem>>, vector<2x128xbf16>
    tpu.vector_store %arg11[%c10, %c0_13], %37 {strides = array<i32>} : memref<16x128xbf16, #tpu.memory_space<vmem>>, vector<2x128xbf16>,
    %c0_14 = arith.constant 0 : index
    %c0_15 = arith.constant 0 : index
    %39 = vector.load %arg11[%c0_14, %c0_15] : memref<16x128xbf16, #tpu.memory_space<vmem>>, vector<16x128xbf16>
    %c0_16 = arith.constant 0 : index
    %c0_17 = arith.constant 0 : index
    %40 = vector.load %arg4[%c0_16, %c0_17] : memref<128x768xbf16, #tpu.memory_space<vmem>>, vector<128x768xbf16>
    %cst_18 = arith.constant dense<0.000000e+00> : vector<16x768xf32>
    %41 = tpu.matmul %39, %40, %cst_18 {dimension_numbers = #tpu.dot_dimension_numbers<[1], [0], [0], [1], [0, 0, 1, 1], [], []>} : vector<16x128xbf16>, vector<128x768xbf16>, vector<16x768xf32> -> vector<16x768xf32>
    %c0_19 = arith.constant 0 : index
    %c0_20 = arith.constant 0 : index
    %42 = vector.load %arg5[%c0_19, %c0_20] : memref<1x768xf32, #tpu.memory_space<vmem>>, vector<1x768xf32>
    %43 = vector.broadcast %42 : vector<1x768xf32> to vector<16x768xf32>
    %44 = arith.addf %41, %43 : vector<16x768xf32>
    %45 = vector.extract_strided_slice %44 {offsets = [0, 0], sizes = [4, 256], strides = [1, 1]} : vector<16x768xf32> to vector<4x256xf32>
    %cst_21 = arith.constant 0.000000e+00 : f32
    %46 = vector.broadcast %cst_21 : f32 to vector<4x256xf32>
    %47 = arith.maximumf %45, %46 : vector<4x256xf32>
    %48 = arith.truncf %47 : vector<4x256xf32> to vector<4x256xbf16>
    %c0_22 = arith.constant 0 : index
    %c0_23 = arith.constant 0 : index
    %49 = vector.load %arg12[%c0_22, %c0_23] : memref<16x256xbf16, #tpu.memory_space<vmem>>, vector<4x256xbf16>
    tpu.vector_store %arg12[%c0_22, %c0_23], %48 {strides = array<i32>} : memref<16x256xbf16, #tpu.memory_space<vmem>>, vector<4x256xbf16>,
    %50 = vector.extract_strided_slice %44 {offsets = [0, 256], sizes = [2, 256], strides = [1, 1]} : vector<16x768xf32> to vector<2x256xf32>
    %51 = vector.extract_strided_slice %44 {offsets = [2, 512], sizes = [2, 256], strides = [1, 1]} : vector<16x768xf32> to vector<2x256xf32>
    %52 = arith.addf %50, %51 : vector<2x256xf32>
    %cst_24 = arith.constant 0.000000e+00 : f32
    %53 = vector.broadcast %cst_24 : f32 to vector<2x256xf32>
    %54 = arith.maximumf %52, %53 : vector<2x256xf32>
    %55 = arith.truncf %54 : vector<2x256xf32> to vector<2x256xbf16>
    %c4 = arith.constant 4 : index
    %c0_25 = arith.constant 0 : index
    %56 = vector.load %arg12[%c4, %c0_25] : memref<16x256xbf16, #tpu.memory_space<vmem>>, vector<2x256xbf16>
    tpu.vector_store %arg12[%c4, %c0_25], %55 {strides = array<i32>} : memref<16x256xbf16, #tpu.memory_space<vmem>>, vector<2x256xbf16>,
    %57 = vector.extract_strided_slice %44 {offsets = [2, 256], sizes = [2, 256], strides = [1, 1]} : vector<16x768xf32> to vector<2x256xf32>
    %58 = vector.extract_strided_slice %44 {offsets = [1, 512], sizes = [2, 256], strides = [1, 1]} : vector<16x768xf32> to vector<2x256xf32>
    %59 = vector.broadcast %4 : vector<2x1xf32> to vector<2x256xf32>
    %60 = arith.mulf %58, %59 : vector<2x256xf32>
    %61 = arith.addf %57, %60 : vector<2x256xf32>
    %cst_26 = arith.constant 0.000000e+00 : f32
    %62 = vector.broadcast %cst_26 : f32 to vector<2x256xf32>
    %63 = arith.maximumf %61, %62 : vector<2x256xf32>
    %64 = arith.truncf %63 : vector<2x256xf32> to vector<2x256xbf16>
    %c6 = arith.constant 6 : index
    %c0_27 = arith.constant 0 : index
    %65 = vector.load %arg12[%c6, %c0_27] : memref<16x256xbf16, #tpu.memory_space<vmem>>, vector<2x256xbf16>
    tpu.vector_store %arg12[%c6, %c0_27], %64 {strides = array<i32>} : memref<16x256xbf16, #tpu.memory_space<vmem>>, vector<2x256xbf16>,
    %66 = vector.extract_strided_slice %44 {offsets = [8, 0], sizes = [4, 256], strides = [1, 1]} : vector<16x768xf32> to vector<4x256xf32>
    %cst_28 = arith.constant 0.000000e+00 : f32
    %67 = vector.broadcast %cst_28 : f32 to vector<4x256xf32>
    %68 = arith.maximumf %66, %67 : vector<4x256xf32>
    %69 = arith.truncf %68 : vector<4x256xf32> to vector<4x256xbf16>
    %c8_29 = arith.constant 8 : index
    %c0_30 = arith.constant 0 : index
    %70 = vector.load %arg12[%c8_29, %c0_30] : memref<16x256xbf16, #tpu.memory_space<vmem>>, vector<4x256xbf16>
    tpu.vector_store %arg12[%c8_29, %c0_30], %69 {strides = array<i32>} : memref<16x256xbf16, #tpu.memory_space<vmem>>, vector<4x256xbf16>,
    %71 = vector.extract_strided_slice %44 {offsets = [8, 256], sizes = [2, 256], strides = [1, 1]} : vector<16x768xf32> to vector<2x256xf32>
    %72 = vector.extract_strided_slice %44 {offsets = [10, 512], sizes = [2, 256], strides = [1, 1]} : vector<16x768xf32> to vector<2x256xf32>
    %73 = arith.addf %71, %72 : vector<2x256xf32>
    %cst_31 = arith.constant 0.000000e+00 : f32
    %74 = vector.broadcast %cst_31 : f32 to vector<2x256xf32>
    %75 = arith.maximumf %73, %74 : vector<2x256xf32>
    %76 = arith.truncf %75 : vector<2x256xf32> to vector<2x256xbf16>
    %c12 = arith.constant 12 : index
    %c0_32 = arith.constant 0 : index
    %77 = vector.load %arg12[%c12, %c0_32] : memref<16x256xbf16, #tpu.memory_space<vmem>>, vector<2x256xbf16>
    tpu.vector_store %arg12[%c12, %c0_32], %76 {strides = array<i32>} : memref<16x256xbf16, #tpu.memory_space<vmem>>, vector<2x256xbf16>,
    %78 = vector.extract_strided_slice %44 {offsets = [10, 256], sizes = [2, 256], strides = [1, 1]} : vector<16x768xf32> to vector<2x256xf32>
    %79 = vector.extract_strided_slice %44 {offsets = [9, 512], sizes = [2, 256], strides = [1, 1]} : vector<16x768xf32> to vector<2x256xf32>
    %80 = vector.broadcast %4 : vector<2x1xf32> to vector<2x256xf32>
    %81 = arith.mulf %79, %80 : vector<2x256xf32>
    %82 = arith.addf %78, %81 : vector<2x256xf32>
    %cst_33 = arith.constant 0.000000e+00 : f32
    %83 = vector.broadcast %cst_33 : f32 to vector<2x256xf32>
    %84 = arith.maximumf %82, %83 : vector<2x256xf32>
    %85 = arith.truncf %84 : vector<2x256xf32> to vector<2x256xbf16>
    %c14 = arith.constant 14 : index
    %c0_34 = arith.constant 0 : index
    %86 = vector.load %arg12[%c14, %c0_34] : memref<16x256xbf16, #tpu.memory_space<vmem>>, vector<2x256xbf16>
    tpu.vector_store %arg12[%c14, %c0_34], %85 {strides = array<i32>} : memref<16x256xbf16, #tpu.memory_space<vmem>>, vector<2x256xbf16>,
    %c0_35 = arith.constant 0 : index
    %c0_36 = arith.constant 0 : index
    %87 = vector.load %arg12[%c0_35, %c0_36] : memref<16x256xbf16, #tpu.memory_space<vmem>>, vector<16x256xbf16>
    %c0_37 = arith.constant 0 : index
    %c0_38 = arith.constant 0 : index
    %88 = vector.load %arg6[%c0_37, %c0_38] : memref<256x1536xbf16, #tpu.memory_space<vmem>>, vector<256x1536xbf16>
    %cst_39 = arith.constant dense<0.000000e+00> : vector<16x1536xf32>
    %89 = tpu.matmul %87, %88, %cst_39 {dimension_numbers = #tpu.dot_dimension_numbers<[1], [0], [0], [1], [0, 0, 1, 1], [], []>} : vector<16x256xbf16>, vector<256x1536xbf16>, vector<16x1536xf32> -> vector<16x1536xf32>
    %c0_40 = arith.constant 0 : index
    %c0_41 = arith.constant 0 : index
    %90 = vector.load %arg7[%c0_40, %c0_41] : memref<1x1536xf32, #tpu.memory_space<vmem>>, vector<1x1536xf32>
    %91 = vector.broadcast %90 : vector<1x1536xf32> to vector<16x1536xf32>
    %92 = arith.addf %89, %91 : vector<16x1536xf32>
    %93 = vector.extract_strided_slice %92 {offsets = [0, 0], sizes = [8, 512], strides = [1, 1]} : vector<16x1536xf32> to vector<8x512xf32>
    %cst_42 = arith.constant 0.000000e+00 : f32
    %94 = vector.broadcast %cst_42 : f32 to vector<8x512xf32>
    %95 = arith.maximumf %93, %94 : vector<8x512xf32>
    %96 = arith.truncf %95 : vector<8x512xf32> to vector<8x512xbf16>
    %c0_43 = arith.constant 0 : index
    %c0_44 = arith.constant 0 : index
    %97 = vector.load %arg13[%c0_43, %c0_44] : memref<32x512xbf16, #tpu.memory_space<vmem>>, vector<8x512xbf16>
    tpu.vector_store %arg13[%c0_43, %c0_44], %96 {strides = array<i32>} : memref<32x512xbf16, #tpu.memory_space<vmem>>, vector<8x512xbf16>,
    %98 = vector.extract_strided_slice %92 {offsets = [0, 512], sizes = [4, 512], strides = [1, 1]} : vector<16x1536xf32> to vector<4x512xf32>
    %99 = vector.extract_strided_slice %92 {offsets = [4, 1024], sizes = [4, 512], strides = [1, 1]} : vector<16x1536xf32> to vector<4x512xf32>
    %100 = arith.addf %98, %99 : vector<4x512xf32>
    %cst_45 = arith.constant 0.000000e+00 : f32
    %101 = vector.broadcast %cst_45 : f32 to vector<4x512xf32>
    %102 = arith.maximumf %100, %101 : vector<4x512xf32>
    %103 = arith.truncf %102 : vector<4x512xf32> to vector<4x512xbf16>
    %c8_46 = arith.constant 8 : index
    %c0_47 = arith.constant 0 : index
    %104 = vector.load %arg13[%c8_46, %c0_47] : memref<32x512xbf16, #tpu.memory_space<vmem>>, vector<4x512xbf16>
    tpu.vector_store %arg13[%c8_46, %c0_47], %103 {strides = array<i32>} : memref<32x512xbf16, #tpu.memory_space<vmem>>, vector<4x512xbf16>,
    %105 = vector.extract_strided_slice %92 {offsets = [4, 512], sizes = [2, 512], strides = [1, 1]} : vector<16x1536xf32> to vector<2x512xf32>
    %106 = vector.extract_strided_slice %92 {offsets = [2, 1024], sizes = [2, 512], strides = [1, 1]} : vector<16x1536xf32> to vector<2x512xf32>
    %107 = arith.addf %105, %106 : vector<2x512xf32>
    %cst_48 = arith.constant 0.000000e+00 : f32
    %108 = vector.broadcast %cst_48 : f32 to vector<2x512xf32>
    %109 = arith.maximumf %107, %108 : vector<2x512xf32>
    %110 = arith.truncf %109 : vector<2x512xf32> to vector<2x512xbf16>
    %c12_49 = arith.constant 12 : index
    %c0_50 = arith.constant 0 : index
    %111 = vector.load %arg13[%c12_49, %c0_50] : memref<32x512xbf16, #tpu.memory_space<vmem>>, vector<2x512xbf16>
    tpu.vector_store %arg13[%c12_49, %c0_50], %110 {strides = array<i32>} : memref<32x512xbf16, #tpu.memory_space<vmem>>, vector<2x512xbf16>,
    %112 = vector.extract_strided_slice %92 {offsets = [6, 512], sizes = [2, 512], strides = [1, 1]} : vector<16x1536xf32> to vector<2x512xf32>
    %113 = vector.extract_strided_slice %92 {offsets = [1, 1024], sizes = [2, 512], strides = [1, 1]} : vector<16x1536xf32> to vector<2x512xf32>
    %114 = vector.broadcast %4 : vector<2x1xf32> to vector<2x512xf32>
    %115 = arith.mulf %113, %114 : vector<2x512xf32>
    %116 = arith.addf %112, %115 : vector<2x512xf32>
    %cst_51 = arith.constant 0.000000e+00 : f32
    %117 = vector.broadcast %cst_51 : f32 to vector<2x512xf32>
    %118 = arith.maximumf %116, %117 : vector<2x512xf32>
    %119 = arith.truncf %118 : vector<2x512xf32> to vector<2x512xbf16>
    %c14_52 = arith.constant 14 : index
    %c0_53 = arith.constant 0 : index
    %120 = vector.load %arg13[%c14_52, %c0_53] : memref<32x512xbf16, #tpu.memory_space<vmem>>, vector<2x512xbf16>
    tpu.vector_store %arg13[%c14_52, %c0_53], %119 {strides = array<i32>} : memref<32x512xbf16, #tpu.memory_space<vmem>>, vector<2x512xbf16>,
    %121 = vector.extract_strided_slice %92 {offsets = [8, 0], sizes = [8, 512], strides = [1, 1]} : vector<16x1536xf32> to vector<8x512xf32>
    %cst_54 = arith.constant 0.000000e+00 : f32
    %122 = vector.broadcast %cst_54 : f32 to vector<8x512xf32>
    %123 = arith.maximumf %121, %122 : vector<8x512xf32>
    %124 = arith.truncf %123 : vector<8x512xf32> to vector<8x512xbf16>
    %c16 = arith.constant 16 : index
    %c0_55 = arith.constant 0 : index
    %125 = vector.load %arg13[%c16, %c0_55] : memref<32x512xbf16, #tpu.memory_space<vmem>>, vector<8x512xbf16>
    tpu.vector_store %arg13[%c16, %c0_55], %124 {strides = array<i32>} : memref<32x512xbf16, #tpu.memory_space<vmem>>, vector<8x512xbf16>,
    %126 = vector.extract_strided_slice %92 {offsets = [8, 512], sizes = [4, 512], strides = [1, 1]} : vector<16x1536xf32> to vector<4x512xf32>
    %127 = vector.extract_strided_slice %92 {offsets = [12, 1024], sizes = [4, 512], strides = [1, 1]} : vector<16x1536xf32> to vector<4x512xf32>
    %128 = arith.addf %126, %127 : vector<4x512xf32>
    %cst_56 = arith.constant 0.000000e+00 : f32
    %129 = vector.broadcast %cst_56 : f32 to vector<4x512xf32>
    %130 = arith.maximumf %128, %129 : vector<4x512xf32>
    %131 = arith.truncf %130 : vector<4x512xf32> to vector<4x512xbf16>
    %c24 = arith.constant 24 : index
    %c0_57 = arith.constant 0 : index
    %132 = vector.load %arg13[%c24, %c0_57] : memref<32x512xbf16, #tpu.memory_space<vmem>>, vector<4x512xbf16>
    tpu.vector_store %arg13[%c24, %c0_57], %131 {strides = array<i32>} : memref<32x512xbf16, #tpu.memory_space<vmem>>, vector<4x512xbf16>,
    %133 = vector.extract_strided_slice %92 {offsets = [12, 512], sizes = [2, 512], strides = [1, 1]} : vector<16x1536xf32> to vector<2x512xf32>
    %134 = vector.extract_strided_slice %92 {offsets = [10, 1024], sizes = [2, 512], strides = [1, 1]} : vector<16x1536xf32> to vector<2x512xf32>
    %135 = arith.addf %133, %134 : vector<2x512xf32>
    %cst_58 = arith.constant 0.000000e+00 : f32
    %136 = vector.broadcast %cst_58 : f32 to vector<2x512xf32>
    %137 = arith.maximumf %135, %136 : vector<2x512xf32>
    %138 = arith.truncf %137 : vector<2x512xf32> to vector<2x512xbf16>
    %c28 = arith.constant 28 : index
    %c0_59 = arith.constant 0 : index
    %139 = vector.load %arg13[%c28, %c0_59] : memref<32x512xbf16, #tpu.memory_space<vmem>>, vector<2x512xbf16>
    tpu.vector_store %arg13[%c28, %c0_59], %138 {strides = array<i32>} : memref<32x512xbf16, #tpu.memory_space<vmem>>, vector<2x512xbf16>,
    %140 = vector.extract_strided_slice %92 {offsets = [14, 512], sizes = [2, 512], strides = [1, 1]} : vector<16x1536xf32> to vector<2x512xf32>
    %141 = vector.extract_strided_slice %92 {offsets = [9, 1024], sizes = [2, 512], strides = [1, 1]} : vector<16x1536xf32> to vector<2x512xf32>
    %142 = vector.broadcast %4 : vector<2x1xf32> to vector<2x512xf32>
    %143 = arith.mulf %141, %142 : vector<2x512xf32>
    %144 = arith.addf %140, %143 : vector<2x512xf32>
    %cst_60 = arith.constant 0.000000e+00 : f32
    %145 = vector.broadcast %cst_60 : f32 to vector<2x512xf32>
    %146 = arith.maximumf %144, %145 : vector<2x512xf32>
    %147 = arith.truncf %146 : vector<2x512xf32> to vector<2x512xbf16>
    %c30 = arith.constant 30 : index
    %c0_61 = arith.constant 0 : index
    %148 = vector.load %arg13[%c30, %c0_61] : memref<32x512xbf16, #tpu.memory_space<vmem>>, vector<2x512xbf16>
    tpu.vector_store %arg13[%c30, %c0_61], %147 {strides = array<i32>} : memref<32x512xbf16, #tpu.memory_space<vmem>>, vector<2x512xbf16>,
    %c0_62 = arith.constant 0 : index
    %c0_63 = arith.constant 0 : index
    %149 = vector.load %arg13[%c0_62, %c0_63] : memref<32x512xbf16, #tpu.memory_space<vmem>>, vector<32x512xbf16>
    %c0_64 = arith.constant 0 : index
    %c0_65 = arith.constant 0 : index
    %150 = vector.load %arg8[%c0_64, %c0_65] : memref<512x384xbf16, #tpu.memory_space<vmem>>, vector<512x384xbf16>
    %cst_66 = arith.constant dense<0.000000e+00> : vector<32x384xf32>
    %151 = tpu.matmul %149, %150, %cst_66 {dimension_numbers = #tpu.dot_dimension_numbers<[1], [0], [0], [1], [0, 0, 1, 1], [], []>} : vector<32x512xbf16>, vector<512x384xbf16>, vector<32x384xf32> -> vector<32x384xf32>
    %c0_67 = arith.constant 0 : index
    %c0_68 = arith.constant 0 : index
    %152 = vector.load %arg9[%c0_67, %c0_68] : memref<1x384xf32, #tpu.memory_space<vmem>>, vector<1x384xf32>
    %153 = vector.broadcast %152 : vector<1x384xf32> to vector<32x384xf32>
    %154 = arith.addf %151, %153 : vector<32x384xf32>
    %155 = vector.extract_strided_slice %154 {offsets = [0, 0], sizes = [16, 128], strides = [1, 1]} : vector<32x384xf32> to vector<16x128xf32>
    %cst_69 = arith.constant 0.000000e+00 : f32
    %156 = vector.broadcast %cst_69 : f32 to vector<16x128xf32>
    %157 = arith.subf %156, %155 : vector<16x128xf32>
    %158 = math.exp %157 : vector<16x128xf32>
    %cst_70 = arith.constant 1.000000e+00 : f32
    %159 = vector.broadcast %cst_70 : f32 to vector<16x128xf32>
    %160 = arith.addf %159, %158 : vector<16x128xf32>
    %cst_71 = arith.constant 1.000000e+00 : f32
    %161 = vector.broadcast %cst_71 : f32 to vector<16x128xf32>
    %162 = arith.divf %161, %160 : vector<16x128xf32>
    %c0_72 = arith.constant 0 : index
    %c0_73 = arith.constant 0 : index
    %163 = vector.load %arg10[%c0_72, %c0_73] : memref<64x128xf32, #tpu.memory_space<vmem>>, vector<16x128xf32>
    tpu.vector_store %arg10[%c0_72, %c0_73], %162 {strides = array<i32>} : memref<64x128xf32, #tpu.memory_space<vmem>>, vector<16x128xf32>,
    %164 = vector.extract_strided_slice %154 {offsets = [0, 128], sizes = [8, 128], strides = [1, 1]} : vector<32x384xf32> to vector<8x128xf32>
    %165 = vector.extract_strided_slice %154 {offsets = [8, 256], sizes = [8, 128], strides = [1, 1]} : vector<32x384xf32> to vector<8x128xf32>
    %166 = arith.addf %164, %165 : vector<8x128xf32>
    %cst_74 = arith.constant 0.000000e+00 : f32
    %167 = vector.broadcast %cst_74 : f32 to vector<8x128xf32>
    %168 = arith.subf %167, %166 : vector<8x128xf32>
    %169 = math.exp %168 : vector<8x128xf32>
    %cst_75 = arith.constant 1.000000e+00 : f32
    %170 = vector.broadcast %cst_75 : f32 to vector<8x128xf32>
    %171 = arith.addf %170, %169 : vector<8x128xf32>
    %cst_76 = arith.constant 1.000000e+00 : f32
    %172 = vector.broadcast %cst_76 : f32 to vector<8x128xf32>
    %173 = arith.divf %172, %171 : vector<8x128xf32>
    %c16_77 = arith.constant 16 : index
    %c0_78 = arith.constant 0 : index
    %174 = vector.load %arg10[%c16_77, %c0_78] : memref<64x128xf32, #tpu.memory_space<vmem>>, vector<8x128xf32>
    tpu.vector_store %arg10[%c16_77, %c0_78], %173 {strides = array<i32>} : memref<64x128xf32, #tpu.memory_space<vmem>>, vector<8x128xf32>,
    %175 = vector.extract_strided_slice %154 {offsets = [8, 128], sizes = [4, 128], strides = [1, 1]} : vector<32x384xf32> to vector<4x128xf32>
    %176 = vector.extract_strided_slice %154 {offsets = [4, 256], sizes = [4, 128], strides = [1, 1]} : vector<32x384xf32> to vector<4x128xf32>
    %177 = arith.addf %175, %176 : vector<4x128xf32>
    %cst_79 = arith.constant 0.000000e+00 : f32
    %178 = vector.broadcast %cst_79 : f32 to vector<4x128xf32>
    %179 = arith.subf %178, %177 : vector<4x128xf32>
    %180 = math.exp %179 : vector<4x128xf32>
    %cst_80 = arith.constant 1.000000e+00 : f32
    %181 = vector.broadcast %cst_80 : f32 to vector<4x128xf32>
    %182 = arith.addf %181, %180 : vector<4x128xf32>
    %cst_81 = arith.constant 1.000000e+00 : f32
    %183 = vector.broadcast %cst_81 : f32 to vector<4x128xf32>
    %184 = arith.divf %183, %182 : vector<4x128xf32>
    %c24_82 = arith.constant 24 : index
    %c0_83 = arith.constant 0 : index
    %185 = vector.load %arg10[%c24_82, %c0_83] : memref<64x128xf32, #tpu.memory_space<vmem>>, vector<4x128xf32>
    tpu.vector_store %arg10[%c24_82, %c0_83], %184 {strides = array<i32>} : memref<64x128xf32, #tpu.memory_space<vmem>>, vector<4x128xf32>,
    %186 = vector.extract_strided_slice %154 {offsets = [12, 128], sizes = [2, 128], strides = [1, 1]} : vector<32x384xf32> to vector<2x128xf32>
    %187 = vector.extract_strided_slice %154 {offsets = [2, 256], sizes = [2, 128], strides = [1, 1]} : vector<32x384xf32> to vector<2x128xf32>
    %188 = arith.addf %186, %187 : vector<2x128xf32>
    %cst_84 = arith.constant 0.000000e+00 : f32
    %189 = vector.broadcast %cst_84 : f32 to vector<2x128xf32>
    %190 = arith.subf %189, %188 : vector<2x128xf32>
    %191 = math.exp %190 : vector<2x128xf32>
    %cst_85 = arith.constant 1.000000e+00 : f32
    %192 = vector.broadcast %cst_85 : f32 to vector<2x128xf32>
    %193 = arith.addf %192, %191 : vector<2x128xf32>
    %cst_86 = arith.constant 1.000000e+00 : f32
    %194 = vector.broadcast %cst_86 : f32 to vector<2x128xf32>
    %195 = arith.divf %194, %193 : vector<2x128xf32>
    %c28_87 = arith.constant 28 : index
    %c0_88 = arith.constant 0 : index
    %196 = vector.load %arg10[%c28_87, %c0_88] : memref<64x128xf32, #tpu.memory_space<vmem>>, vector<2x128xf32>
    tpu.vector_store %arg10[%c28_87, %c0_88], %195 {strides = array<i32>} : memref<64x128xf32, #tpu.memory_space<vmem>>, vector<2x128xf32>,
    %197 = vector.extract_strided_slice %154 {offsets = [14, 128], sizes = [2, 128], strides = [1, 1]} : vector<32x384xf32> to vector<2x128xf32>
    %198 = vector.extract_strided_slice %154 {offsets = [1, 256], sizes = [2, 128], strides = [1, 1]} : vector<32x384xf32> to vector<2x128xf32>
    %199 = vector.broadcast %4 : vector<2x1xf32> to vector<2x128xf32>
    %200 = arith.mulf %198, %199 : vector<2x128xf32>
    %201 = arith.addf %197, %200 : vector<2x128xf32>
    %cst_89 = arith.constant 0.000000e+00 : f32
    %202 = vector.broadcast %cst_89 : f32 to vector<2x128xf32>
    %203 = arith.subf %202, %201 : vector<2x128xf32>
    %204 = math.exp %203 : vector<2x128xf32>
    %cst_90 = arith.constant 1.000000e+00 : f32
    %205 = vector.broadcast %cst_90 : f32 to vector<2x128xf32>
    %206 = arith.addf %205, %204 : vector<2x128xf32>
    %cst_91 = arith.constant 1.000000e+00 : f32
    %207 = vector.broadcast %cst_91 : f32 to vector<2x128xf32>
    %208 = arith.divf %207, %206 : vector<2x128xf32>
    %c30_92 = arith.constant 30 : index
    %c0_93 = arith.constant 0 : index
    %209 = vector.load %arg10[%c30_92, %c0_93] : memref<64x128xf32, #tpu.memory_space<vmem>>, vector<2x128xf32>
    tpu.vector_store %arg10[%c30_92, %c0_93], %208 {strides = array<i32>} : memref<64x128xf32, #tpu.memory_space<vmem>>, vector<2x128xf32>,
    %210 = vector.extract_strided_slice %154 {offsets = [16, 0], sizes = [16, 128], strides = [1, 1]} : vector<32x384xf32> to vector<16x128xf32>
    %cst_94 = arith.constant 0.000000e+00 : f32
    %211 = vector.broadcast %cst_94 : f32 to vector<16x128xf32>
    %212 = arith.subf %211, %210 : vector<16x128xf32>
    %213 = math.exp %212 : vector<16x128xf32>
    %cst_95 = arith.constant 1.000000e+00 : f32
    %214 = vector.broadcast %cst_95 : f32 to vector<16x128xf32>
    %215 = arith.addf %214, %213 : vector<16x128xf32>
    %cst_96 = arith.constant 1.000000e+00 : f32
    %216 = vector.broadcast %cst_96 : f32 to vector<16x128xf32>
    %217 = arith.divf %216, %215 : vector<16x128xf32>
    %c32 = arith.constant 32 : index
    %c0_97 = arith.constant 0 : index
    %218 = vector.load %arg10[%c32, %c0_97] : memref<64x128xf32, #tpu.memory_space<vmem>>, vector<16x128xf32>
    tpu.vector_store %arg10[%c32, %c0_97], %217 {strides = array<i32>} : memref<64x128xf32, #tpu.memory_space<vmem>>, vector<16x128xf32>,
    %219 = vector.extract_strided_slice %154 {offsets = [16, 128], sizes = [8, 128], strides = [1, 1]} : vector<32x384xf32> to vector<8x128xf32>
    %220 = vector.extract_strided_slice %154 {offsets = [24, 256], sizes = [8, 128], strides = [1, 1]} : vector<32x384xf32> to vector<8x128xf32>
    %221 = arith.addf %219, %220 : vector<8x128xf32>
    %cst_98 = arith.constant 0.000000e+00 : f32
    %222 = vector.broadcast %cst_98 : f32 to vector<8x128xf32>
    %223 = arith.subf %222, %221 : vector<8x128xf32>
    %224 = math.exp %223 : vector<8x128xf32>
    %cst_99 = arith.constant 1.000000e+00 : f32
    %225 = vector.broadcast %cst_99 : f32 to vector<8x128xf32>
    %226 = arith.addf %225, %224 : vector<8x128xf32>
    %cst_100 = arith.constant 1.000000e+00 : f32
    %227 = vector.broadcast %cst_100 : f32 to vector<8x128xf32>
    %228 = arith.divf %227, %226 : vector<8x128xf32>
    %c48 = arith.constant 48 : index
    %c0_101 = arith.constant 0 : index
    %229 = vector.load %arg10[%c48, %c0_101] : memref<64x128xf32, #tpu.memory_space<vmem>>, vector<8x128xf32>
    tpu.vector_store %arg10[%c48, %c0_101], %228 {strides = array<i32>} : memref<64x128xf32, #tpu.memory_space<vmem>>, vector<8x128xf32>,
    %230 = vector.extract_strided_slice %154 {offsets = [24, 128], sizes = [4, 128], strides = [1, 1]} : vector<32x384xf32> to vector<4x128xf32>
    %231 = vector.extract_strided_slice %154 {offsets = [20, 256], sizes = [4, 128], strides = [1, 1]} : vector<32x384xf32> to vector<4x128xf32>
    %232 = arith.addf %230, %231 : vector<4x128xf32>
    %cst_102 = arith.constant 0.000000e+00 : f32
    %233 = vector.broadcast %cst_102 : f32 to vector<4x128xf32>
    %234 = arith.subf %233, %232 : vector<4x128xf32>
    %235 = math.exp %234 : vector<4x128xf32>
    %cst_103 = arith.constant 1.000000e+00 : f32
    %236 = vector.broadcast %cst_103 : f32 to vector<4x128xf32>
    %237 = arith.addf %236, %235 : vector<4x128xf32>
    %cst_104 = arith.constant 1.000000e+00 : f32
    %238 = vector.broadcast %cst_104 : f32 to vector<4x128xf32>
    %239 = arith.divf %238, %237 : vector<4x128xf32>
    %c56 = arith.constant 56 : index
    %c0_105 = arith.constant 0 : index
    %240 = vector.load %arg10[%c56, %c0_105] : memref<64x128xf32, #tpu.memory_space<vmem>>, vector<4x128xf32>
    tpu.vector_store %arg10[%c56, %c0_105], %239 {strides = array<i32>} : memref<64x128xf32, #tpu.memory_space<vmem>>, vector<4x128xf32>,
    %241 = vector.extract_strided_slice %154 {offsets = [28, 128], sizes = [2, 128], strides = [1, 1]} : vector<32x384xf32> to vector<2x128xf32>
    %242 = vector.extract_strided_slice %154 {offsets = [18, 256], sizes = [2, 128], strides = [1, 1]} : vector<32x384xf32> to vector<2x128xf32>
    %243 = arith.addf %241, %242 : vector<2x128xf32>
    %cst_106 = arith.constant 0.000000e+00 : f32
    %244 = vector.broadcast %cst_106 : f32 to vector<2x128xf32>
    %245 = arith.subf %244, %243 : vector<2x128xf32>
    %246 = math.exp %245 : vector<2x128xf32>
    %cst_107 = arith.constant 1.000000e+00 : f32
    %247 = vector.broadcast %cst_107 : f32 to vector<2x128xf32>
    %248 = arith.addf %247, %246 : vector<2x128xf32>
    %cst_108 = arith.constant 1.000000e+00 : f32
    %249 = vector.broadcast %cst_108 : f32 to vector<2x128xf32>
    %250 = arith.divf %249, %248 : vector<2x128xf32>
    %c60 = arith.constant 60 : index
    %c0_109 = arith.constant 0 : index
    %251 = vector.load %arg10[%c60, %c0_109] : memref<64x128xf32, #tpu.memory_space<vmem>>, vector<2x128xf32>
    tpu.vector_store %arg10[%c60, %c0_109], %250 {strides = array<i32>} : memref<64x128xf32, #tpu.memory_space<vmem>>, vector<2x128xf32>,
    %252 = vector.extract_strided_slice %154 {offsets = [30, 128], sizes = [2, 128], strides = [1, 1]} : vector<32x384xf32> to vector<2x128xf32>
    %253 = vector.extract_strided_slice %154 {offsets = [17, 256], sizes = [2, 128], strides = [1, 1]} : vector<32x384xf32> to vector<2x128xf32>
    %254 = vector.broadcast %4 : vector<2x1xf32> to vector<2x128xf32>
    %255 = arith.mulf %253, %254 : vector<2x128xf32>
    %256 = arith.addf %252, %255 : vector<2x128xf32>
    %cst_110 = arith.constant 0.000000e+00 : f32
    %257 = vector.broadcast %cst_110 : f32 to vector<2x128xf32>
    %258 = arith.subf %257, %256 : vector<2x128xf32>
    %259 = math.exp %258 : vector<2x128xf32>
    %cst_111 = arith.constant 1.000000e+00 : f32
    %260 = vector.broadcast %cst_111 : f32 to vector<2x128xf32>
    %261 = arith.addf %260, %259 : vector<2x128xf32>
    %cst_112 = arith.constant 1.000000e+00 : f32
    %262 = vector.broadcast %cst_112 : f32 to vector<2x128xf32>
    %263 = arith.divf %262, %261 : vector<2x128xf32>
    %c62 = arith.constant 62 : index
    %c0_113 = arith.constant 0 : index
    %264 = vector.load %arg10[%c62, %c0_113] : memref<64x128xf32, #tpu.memory_space<vmem>>, vector<2x128xf32>
    tpu.vector_store %arg10[%c62, %c0_113], %263 {strides = array<i32>} : memref<64x128xf32, #tpu.memory_space<vmem>>, vector<2x128xf32>,
    return
  }
  func.func @transform_0(%arg0: i32) -> (i32, i32) {
    %c0_i32 = arith.constant 0 : i32
    %c0_i32_0 = arith.constant 0 : i32
    return %arg0, %c0_i32 : i32, i32
  }
  func.func @transform_1(%arg0: i32) -> (i32, i32) {
    %c0_i32 = arith.constant 0 : i32
    %c0_i32_0 = arith.constant 0 : i32
    %c0_i32_1 = arith.constant 0 : i32
    return %c0_i32, %c0_i32_0 : i32, i32
  }
  func.func @transform_2(%arg0: i32) -> (i32, i32) {
    %c0_i32 = arith.constant 0 : i32
    %c0_i32_0 = arith.constant 0 : i32
    %c0_i32_1 = arith.constant 0 : i32
    return %c0_i32, %c0_i32_0 : i32, i32
  }
  func.func @transform_3(%arg0: i32) -> (i32, i32) {
    %c0_i32 = arith.constant 0 : i32
    %c0_i32_0 = arith.constant 0 : i32
    %c0_i32_1 = arith.constant 0 : i32
    return %c0_i32, %c0_i32_0 : i32, i32
  }
  func.func @transform_4(%arg0: i32) -> (i32, i32) {
    %c0_i32 = arith.constant 0 : i32
    %c0_i32_0 = arith.constant 0 : i32
    %c0_i32_1 = arith.constant 0 : i32
    return %c0_i32, %c0_i32_0 : i32, i32
  }
  func.func @transform_5(%arg0: i32) -> (i32, i32) {
    %c0_i32 = arith.constant 0 : i32
    %c0_i32_0 = arith.constant 0 : i32
    %c0_i32_1 = arith.constant 0 : i32
    return %c0_i32, %c0_i32_0 : i32, i32
  }
  func.func @transform_6(%arg0: i32) -> (i32, i32) {
    %c0_i32 = arith.constant 0 : i32
    %c0_i32_0 = arith.constant 0 : i32
    %c0_i32_1 = arith.constant 0 : i32
    return %c0_i32, %c0_i32_0 : i32, i32
  }
  func.func @transform_7(%arg0: i32) -> (i32, i32) {
    %c0_i32 = arith.constant 0 : i32
    %c0_i32_0 = arith.constant 0 : i32
    %c0_i32_1 = arith.constant 0 : i32
    return %c0_i32, %c0_i32_0 : i32, i32
  }
  func.func @transform_8(%arg0: i32) -> (i32, i32) {
    %c0_i32 = arith.constant 0 : i32
    %c0_i32_0 = arith.constant 0 : i32
    %c0_i32_1 = arith.constant 0 : i32
    return %c0_i32, %c0_i32_0 : i32, i32
  }
  func.func @transform_9(%arg0: i32) -> (i32, i32) {
    %c0_i32 = arith.constant 0 : i32
    %c0_i32_0 = arith.constant 0 : i32
    return %arg0, %c0_i32 : i32, i32
  }
}

</mosaic_0001>

<bundles_post_ra>
// kernel: tile.23
= control target key start
LH: loop header
LB: loop body
LE: loop exit
PB: predicated region body
PF: predicated region fallthrough
CT: control target
= control target key end

     0   :  { %s22_s0 = inlined_call_operand.vmem [shape: f32[32], index: 0, kind: input, shape index: {}]   ;;  %s23_s1 = inlined_call_operand.vmem [shape: f32[4,32], index: 1, kind: output, shape index: {}]  }
   0x1   :  { %v4_v0 = vld [vmem:[%s22_s0] ss:$0 sm:$0xff] }
   0x2   :  { %5 = vst [vmem:[%s23_s1] sm:$0xf] %v4_v0 }

// kernel: tile.24
= control target key start
LH: loop header
LB: loop body
LE: loop exit
PB: predicated region body
PF: predicated region fallthrough
CT: control target
= control target key end

     0   :  { %s37_s8 = smov 32   ;;  %s38_s9 = smov 64   ;;  %vm7_vm0 = vcmask 261120   ;;  %vm13_vm1 = vcmask 1048320   ;;  %vm19_vm2 = vcmask 785920   ;;  %vm25_vm3 = vcmask 523520   ;;  %s55_s0 = inlined_call_operand.vmem [shape: f32[4,32], index: 0, kind: input, shape index: {}]   ;;  %s56_s1 = inlined_call_operand.vmem [shape: f32[128], index: 1, kind: output, shape index: {}]  }
   0x1   :  { %v4_v0 = vld [vmem:[%s55_s0] sm:$0xf]  ;;  %s36_s0 = smov 96  }
   0x2   :  { %5 = vst [vmem:[#allocation1] sm:$0xf] %v4_v0 }
   0x9   :  { %v10_v1 = vld [vmem:[#allocation1 + $0x3] sm:$0x1]   ;;  %v22_v2 = vld [vmem:[#allocation1 + $0x1] sm:$0x1]   ;;  %v16_v3 = vld [vmem:[#allocation1 + $0x2] sm:$0x1]  }
   0xa   :  { %11 = vrot.lane.b32.xlu0 %v10_v1, %s36_s0  ;;  %23 = vrot.lane.b32.xlu1 %v22_v2, %s37_s8  ;;  %v6_v4 = vld [vmem:[#allocation1] sm:$0x1]  }
   0xb   :  { %8 = vst.msk [vmem:[#allocation0] sm:$0x1] %vm7_vm0, %v6_v4  }
  0x12   :  { %17 = vrot.lane.b32.xlu0 %v16_v3, %s38_s9 }
  0x7c   :  { %v12_v5 = vpop.permute.xlu0 %11   ;;  %v24_v6 = vpop.permute.xlu1 %23  }
  0x7d   :  { %14 = vst.msk [vmem:[#allocation0] sm:$0x1] %vm13_vm1, %v12_v5  }
  0x84   :  { %v18_v7 = vpop.permute.xlu0 %17  }
  0x85   :  { %20 = vst.msk [vmem:[#allocation0] sm:$0x1] %vm19_vm2, %v18_v7  }
  0x86   :  { %26 = vst.msk [vmem:[#allocation0] sm:$0x1] %vm25_vm3, %v24_v6  }
  0x8d   :  { %v29_v8 = vld [vmem:[#allocation0] sm:$0x1] }
  0x8e   :  { %32 = vst [vmem:[%s56_s1] sm:$0x1] %v29_v8 }

// kernel: tile.28
= control target key start
LH: loop header
LB: loop body
LE: loop exit
PB: predicated region body
PF: predicated region fallthrough
CT: control target
= control target key end

     0   :  { %s22_s0 = inlined_call_operand.vmem [shape: f32[32], index: 0, kind: input, shape index: {}]   ;;  %s23_s1 = inlined_call_operand.vmem [shape: f32[8,32], index: 1, kind: output, shape index: {}]  }
   0x1   :  { %v4_v0 = vld [vmem:[%s22_s0] ss:$0 sm:$0xff] }
   0x2   :  { %5 = vst [vmem:[%s23_s1] sm:$0xff] %v4_v0 }

// kernel: tile.29
= control target key start
LH: loop header
LB: loop body
LE: loop exit
PB: predicated region body
PF: predicated region fallthrough
CT: control target
= control target key end

     0   :  { %s7_s6 = smov 3  ;;  %s39_s9 = smov 96   ;;  %vm4_vm0 = vcmask 261120   ;;  %vm11_vm1 = vcmask 1048320   ;;  %vm18_vm2 = vcmask 785920   ;;  %vm25_vm3 = vcmask 523520   ;;  %s67_s0 = inlined_call_operand.vmem [shape: f32[8,32], index: 0, kind: input, shape index: {}]   ;;  %s68_s1 = inlined_call_operand.vmem [shape: f32[256], index: 1, kind: output, shape index: {}]  }
   0x1   :  { %v33_v0 = vld [vmem:[%s67_s0 + $0x3] ss:$4 sm:%s7_s6]   ;;  %s21_s10 = smov 3  ;;  %s14_s13 = smov 3 }
   0x2   :  { %9 = vrot.lane.b32.xlu0 %v33_v0, %s39_s9  ;;  %v35_v1 = vld [vmem:[%s67_s0 + $0x1] ss:$4 sm:%s21_s10]   ;;  %s40_s14 = smov 32   ;;  %s41_s17 = smov 64  }
   0x3   :  { %23 = vrot.lane.b32.xlu1 %v35_v1, %s40_s14  ;;  %v34_v2 = vld [vmem:[%s67_s0 + $0x2] ss:$4 sm:%s14_s13]   ;;  %s2_s18 = smov 3 }
   0x4   :  { %v3_v3 = vld [vmem:[%s67_s0] ss:$4 sm:%s2_s18]  }
   0x5   :  { %5 = vst.msk [vmem:[#allocation0] sm:$0x3] %vm4_vm0, %v3_v3  }
   0xa   :  { %16 = vrot.lane.b32.xlu0 %v34_v2, %s41_s17 }
  0x74   :  { %v10_v4 = vpop.permute.xlu0 %9  }
  0x75   :  { %12 = vst.msk [vmem:[#allocation0] sm:$0x3] %vm11_vm1, %v10_v4   ;;  %v24_v5 = vpop.permute.xlu1 %23  }
  0x7c   :  { %v17_v6 = vpop.permute.xlu0 %16  }
  0x7d   :  { %19 = vst.msk [vmem:[#allocation0] sm:$0x3] %vm18_vm2, %v17_v6  }
  0x7e   :  { %26 = vst.msk [vmem:[#allocation0] sm:$0x3] %vm25_vm3, %v24_v5  }
  0x85   :  { %v29_v7 = vld [vmem:[#allocation0] sm:$0x3] }
  0x86   :  { %32 = vst [vmem:[%s68_s1] sm:$0x3] %v29_v7 }

// kernel: _lambda_.1
= control target key start
LH: loop header
LB: loop body
LE: loop exit
PB: predicated region body
PF: predicated region fallthrough
CT: control target
= control target key end

     0   :  { %s5986_s30 = smov 0   ;;  %s8518_s0 = inlined_call_operand.vmem [shape: bf16[32,128], index: 0, kind: input, shape index: {}]   ;;  %s8519_s1 = inlined_call_operand.vmem [shape: bf16[128,384], index: 1, kind: input, shape index: {}]   ;;  %s8520_s2 = inlined_call_operand.vmem [shape: f32[1,384], index: 2, kind: input, shape index: {}]   ;;  %s8521_s3 = inlined_call_operand.vmem [shape: bf16[128,768], index: 3, kind: input, shape index: {}]   ;;  %s8522_s4 = inlined_call_operand.vmem [shape: f32[1,768], index: 4, kind: input, shape index: {}]   ;;  %s8523_s5 = inlined_call_operand.vmem [shape: bf16[256,1536], index: 5, kind: input, shape index: {}]   ;;  %s8524_s6 = inlined_call_operand.vmem [shape: f32[1,1536], index: 6, kind: input, shape index: {}]   ;;  %s8525_s7 = inlined_call_operand.vmem [shape: bf16[512,384], index: 7, kind: input, shape index: {}]   ;;  %s8526_s8 = inlined_call_operand.vmem [shape: f32[1,384], index: 8, kind: input, shape index: {}]   ;;  %s8527_s9 = inlined_call_operand.vmem [shape: f32[128,128], index: 9, kind: output, shape index: {}]  }
   0x1 LB: > { %s3990_s10 = sadd.s32 4294967295, %s5933_s30   ;;  %p3994_p0 = scmp.ge.s32.totalorder %s5933_s30, 1  ;;  %s5933_s30 = sphi %s5986_s30, %s19_s30  }
   0x2   : > { %p288_p1 = scmp.lt.s32.totalorder %s5933_s30, 3 }
   0x4   : > { %p289_p2 = pnand %p3994_p0, %p288_p1 }
   0x5   : > { %s3995_s18 = sshll.u32 (!%p289_p2), %s3990_s10, 1 }
   0x6   : > { %292 = sbr.rel (%p289_p2) target bundleno = 931 (0x3a3), region = 56  ;;  %p325_p3 = scmp.lt.s32.totalorder (!%p289_p2), %s3995_s18, 3 }
   0xb   : > { %v4098_v0 = vld [vmem:[%s8519_s1 + $0xb0] sm:$0xf]  ;;  %v5514_v1 = vld [vmem:[%s8519_s1 + $0xb8] sm:$0xf0]  ;;  %v5512_v2 = vld [vmem:[%s8519_s1 + $0xac] sm:$0xf] }
   0xc   : > { %v4099_v3 = vor.u32 %v5514_v1, %v4098_v0  ;;  %v4092_v4 = vld [vmem:[%s8519_s1 + $0xb4] sm:$0xf0]  ;;  %v5511_v6 = vld [vmem:[%s8519_s1 + $0xa0] sm:$0xf0]  ;;  %v4090_v8 = vld [vmem:[%s8519_s1 + $0xa8] sm:$0xf] }
   0xd   : > { %v4086_v5 = vld [vmem:[%s8519_s1 + $0x98] sm:$0xf]  ;;  %v4095_v7 = vor.u32 %v5512_v2, %v4092_v4  ;;  %v5513_v9 = vld [vmem:[%s8519_s1 + $0xb0] sm:$0xf0]  ;;  %v4080_v13 = vld [vmem:[%s8519_s1 + $0x9c] sm:$0xf0] }
   0xe   : > { %v5509_v10 = vld [vmem:[%s8519_s1 + $0x94] sm:$0xf]  ;;  %545 = vmatpush.bf16.msra.mxu2 %v4099_v3  ;;  %v4087_v11 = vor.u32 %v5511_v6, %v4086_v5  ;;  %v4091_v12 = vor.u32 %v5513_v9, %v4090_v8  ;;  %v4074_v14 = vld [vmem:[%s8519_s1 + $0x80] sm:$0xf]  ;;  %v5508_v16 = vld [vmem:[%s8519_s1 + $0x88] sm:$0xf0] }
   0xf   : > { %531 = vmatpush.bf16.msra.mxu1 %v4095_v7  ;;  %v4083_v15 = vor.u32 %v5509_v10, %v4080_v13  ;;  %v4078_v17 = vld [vmem:[%s8519_s1 + $0x90] sm:$0xf]  ;;  %v5510_v18 = vld [vmem:[%s8519_s1 + $0x98] sm:$0xf0]  ;;  %v4068_v21 = vld [vmem:[%s8519_s1 + $0x84] sm:$0xf0]  ;;  %v4075_v24 = vor.u32 %v5508_v16, %v4074_v14 }
  0x10   : > { %517 = vmatpush.bf16.msra.mxu0 %v4091_v12  ;;  %v4079_v19 = vor.u32 %v5510_v18, %v4078_v17  ;;  %v5506_v20 = vld [vmem:[%s8519_s1 + $0x7c] sm:$0xf]  ;;  %v4066_v22 = vld [vmem:[%s8519_s1 + $0x78] sm:$0xf]  ;;  %v5507_v23 = vld [vmem:[%s8519_s1 + $0x80] sm:$0xf0] }
  0x11   : > { %v4071_v25 = vor.u32 %v5506_v20, %v4068_v21  ;;  %v4062_v26 = vld [vmem:[%s8519_s1 + $0x68] sm:$0xf]  ;;  %v5505_v27 = vld [vmem:[%s8519_s1 + $0x70] sm:$0xf0]  ;;  %v4067_v28 = vor.u32 %v5507_v23, %v4066_v22  ;;  %v5503_v29 = vld [vmem:[%s8519_s1 + $0x64] sm:$0xf] }
  0x12   : > { %546 = vmatpush.bf16.msra.mxu2 %v4087_v11  ;;  %v4056_v30 = vld [vmem:[%s8519_s1 + $0x6c] sm:$0xf0]  ;;  %v4054_v31 = vld [vmem:[%s8519_s1 + $0x60] sm:$0xf]  ;;  %v5504_v32 = vld [vmem:[%s8519_s1 + $0x68] sm:$0xf0]  ;;  %v4063_v33 = vor.u32 %v5505_v27, %v4062_v26 }
  0x13   : > { %532 = vmatpush.bf16.msra.mxu1 %v4083_v15  ;;  %v4059_v34 = vor.u32 %v5503_v29, %v4056_v30  ;;  %v4050_v35 = vld [vmem:[%s8519_s1 + $0x50] sm:$0xf]  ;;  %v5502_v36 = vld [vmem:[%s8519_s1 + $0x58] sm:$0xf0]  ;;  %v4055_v37 = vor.u32 %v5504_v32, %v4054_v31  ;;  %v5500_v38 = vld [vmem:[%s8519_s1 + $0x4c] sm:$0xf] }
  0x14   : > { %518 = vmatpush.bf16.msra.mxu0 %v4079_v19  ;;  %v4044_v39 = vld [vmem:[%s8519_s1 + $0x54] sm:$0xf0]  ;;  %v4042_v40 = vld [vmem:[%s8519_s1 + $0x48] sm:$0xf]  ;;  %v5501_v41 = vld [vmem:[%s8519_s1 + $0x50] sm:$0xf0]  ;;  %v4051_v42 = vor.u32 %v5502_v36, %v4050_v35 }
  0x15   : > { %v4038_v43 = vld [vmem:[%s8519_s1 + $0x38] sm:$0xf]  ;;  %v5499_v44 = vld [vmem:[%s8519_s1 + $0x40] sm:$0xf0]  ;;  %v4047_v45 = vor.u32 %v5500_v38, %v4044_v39  ;;  %v5497_v46 = vld [vmem:[%s8519_s1 + $0x34] sm:$0xf]  ;;  %v4043_v48 = vor.u32 %v5501_v41, %v4042_v40 }
  0x16   : > { %547 = vmatpush.bf16.msra.mxu2 %v4075_v24  ;;  %v4274_v47 = vld [vmem:[%s8521_s3 + $0x150] sm:$0xf]  ;;  %v4032_v49 = vld [vmem:[%s8519_s1 + $0x3c] sm:$0xf0]  ;;  %v5561_v51 = vld [vmem:[%s8521_s3 + $0x164] sm:$0xf0]  ;;  %v4039_v56 = vor.u32 %v5499_v44, %v4038_v43 }
  0x17   : > { %533 = vmatpush.bf16.msra.mxu1 %v4071_v25  ;;  %v4030_v50 = vld [vmem:[%s8519_s1 + $0x30] sm:$0xf]  ;;  %v5498_v52 = vld [vmem:[%s8519_s1 + $0x38] sm:$0xf0]  ;;  %v4275_v53 = vor.u32 %v5561_v51, %v4274_v47  ;;  %v4250_v54 = vld [vmem:[%s8521_s3 + $0x120] sm:$0xf]  ;;  %v4035_v57 = vor.u32 %v5497_v46, %v4032_v49 }
  0x18   : > { %519 = vmatpush.bf16.msra.mxu0 %v4067_v28  ;;  %v5555_v55 = vld [vmem:[%s8521_s3 + $0x134] sm:$0xf0]  ;;  %v4026_v58 = vld [vmem:[%s8519_s1 + $0x20] sm:$0xf]  ;;  %v5496_v59 = vld [vmem:[%s8519_s1 + $0x28] sm:$0xf0]  ;;  %v4031_v61 = vor.u32 %v5498_v52, %v4030_v50 }
  0x19   : > { %s8533_s18 = smov (!%p325_p3, %s3995_s18), 3  ;;  %900 = vmatpush.bf16.msra.mxu3 %v4275_v53  ;;  %v4251_v60 = vor.u32 %v5555_v55, %v4250_v54  ;;  %v5494_v62 = vld [vmem:[%s8519_s1 + $0x1c] sm:$0xf]  ;;  %v4020_v63 = vld [vmem:[%s8519_s1 + $0x24] sm:$0xf0]  ;;  %v4027_v2 = vor.u32 %v5496_v59, %v4026_v58 }
  0x1a   : > { %548 = vmatpush.bf16.msra.mxu2 %v4063_v33  ;;  %v4018_v0 = vld [vmem:[%s8519_s1 + $0x18] sm:$0xf]  ;;  %v5495_v1 = vld [vmem:[%s8519_s1 + $0x20] sm:$0xf0]  ;;  %v4023_v3 = vor.u32 %v5494_v62, %v4020_v63  ;;  %v4014_v4 = vld [vmem:[%s8519_s1 + $0x8] sm:$0xf] }
  0x1b   : > { %534 = vmatpush.bf16.msra.mxu1 %v4059_v34  ;;  %v5493_v5 = vld [vmem:[%s8519_s1 + $0x10] sm:$0xf0]  ;;  %s3996_s14 = sshll.u32 %s8533_s18, 2  ;;  %v4019_v6 = vor.u32 %v5495_v1, %v4018_v0  ;;  %v5491_v7 = vld [vmem:[%s8519_s1 + $0x4] sm:$0xf]  ;;  %s3997_s18 = sshll.u32 %s3990_s10, 3 }
  0x1c   : > { %520 = vmatpush.bf16.msra.mxu0 %v4055_v37  ;;  %v4008_v8 = vld [vmem:[%s8519_s1 + $0xc] sm:$0xf0]  ;;  %v4006_v9 = vld [vmem:[%s8519_s1] sm:$0xf]  ;;  %v5492_v10 = vld [vmem:[%s8519_s1 + $0x8] sm:$0xf0]  ;;  %v4015_v11 = vor.u32 %v5493_v5, %v4014_v4  ;;  %s328_s25 = scalar_lea.vmem %s8518_s0, %s3996_s14 }
  0x1d   : > { %901 = vmatpush.bf16.msra.mxu3 %v4251_v60  ;;  %v5558_v12 = vld [vmem:[%s8521_s3 + $0x154] sm:$0xf]  ;;  %v4276_v13 = vld [vmem:[%s8521_s3 + $0x168] sm:$0xf0]  ;;  %v4011_v14 = vor.u32 %v5491_v7, %v4008_v8  ;;  %v4007_v15 = vor.u32 %v5492_v10, %v4006_v9  ;;  %v5490_v16 = vld [vmem:[%s328_s25] sm:$0xff]  ;;  %p331_p4 = scmp.lt.s32.totalorder %s3997_s18, 15 }
  0x1e   : > { %549 = vmatpush.bf16.msra.mxu2 %v4051_v42  ;;  %v4279_v17 = vor.u32 %v5558_v12, %v4276_v13  ;;  %v5552_v18 = vld [vmem:[%s8521_s3 + $0x124] sm:$0xf]  ;;  %v4252_v19 = vld [vmem:[%s8521_s3 + $0x138] sm:$0xf0]  ;;  %v4226_v21 = vld [vmem:[%s8521_s3 + $0xf0] sm:$0xf] }
  0x1f   : > { %535 = vmatpush.bf16.msra.mxu1 %v4047_v45  ;;  %v4255_v20 = vor.u32 %v5552_v18, %v4252_v19  ;;  %v5549_v22 = vld [vmem:[%s8521_s3 + $0x104] sm:$0xf0]  ;;  %v5546_v23 = vld [vmem:[%s8521_s3 + $0xf4] sm:$0xf]  ;;  %v4228_v25 = vld [vmem:[%s8521_s3 + $0x108] sm:$0xf0] }
  0x20   : > { %521 = vmatpush.bf16.msra.mxu0 %v4043_v48  ;;  %v4227_v24 = vor.u32 %v5549_v22, %v4226_v21  ;;  %v4231_v26 = vor.u32 %v5546_v23, %v4228_v25  ;;  %v4202_v27 = vld [vmem:[%s8521_s3 + $0xc0] sm:$0xf]  ;;  %v5543_v28 = vld [vmem:[%s8521_s3 + $0xd4] sm:$0xf0]  ;;  %v5540_v30 = vld [vmem:[%s8521_s3 + $0xc4] sm:$0xf] }
  0x21   : > { %v4203_v29 = vor.u32 %v5543_v28, %v4202_v27  ;;  %v4204_v31 = vld [vmem:[%s8521_s3 + $0xd8] sm:$0xf0]  ;;  %v4282_v32 = vld [vmem:[%s8521_s3 + $0x158] sm:$0xf]  ;;  %v5562_v34 = vld [vmem:[%s8521_s3 + $0x16c] sm:$0xf0] }
  0x22   : > { %550 = vmatpush.bf16.msra.mxu2 %v4039_v56  ;;  %902 = vmatpush.bf16.msra.mxu3 %v4227_v24  ;;  %v4207_v33 = vor.u32 %v5540_v30, %v4204_v31  ;;  %v4283_v35 = vor.u32 %v5562_v34, %v4282_v32  ;;  %v5559_v36 = vld [vmem:[%s8521_s3 + $0x15c] sm:$0xf]  ;;  %v4284_v37 = vld [vmem:[%s8521_s3 + $0x170] sm:$0xf0]  ;;  %v4178_v39 = vld [vmem:[%s8521_s3 + $0x90] sm:$0xf] }
  0x23   : > { %536 = vmatpush.bf16.msra.mxu1 %v4035_v57  ;;  %v4287_v38 = vor.u32 %v5559_v36, %v4284_v37  ;;  %v5537_v40 = vld [vmem:[%s8521_s3 + $0xa4] sm:$0xf0]  ;;  %v5534_v42 = vld [vmem:[%s8521_s3 + $0x94] sm:$0xf]  ;;  %v4180_v43 = vld [vmem:[%s8521_s3 + $0xa8] sm:$0xf0] }
  0x24   : > { %522 = vmatpush.bf16.msra.mxu0 %v4031_v61  ;;  %v4179_v41 = vor.u32 %v5537_v40, %v4178_v39  ;;  %v4258_v44 = vld [vmem:[%s8521_s3 + $0x128] sm:$0xf]  ;;  %v4183_v45 = vor.u32 %v5534_v42, %v4180_v43  ;;  %v5556_v46 = vld [vmem:[%s8521_s3 + $0x13c] sm:$0xf0]  ;;  %v5553_v47 = vld [vmem:[%s8521_s3 + $0x12c] sm:$0xf] }
  0x25   : > { %v4260_v48 = vld [vmem:[%s8521_s3 + $0x140] sm:$0xf0]  ;;  %v4259_v49 = vor.u32 %v5556_v46, %v4258_v44  ;;  %v4154_v51 = vld [vmem:[%s8521_s3 + $0x60] sm:$0xf]  ;;  %v5531_v52 = vld [vmem:[%s8521_s3 + $0x74] sm:$0xf0] }
  0x26   : > { %551 = vmatpush.bf16.msra.mxu2 %v4027_v2  ;;  %903 = vmatpush.bf16.msra.mxu3 %v4203_v29  ;;  %v4263_v50 = vor.u32 %v5553_v47, %v4260_v48  ;;  %v5528_v53 = vld [vmem:[%s8521_s3 + $0x64] sm:$0xf]  ;;  %v4155_v54 = vor.u32 %v5531_v52, %v4154_v51  ;;  %v4156_v55 = vld [vmem:[%s8521_s3 + $0x78] sm:$0xf0]  ;;  %v4234_v56 = vld [vmem:[%s8521_s3 + $0xf8] sm:$0xf] }
  0x27   : > { %537 = vmatpush.bf16.msra.mxu1 %v4023_v3  ;;  %v5550_v57 = vld [vmem:[%s8521_s3 + $0x10c] sm:$0xf0]  ;;  %v4159_v58 = vor.u32 %v5528_v53, %v4156_v55  ;;  %v5547_v60 = vld [vmem:[%s8521_s3 + $0xfc] sm:$0xf]  ;;  %v4236_v61 = vld [vmem:[%s8521_s3 + $0x110] sm:$0xf0] }
  0x28   : > { %523 = vmatpush.bf16.msra.mxu0 %v4019_v6  ;;  %v4235_v59 = vor.u32 %v5550_v57, %v4234_v56  ;;  %v4239_v62 = vor.u32 %v5547_v60, %v4236_v61  ;;  %v4130_v63 = vld [vmem:[%s8521_s3 + $0x30] sm:$0xf]  ;;  %v5525_v0 = vld [vmem:[%s8521_s3 + $0x44] sm:$0xf0]  ;;  %v5522_v1 = vld [vmem:[%s8521_s3 + $0x34] sm:$0xf] }
  0x29   : > { %v4131_v2 = vor.u32 %v5525_v0, %v4130_v63  ;;  %v4132_v3 = vld [vmem:[%s8521_s3 + $0x48] sm:$0xf0]  ;;  %v4210_v4 = vld [vmem:[%s8521_s3 + $0xc8] sm:$0xf]  ;;  %v5544_v5 = vld [vmem:[%s8521_s3 + $0xdc] sm:$0xf0] }
  0x2a   : > { %552 = vmatpush.bf16.msra.mxu2 %v4015_v11  ;;  %904 = vmatpush.bf16.msra.mxu3 %v4179_v41  ;;  %v4135_v6 = vor.u32 %v5522_v1, %v4132_v3  ;;  %v4211_v7 = vor.u32 %v5544_v5, %v4210_v4  ;;  %v5541_v8 = vld [vmem:[%s8521_s3 + $0xcc] sm:$0xf]  ;;  %v4212_v9 = vld [vmem:[%s8521_s3 + $0xe0] sm:$0xf0]  ;;  %v336_v11 = vlaneseq  ;;  %v4106_v12 = vld [vmem:[%s8521_s3] sm:$0xf] }
  0x2b   : > { %538 = vmatpush.bf16.msra.mxu1 %v4011_v14  ;;  %v4215_v10 = vor.u32 %v5541_v8, %v4212_v9  ;;  %v5519_v13 = vld [vmem:[%s8521_s3 + $0x14] sm:$0xf0]  ;;  %v5516_v14 = vld [vmem:[%s8521_s3 + $0x4] sm:$0xf]  ;;  %v5538_v18 = vld [vmem:[%s8521_s3 + $0xac] sm:$0xf0] }
  0x2c   : > { %524 = vmatpush.bf16.msra.mxu0 %v4007_v15  ;;  %v4107_v15 = vor.u32 %v5519_v13, %v4106_v12  ;;  %v5535_v21 = vld [vmem:[%s8521_s3 + $0x9c] sm:$0xf]  ;;  %v4188_v22 = vld [vmem:[%s8521_s3 + $0xb0] sm:$0xf0]  ;;  %v4290_v23 = vld [vmem:[%s8521_s3 + $0x160] sm:$0xf] }
  0x2d   : > { %553 = vmatmul.bf16.vlgmr.msra.gmra.mxu2 %v5490_v16  ;;  %v4191_v24 = vor.u32 %v5535_v21, %v4188_v22  ;;  %v5563_v25 = vld [vmem:[%s8521_s3 + $0x174] sm:$0xf0]  ;;  %v4292_v27 = vld [vmem:[%s8521_s3 + $0x178] sm:$0xf0]  ;;  %v337_v28 = vshrl.u32 %v336_v11, 7  ;;  %v5935_v5 = vmov 0.0  }
  0x2e   : > { %539 = vmatmul.bf16.vlgmr.msra.gmra.mxu1 %v5490_v16  ;;  %942 = vmatpush.bf16.msrb.mxu2 %v4287_v38  ;;  %v4291_v29 = vor.u32 %v5563_v25, %v4290_v23  ;;  %v4162_v31 = vld [vmem:[%s8521_s3 + $0x68] sm:$0xf]  ;;  %v5532_v32 = vld [vmem:[%s8521_s3 + $0x7c] sm:$0xf0]  ;;  %v4266_v36 = vld [vmem:[%s8521_s3 + $0x130] sm:$0xf] }
  0x2f   : > { %525 = vmatmul.bf16.vlgmr.msra.gmra.mxu0 %v5490_v16  ;;  %928 = vmatpush.bf16.msrb.mxu1 %v4283_v35  ;;  %v4108_v16 = vld [vmem:[%s8521_s3 + $0x18] sm:$0xf0]  ;;  %v4163_v34 = vor.u32 %v5532_v32, %v4162_v31  ;;  %v4164_v35 = vld [vmem:[%s8521_s3 + $0x80] sm:$0xf0]  ;;  %v5557_v37 = vld [vmem:[%s8521_s3 + $0x144] sm:$0xf0] }
  0x30   : > { %914 = vmatpush.bf16.msrb.mxu0 %v4279_v17  ;;  %905 = vmatpush.bf16.msra.mxu3 %v4155_v54  ;;  %v4186_v17 = vld [vmem:[%s8521_s3 + $0x98] sm:$0xf]  ;;  %v4111_v19 = vor.u32 %v5516_v14, %v4108_v16  ;;  %v6333_v38 = vld [vmem:[%s8520_s2] sm:$0x7]  ;;  %v4267_v40 = vor.u32 %v5557_v37, %v4266_v36  ;;  %v5554_v41 = vld [vmem:[%s8521_s3 + $0x134] sm:$0xf] }
  0x31   : > { %v4268_v42 = vld [vmem:[%s8521_s3 + $0x148] sm:$0xf0]  ;;  %v377_v43 = vperm.slane %v6333_v38, 0  ;;  %vm338_vm0 = vcmp.lt.s32.totalorder %v337_v28, 1  ;;  %v5526_v46 = vld [vmem:[%s8521_s3 + $0x4c] sm:$0xf0] }
  0x32   : > { %943 = vmatpush.bf16.msrb.mxu2 %v4263_v50  ;;  %v4271_v44 = vor.u32 %v5554_v41, %v4268_v42  ;;  %v5523_v47 = vld [vmem:[%s8521_s3 + $0x3c] sm:$0xf]  ;;  %v4242_v50 = vld [vmem:[%s8521_s3 + $0x100] sm:$0xf]  ;;  %v5551_v51 = vld [vmem:[%s8521_s3 + $0x114] sm:$0xf0] }
  0x33   : > { %929 = vmatpush.bf16.msrb.mxu1 %v4259_v49  ;;  %v4140_v49 = vld [vmem:[%s8521_s3 + $0x50] sm:$0xf0]  ;;  %v4243_v53 = vor.u32 %v5551_v51, %v4242_v50  ;;  %v5548_v54 = vld [vmem:[%s8521_s3 + $0x104] sm:$0xf]  ;;  %v4244_v55 = vld [vmem:[%s8521_s3 + $0x118] sm:$0xf0] }
  0x34   : > { %915 = vmatpush.bf16.msrb.mxu0 %v4255_v20  ;;  %906 = vmatpush.bf16.msra.mxu3 %v4131_v2  ;;  %v4187_v20 = vor.u32 %v5538_v18, %v4186_v17  ;;  %v4143_v52 = vor.u32 %v5523_v47, %v4140_v49  ;;  %v4114_v56 = vld [vmem:[%s8521_s3 + $0x8] sm:$0xf]  ;;  %v4247_v57 = vor.u32 %v5548_v54, %v4244_v55  ;;  %v4116_v60 = vld [vmem:[%s8521_s3 + $0x20] sm:$0xf0]  ;;  %v5542_v0 = vld [vmem:[%s8521_s3 + $0xd4] sm:$0xf] }
  0x35   : > { %v5545_v63 = vld [vmem:[%s8521_s3 + $0xe4] sm:$0xf0]  ;;  %v4220_v3 = vld [vmem:[%s8521_s3 + $0xe8] sm:$0xf0]  ;;  %v379_v9 = vperm.slane %v6333_v38, 2  ;;  %s8535_s18 = smov (!%p331_p4, %s3997_s18), 15 }
  0x36   : > { %944 = vmatpush.bf16.msrb.mxu2 %v4239_v62  ;;  %v4218_v62 = vld [vmem:[%s8521_s3 + $0xd0] sm:$0xf]  ;;  %v4194_v13 = vld [vmem:[%s8521_s3 + $0xa0] sm:$0xf]  ;;  %v5539_v14 = vld [vmem:[%s8521_s3 + $0xb4] sm:$0xf0] }
  0x37   : > { %930 = vmatpush.bf16.msrb.mxu1 %v4235_v59  ;;  %v5517_v59 = vld [vmem:[%s8521_s3 + $0xc] sm:$0xf]  ;;  %v4219_v2 = vor.u32 %v5545_v63, %v4218_v62  ;;  %v4195_v17 = vor.u32 %v5539_v14, %v4194_v13  ;;  %v5536_v18 = vld [vmem:[%s8521_s3 + $0xa4] sm:$0xf]  ;;  %v4170_v23 = vld [vmem:[%s8521_s3 + $0x70] sm:$0xf] }
  0x38   : > { %916 = vmatpush.bf16.msrb.mxu0 %v4231_v26  ;;  %907 = vmatpush.bf16.msra.mxu3 %v4107_v15  ;;  %v5560_v26 = vld [vmem:[%s8521_s3 + $0x164] sm:$0xf]  ;;  %v4119_v1 = vor.u32 %v5517_v59, %v4116_v60  ;;  %v5530_v25 = vld [vmem:[%s8521_s3 + $0x74] sm:$0xf]  ;;  %v4146_v32 = vld [vmem:[%s8521_s3 + $0x40] sm:$0xf] }
  0x39   : > { %v4295_v30 = vor.u32 %v5560_v26, %v4292_v27  ;;  %v4172_v26 = vld [vmem:[%s8521_s3 + $0x88] sm:$0xf0]  ;;  %v5524_v36 = vld [vmem:[%s8521_s3 + $0x44] sm:$0xf]  ;;  %v4148_v37 = vld [vmem:[%s8521_s3 + $0x58] sm:$0xf0] }
  0x3a   : > { %945 = vmatpush.bf16.msrb.mxu2 %v4215_v10  ;;  %v378_v10 = vperm.slane %v6333_v38, 1  ;;  %v4175_v31 = vor.u32 %v5530_v25, %v4172_v26  ;;  %v4122_v38 = vld [vmem:[%s8521_s3 + $0x10] sm:$0xf]  ;;  %v4124_v49 = vld [vmem:[%s8521_s3 + $0x28] sm:$0xf0]  ;;  %s3998_s10 = sshll.u32 %s8535_s18, 3 }
  0x3b   : > { %931 = vmatpush.bf16.msrb.mxu1 %v4211_v7  ;;  %v4223_v7 = vor.u32 %v5542_v0, %v4220_v3  ;;  %v4642_v59 = vld [vmem:[%s8523_s5 + $0x2a0] sm:$0xf]  ;;  %v5656_v60 = vld [vmem:[%s8523_s5 + $0x2cc] sm:$0xf0]  ;;  %s8413_s26 = scalar_lea.vmem %s8527_s9, %s3998_s10 }
  0x3c   : > { %917 = vmatpush.bf16.msrb.mxu0 %v4207_v33  ;;  %v5529_v33 = vld [vmem:[%s8521_s3 + $0x6c] sm:$0xf]  ;;  %956 = vmatpush.bf16.msrb.mxu3 %v4291_v29  ;;  %v4643_v63 = vor.u32 %v5656_v60, %v4642_v59  ;;  %v5752_v0 = vld [vmem:[%s8523_s5 + $0x5cc] sm:$0xf0]  ;;  %v4978_v14 = vld [vmem:[%s8523_s5 + $0x540] sm:$0xf] }
  0x3d   : > { %v4167_v39 = vor.u32 %v5529_v33, %v4164_v35  ;;  %v5527_v33 = vld [vmem:[%s8521_s3 + $0x54] sm:$0xf0]  ;;  %v5644_v13 = vld [vmem:[%s8523_s5 + $0x26c] sm:$0xf0]  ;;  %v4930_v26 = vld [vmem:[%s8523_s5 + $0x4e0] sm:$0xf] }
  0x3e   : > { %946 = vmatpush.bf16.msrb.mxu2 %v4191_v24  ;;  %v5533_v24 = vld [vmem:[%s8521_s3 + $0x84] sm:$0xf0]  ;;  %v4147_v41 = vor.u32 %v5527_v33, %v4146_v32  ;;  %v5632_v25 = vld [vmem:[%s8523_s5 + $0x20c] sm:$0xf0]  ;;  %v5722_v33 = vld [vmem:[%s8523_s5 + $0x4e4] sm:$0xf] }
  0x3f   : > { %932 = vmatpush.bf16.msrb.mxu1 %v4187_v20  ;;  %v4171_v29 = vor.u32 %v5533_v24, %v4170_v23  ;;  %v4546_v24 = vld [vmem:[%s8523_s5 + $0x1e0] sm:$0xf] }
  0x40   : > { %918 = vmatpush.bf16.msrb.mxu0 %v4183_v45  ;;  %v4138_v45 = vld [vmem:[%s8521_s3 + $0x38] sm:$0xf]  ;;  %957 = vmatpush.bf16.msrb.mxu3 %v4267_v40  ;;  %v4402_v60 = vld [vmem:[%s8523_s5 + $0xc0] sm:$0xf] }
  0x41   : > { %v4139_v48 = vor.u32 %v5526_v46, %v4138_v45 }
  0x42   : > { %947 = vmatpush.bf16.msrb.mxu2 %v4167_v39 }
  0x43   : > { %933 = vmatpush.bf16.msrb.mxu1 %v4163_v34 }
  0x44   : > { %919 = vmatpush.bf16.msrb.mxu0 %v4159_v58  ;;  %v5520_v58 = vld [vmem:[%s8521_s3 + $0x1c] sm:$0xf0]  ;;  %958 = vmatpush.bf16.msrb.mxu3 %v4243_v53 }
  0x45   : > { %v4115_v61 = vor.u32 %v5520_v58, %v4114_v56 }
  0x46   : > { %948 = vmatpush.bf16.msrb.mxu2 %v4143_v52 }
  0x47   : > { %934 = vmatpush.bf16.msrb.mxu1 %v4139_v48  ;;  %v5518_v48 = vld [vmem:[%s8521_s3 + $0x14] sm:$0xf] }
  0x48   : > { %920 = vmatpush.bf16.msrb.mxu0 %v4135_v6  ;;  %v3999_v6 = vsel %vm338_vm0, 1.0, %v5935_v5  ;;  %959 = vmatpush.bf16.msrb.mxu3 %v4219_v2  ;;  %v4127_v54 = vor.u32 %v5518_v48, %v4124_v49  ;;  %v4644_v5 = vld [vmem:[%s8523_s5 + $0x2d0] sm:$0xf0]  ;;  %v4450_v48 = vld [vmem:[%s8523_s5 + $0x120] sm:$0xf] }
  0x49   : > { %v6395_v12 = vrot.slane %v3999_v6, 7  ;;  %v5746_v6 = vld [vmem:[%s8523_s5 + $0x5a4] sm:$0xf]  ;;  %v5608_v49 = vld [vmem:[%s8523_s5 + $0x14c] sm:$0xf0] }
  0x4a   : > { %949 = vmatpush.bf16.msrb.mxu2 %v4119_v1 }
  0x4b   : > { %935 = vmatpush.bf16.msrb.mxu1 %v4115_v61  ;;  %v5026_v61 = vld [vmem:[%s8523_s5 + $0x5a0] sm:$0xf] }
  0x4c   : > { %921 = vmatpush.bf16.msrb.mxu0 %v4111_v19  ;;  %v4196_v19 = vld [vmem:[%s8521_s3 + $0xb8] sm:$0xf0]  ;;  %960 = vmatpush.bf16.msrb.mxu3 %v4195_v17  ;;  %v5027_v1 = vor.u32 %v5752_v0, %v5026_v61  ;;  %v5638_v17 = vld [vmem:[%s8523_s5 + $0x244] sm:$0xf]  ;;  %v5596_v61 = vld [vmem:[%s8523_s5 + $0xec] sm:$0xf0] }
  0x4d   : > { %v4199_v22 = vor.u32 %v5536_v18, %v4196_v19  ;;  %v4596_v19 = vld [vmem:[%s8523_s5 + $0x270] sm:$0xf0]  ;;  %v5692_v0 = vld [vmem:[%s8523_s5 + $0x3ec] sm:$0xf0] }
  0x4e   : > { %2262 = vmatpush.bf16.msra.mxu2 %v5027_v1  ;;  %v5590_v1 = vld [vmem:[%s8523_s5 + $0xc4] sm:$0xf] }
  0x4f   : > { %2248 = vmatpush.bf16.msra.mxu1 %v4643_v63  ;;  %v4403_v63 = vor.u32 %v5596_v61, %v4402_v60  ;;  %v4554_v60 = vld [vmem:[%s8523_s5 + $0x1e8] sm:$0xf]  ;;  %v5633_v61 = vld [vmem:[%s8523_s5 + $0x214] sm:$0xf0] }
  0x50   : > { %970 = vmatpush.bf16.msra.mxu0 %v4295_v30  ;;  %961 = vmatpush.bf16.msrb.mxu3 %v4171_v29  ;;  %v5626_v29 = vld [vmem:[%s8523_s5 + $0x1e4] sm:$0xf] }
  0x54   : > { %971 = vmatpush.bf16.msra.mxu0 %v4271_v44  ;;  %v4151_v44 = vor.u32 %v5524_v36, %v4148_v37  ;;  %962 = vmatpush.bf16.msrb.mxu3 %v4147_v41  ;;  %v4498_v36 = vld [vmem:[%s8523_s5 + $0x180] sm:$0xf]  ;;  %v5620_v37 = vld [vmem:[%s8523_s5 + $0x1ac] sm:$0xf0] }
  0x55   : > { %v5716_v41 = vld [vmem:[%s8523_s5 + $0x4ac] sm:$0xf0] }
  0x58   : > { %972 = vmatpush.bf16.msra.mxu0 %v4247_v57 }
  0x5c   : > { %973 = vmatpush.bf16.msra.mxu0 %v4223_v7  ;;  %v5028_v7 = vld [vmem:[%s8523_s5 + $0x5d0] sm:$0xf0] }
  0x60   : > { %974 = vmatpush.bf16.msra.mxu0 %v4199_v22  ;;  %v4599_v22 = vor.u32 %v5638_v17, %v4596_v19  ;;  %v4740_v19 = vld [vmem:[%s8523_s5 + $0x390] sm:$0xf0] }
  0x64   : > { %975 = vmatpush.bf16.msra.mxu0 %v4175_v31 }
  0x68   : > { %976 = vmatpush.bf16.msra.mxu0 %v4151_v44  ;;  %v4500_v44 = vld [vmem:[%s8523_s5 + $0x1b0] sm:$0xf0] }
  0x6c   : > { %977 = vmatpush.bf16.msra.mxu0 %v4127_v54  ;;  %v4452_v54 = vld [vmem:[%s8523_s5 + $0x150] sm:$0xf0] }
  0xab   : > { %v540_v15 = vpop.f32.mrf.mxu1 }
  0xac   : > { %v526_v4 = vpop.f32.mrf.mxu0  ;;  %v541_v27 = vadd.f32 %v540_v15, %v378_v10 }
  0xad   : > { %v527_v8 = vadd.f32 %v526_v4, %v377_v43  ;;  %v5650_v4 = vld [vmem:[%s8523_s5 + $0x2a4] sm:$0xf] }
  0xaf   : > { %v559_v11 = vmax.f32 %v527_v8, 0.0 }
  0xb0   : > { %v554_v16 = vpop.f32.mrf.mxu2 }
  0xb1   : > { %v560_v20 = vpack.c.bf16 %v559_v11, %v559_v11  ;;  %v555_v21 = vadd.f32 %v554_v16, %v379_v9  ;;  %v4594_v11 = vld [vmem:[%s8523_s5 + $0x240] sm:$0xf]  ;;  %v5740_v16 = vld [vmem:[%s8523_s5 + $0x56c] sm:$0xf0] }
  0xb2   : > { %v4595_v15 = vor.u32 %v5644_v13, %v4594_v11  ;;  %v4979_v18 = vor.u32 %v5740_v16, %v4978_v14  ;;  %v5680_v13 = vld [vmem:[%s8523_s5 + $0x38c] sm:$0xf0]  ;;  %v5578_v14 = vld [vmem:[%s8523_s5 + $0x64] sm:$0xf] }
  0xb3   : > { %561 = vst [vmem:[#allocation2] sm:$0x1] %v560_v20  ;;  %v565_v28 = vmul.f32 %v6395_v12, %v555_v21  ;;  %v542_v50 = vpop.f32.mrf.mxu1  ;;  %v5734_v20 = vld [vmem:[%s8523_s5 + $0x544] sm:$0xf]  ;;  %v4980_v21 = vld [vmem:[%s8523_s5 + $0x570] sm:$0xf0] }
  0xb4   : > { %v528_v30 = vpop.f32.mrf.mxu0  ;;  %v543_v56 = vadd.f32 %v542_v50, %v378_v10  ;;  %v5031_v10 = vor.u32 %v5746_v6, %v5028_v7  ;;  %2249 = vmatpush.bf16.msra.mxu1 %v4595_v15  ;;  %v4983_v23 = vor.u32 %v5734_v20, %v4980_v21  ;;  %2263 = vmatpush.bf16.msra.mxu2 %v4979_v18  ;;  %v4834_v50 = vld [vmem:[%s8523_s5 + $0x420] sm:$0xf]  ;;  %v4356_v15 = vld [vmem:[%s8523_s5 + $0x90] sm:$0xf0]  ;;  %v5674_v18 = vld [vmem:[%s8523_s5 + $0x364] sm:$0xf] }
  0xb5   : > { %v567_v34 = vrot.slane %v565_v28, 1  ;;  %v529_v35 = vadd.f32 %v528_v30, %v377_v43  ;;  %v5521_v43 = vld [vmem:[%s8521_s3 + $0x24] sm:$0xf0]  ;;  %v5728_v28 = vld [vmem:[%s8523_s5 + $0x50c] sm:$0xf0]  ;;  %v4359_v17 = vor.u32 %v5578_v14, %v4356_v15  ;;  %v4743_v20 = vor.u32 %v5674_v18, %v4740_v19 }
  0xb6   : > { %v4123_v53 = vor.u32 %v5521_v43, %v4122_v38  ;;  %v4548_v30 = vld [vmem:[%s8523_s5 + $0x210] sm:$0xf0]  ;;  %v4931_v31 = vor.u32 %v5728_v28, %v4930_v26  ;;  %v4306_v21 = vld [vmem:[%s8523_s5] sm:$0xf]  ;;  %v5566_v26 = vld [vmem:[%s8523_s5 + $0x4] sm:$0xf] }
  0xb7   : > { %v569_v39 = vadd.f32 %v567_v34, %v541_v27  ;;  %v576_v40 = vmax.f32 %v529_v35, 0.0  ;;  %v4547_v27 = vor.u32 %v5632_v25, %v4546_v24  ;;  %v4551_v32 = vor.u32 %v5626_v29, %v4548_v30  ;;  %v4932_v34 = vld [vmem:[%s8523_s5 + $0x510] sm:$0xf0]  ;;  %v5668_v25 = vld [vmem:[%s8523_s5 + $0x32c] sm:$0xf0] }
  0xb8   : > { %v556_v42 = vpop.f32.mrf.mxu2  ;;  %963 = vmatpush.bf16.msrb.mxu3 %v4123_v53  ;;  %v4935_v35 = vor.u32 %v5722_v33, %v4932_v34  ;;  %2264 = vmatpush.bf16.msra.mxu2 %v4931_v31  ;;  %v5602_v53 = vld [vmem:[%s8523_s5 + $0x124] sm:$0xf]  ;;  %v4692_v31 = vld [vmem:[%s8523_s5 + $0x330] sm:$0xf0]  ;;  %v5657_v34 = vld [vmem:[%s8523_s5 + $0x2d4] sm:$0xf0] }
  0xb9   : > { %v570_v45 = vmax.f32 %v569_v39, 0.0  ;;  %v577_v46 = vpack.c.bf16 %v576_v40, %v576_v40  ;;  %v557_v47 = vadd.f32 %v556_v42, %v379_v9  ;;  %v4647_v9 = vor.u32 %v5650_v4, %v4644_v5  ;;  %2250 = vmatpush.bf16.msra.mxu1 %v4547_v27  ;;  %v4882_v39 = vld [vmem:[%s8523_s5 + $0x480] sm:$0xf]  ;;  %v5614_v42 = vld [vmem:[%s8523_s5 + $0x184] sm:$0xf] }
  0xba   : > { %v4499_v40 = vor.u32 %v5620_v37, %v4498_v36  ;;  %v4883_v38 = vor.u32 %v5716_v41, %v4882_v39  ;;  %v4503_v43 = vor.u32 %v5614_v42, %v4500_v44  ;;  %v5686_v4 = vld [vmem:[%s8523_s5 + $0x3c4] sm:$0xf]  ;;  %v4788_v5 = vld [vmem:[%s8523_s5 + $0x3f0] sm:$0xf0]  ;;  %v5753_v36 = vld [vmem:[%s8523_s5 + $0x5d4] sm:$0xf0] }
  0xbb   : > { %v571_v51 = vpack.c.bf16 %v570_v45, %v570_v45  ;;  %578 = vst [vmem:[#allocation2 + $0x4] sm:$0x1] %v577_v46  ;;  %v579_v52 = vmul.f32 %v6395_v12, %v557_v47  ;;  %v5710_v45 = vld [vmem:[%s8523_s5 + $0x484] sm:$0xf]  ;;  %v4884_v46 = vld [vmem:[%s8523_s5 + $0x4b0] sm:$0xf0]  ;;  %v4791_v7 = vor.u32 %v5686_v4, %v4788_v5 }
  0xbc   : > { %v4887_v47 = vor.u32 %v5710_v45, %v4884_v46  ;;  %2265 = vmatpush.bf16.msra.mxu2 %v4883_v38  ;;  %v4308_v27 = vld [vmem:[%s8523_s5 + $0x30] sm:$0xf0]  ;;  %v5662_v30 = vld [vmem:[%s8523_s5 + $0x304] sm:$0xf]  ;;  %v4652_v41 = vld [vmem:[%s8523_s5 + $0x2d8] sm:$0xf0] }
  0xbd   : > { %v573_v55 = vrot.slane %v571_v51, 7  ;;  %v581_v57 = vrot.slane %v579_v52, 1  ;;  %2251 = vmatpush.bf16.msra.mxu1 %v4499_v40  ;;  %v4451_v51 = vor.u32 %v5608_v49, %v4450_v48  ;;  %v5704_v52 = vld [vmem:[%s8523_s5 + $0x44c] sm:$0xf0]  ;;  %v4311_v29 = vor.u32 %v5566_v26, %v4308_v27  ;;  %v5651_v40 = vld [vmem:[%s8523_s5 + $0x2ac] sm:$0xf] }
  0xbe   : > { %v4695_v33 = vor.u32 %v5662_v30, %v4692_v31  ;;  %v5747_v42 = vld [vmem:[%s8523_s5 + $0x5ac] sm:$0xf]  ;;  %v6665_v44 = vld [vmem:[%s8522_s4] sm:$0x3f]  ;;  %v4655_v38 = vor.u32 %v5651_v40, %v4652_v41  ;;  %v4602_v46 = vld [vmem:[%s8523_s5 + $0x248] sm:$0xf] }
  0xbf   : > { %575 = vst [vmem:[#allocation2] sm:$0x2] %v573_v55  ;;  %v583_v58 = vadd.f32 %v581_v57, %v543_v56  ;;  %v4835_v55 = vor.u32 %v5704_v52, %v4834_v50  ;;  %v4455_v56 = vor.u32 %v5602_v53, %v4452_v54  ;;  %v5698_v57 = vld [vmem:[%s8523_s5 + $0x424] sm:$0xf]  ;;  %v4986_v48 = vld [vmem:[%s8523_s5 + $0x548] sm:$0xf] }
  0xc0   : > { %v5741_v50 = vld [vmem:[%s8523_s5 + $0x574] sm:$0xf0]  ;;  %v4604_v52 = vld [vmem:[%s8523_s5 + $0x278] sm:$0xf0]  ;;  %v4842_v31 = vld [vmem:[%s8523_s5 + $0x428] sm:$0xf] }
  0xc1   : > { %v584_v62 = vmax.f32 %v583_v58, 0.0  ;;  %v4836_v58 = vld [vmem:[%s8523_s5 + $0x450] sm:$0xf0]  ;;  %2252 = vmatpush.bf16.msra.mxu1 %v4451_v51  ;;  %2266 = vmatpush.bf16.msra.mxu2 %v4835_v55  ;;  %v5639_v51 = vld [vmem:[%s8523_s5 + $0x24c] sm:$0xf]  ;;  %v4987_v53 = vor.u32 %v5741_v50, %v4986_v48 }
  0xc2   : > { %v4839_v59 = vor.u32 %v5698_v57, %v4836_v58  ;;  %v4607_v54 = vor.u32 %v5639_v51, %v4604_v52  ;;  %v5735_v55 = vld [vmem:[%s8523_s5 + $0x54c] sm:$0xf]  ;;  %v643_v57 = vperm.slane %v6665_v44, 1  ;;  %v4508_v18 = vld [vmem:[%s8523_s5 + $0x1b8] sm:$0xf0] }
  0xc3   : > { %v585_v2 = vpack.c.bf16 %v584_v62, %v584_v62  ;;  %v4786_v62 = vld [vmem:[%s8523_s5 + $0x3c0] sm:$0xf]  ;;  %v4844_v41 = vld [vmem:[%s8523_s5 + $0x458] sm:$0xf0]  ;;  %v4794_v48 = vld [vmem:[%s8523_s5 + $0x3c8] sm:$0xf] }
  0xc4   : > { %v5591_v50 = vld [vmem:[%s8523_s5 + $0xcc] sm:$0xf] }
  0xc5   : > { %v587_v3 = vrot.slane %v585_v2, 7  ;;  %v4787_v2 = vor.u32 %v5692_v0, %v4786_v62  ;;  %2253 = vmatpush.bf16.msra.mxu1 %v4403_v63  ;;  %v4938_v62 = vld [vmem:[%s8523_s5 + $0x4e8] sm:$0xf]  ;;  %v4555_v63 = vor.u32 %v5633_v61, %v4554_v60  ;;  %v5729_v0 = vld [vmem:[%s8523_s5 + $0x514] sm:$0xf0] }
  0xc6   : > { %v4939_v4 = vor.u32 %v5729_v0, %v4938_v62  ;;  %v5585_v0 = vld [vmem:[%s8523_s5 + $0x94] sm:$0xf0] }
  0xc7   : > { %589 = vst [vmem:[#allocation2 + $0x4] sm:$0x2] %v587_v3  ;;  %v4404_v3 = vld [vmem:[%s8523_s5 + $0xf0] sm:$0xf0]  ;;  %2267 = vmatpush.bf16.msra.mxu2 %v4787_v2  ;;  %v4556_v2 = vld [vmem:[%s8523_s5 + $0x218] sm:$0xf0] }
  0xc8   : > { %v4407_v6 = vor.u32 %v5590_v1, %v4404_v3  ;;  %v5627_v1 = vld [vmem:[%s8523_s5 + $0x1ec] sm:$0xf]  ;;  %v642_v3 = vperm.slane %v6665_v44, 0 }
  0xc9   : > { %v4559_v5 = vor.u32 %v5627_v1, %v4556_v2  ;;  %v4746_v2 = vld [vmem:[%s8523_s5 + $0x368] sm:$0xf] }
  0xce   : > { %v5515_v8 = vld [vmem:[#allocation2] sm:$0xff] }
  0xcf   : > { %908 = vmatmul.bf16.vlgmr.msra.gmra.mxu3 %v5515_v8  ;;  %922 = vmatmul.bf16.vlgmr.msrb.gmra.mxu0 %v5515_v8 }
  0xd0   : > { %936 = vmatmul.bf16.vlgmr.msrb.gmra.mxu1 %v5515_v8  ;;  %950 = vmatmul.bf16.vlgmr.msrb.gmra.mxu2 %v5515_v8 }
  0xd1   : > { %2276 = vmatpush.bf16.msra.mxu3 %v4647_v9  ;;  %2290 = vmatpush.bf16.msrb.mxu0 %v5031_v10  ;;  %v5584_v9 = vld [vmem:[%s8523_s5 + $0x8c] sm:$0xf0]  ;;  %v4738_v10 = vld [vmem:[%s8523_s5 + $0x360] sm:$0xf] }
  0xd2   : > { %v4739_v16 = vor.u32 %v5680_v13, %v4738_v10  ;;  %v4506_v10 = vld [vmem:[%s8523_s5 + $0x188] sm:$0xf] }
  0xd3   : > { %v4890_v13 = vld [vmem:[%s8523_s5 + $0x488] sm:$0xf] }
  0xd4   : > { %2268 = vmatpush.bf16.msra.mxu2 %v4739_v16  ;;  %v5717_v16 = vld [vmem:[%s8523_s5 + $0x4b4] sm:$0xf0] }
  0xd5   : > { %2277 = vmatpush.bf16.msra.mxu3 %v4599_v22  ;;  %2291 = vmatpush.bf16.msrb.mxu0 %v4983_v23  ;;  %v5572_v22 = vld [vmem:[%s8523_s5 + $0x2c] sm:$0xf0]  ;;  %v4690_v23 = vld [vmem:[%s8523_s5 + $0x300] sm:$0xf] }
  0xd6   : > { %v4307_v24 = vor.u32 %v5572_v22, %v4306_v21  ;;  %v4691_v28 = vor.u32 %v5668_v25, %v4690_v23  ;;  %v5711_v22 = vld [vmem:[%s8523_s5 + $0x48c] sm:$0xf]  ;;  %v4892_v23 = vld [vmem:[%s8523_s5 + $0x4b8] sm:$0xf0] }
  0xd7   : > { %v4895_v25 = vor.u32 %v5711_v22, %v4892_v23  ;;  %v4698_v22 = vld [vmem:[%s8523_s5 + $0x308] sm:$0xf]  ;;  %v5669_v23 = vld [vmem:[%s8523_s5 + $0x334] sm:$0xf0] }
  0xd8   : > { %2269 = vmatpush.bf16.msra.mxu2 %v4691_v28  ;;  %v4458_v28 = vld [vmem:[%s8523_s5 + $0x128] sm:$0xf] }
  0xd9   : > { %2278 = vmatpush.bf16.msra.mxu3 %v4551_v32  ;;  %2292 = vmatpush.bf16.msrb.mxu0 %v4935_v35  ;;  %v4650_v32 = vld [vmem:[%s8523_s5 + $0x2a8] sm:$0xf] }
  0xda   : > { %v5034_v35 = vld [vmem:[%s8523_s5 + $0x5a8] sm:$0xf]  ;;  %v4651_v37 = vor.u32 %v5657_v34, %v4650_v32  ;;  %v5705_v32 = vld [vmem:[%s8523_s5 + $0x454] sm:$0xf0] }
  0xdb   : > { %v5035_v39 = vor.u32 %v5753_v36, %v5034_v35  ;;  %v4843_v35 = vor.u32 %v5705_v32, %v4842_v31  ;;  %v4460_v36 = vld [vmem:[%s8523_s5 + $0x158] sm:$0xf0]  ;;  %v4699_v32 = vor.u32 %v5669_v23, %v4698_v22  ;;  %v5044_v22 = vld [vmem:[%s8523_s5 + $0x5e0] sm:$0xf0] }
  0xdd   : > { %2279 = vmatpush.bf16.msra.mxu3 %v4503_v43  ;;  %2293 = vmatpush.bf16.msrb.mxu0 %v4887_v47  ;;  %v5036_v43 = vld [vmem:[%s8523_s5 + $0x5d8] sm:$0xf0]  ;;  %v5645_v47 = vld [vmem:[%s8523_s5 + $0x274] sm:$0xf0] }
  0xde   : > { %2318 = vmatpush.bf16.msrb.mxu2 %v5035_v39  ;;  %v5039_v45 = vor.u32 %v5747_v42, %v5036_v43  ;;  %v4603_v49 = vor.u32 %v5645_v47, %v4602_v46  ;;  %v647_v39 = vperm.slane %v6665_v44, 5  ;;  %v4410_v43 = vld [vmem:[%s8523_s5 + $0xc8] sm:$0xf] }
  0xdf   : > { %964 = vmatmul.bf16.vlgmr.msrb.gmra.mxu3 %v5515_v8  ;;  %978 = vmatmul.bf16.vlgmr.msra.gmra.mxu0 %v5515_v8  ;;  %v4354_v8 = vld [vmem:[%s8523_s5 + $0x60] sm:$0xf] }
  0xe0   : > { %v4355_v11 = vor.u32 %v5584_v9, %v4354_v8 }
  0xe1   : > { %2280 = vmatpush.bf16.msra.mxu3 %v4455_v56  ;;  %2294 = vmatpush.bf16.msrb.mxu0 %v4839_v59  ;;  %v4988_v56 = vld [vmem:[%s8523_s5 + $0x578] sm:$0xf0] }
  0xe2   : > { %2254 = vmatpush.bf16.msra.mxu1 %v4355_v11  ;;  %v4991_v59 = vor.u32 %v5735_v55, %v4988_v56  ;;  %2319 = vmatpush.bf16.msrb.mxu2 %v4987_v53  ;;  %v5621_v11 = vld [vmem:[%s8523_s5 + $0x1b4] sm:$0xf0]  ;;  %v4412_v53 = vld [vmem:[%s8523_s5 + $0xf8] sm:$0xf0]  ;;  %v645_v56 = vperm.slane %v6665_v44, 3 }
  0xe3   : > { %v4507_v15 = vor.u32 %v5621_v11, %v4506_v10  ;;  %v4796_v55 = vld [vmem:[%s8523_s5 + $0x3f8] sm:$0xf0]  ;;  %v5675_v11 = vld [vmem:[%s8523_s5 + $0x36c] sm:$0xf] }
  0xe4   : > { %v4364_v10 = vld [vmem:[%s8523_s5 + $0x98] sm:$0xf0] }
  0xe5   : > { %2281 = vmatpush.bf16.msra.mxu3 %v4407_v6  ;;  %2295 = vmatpush.bf16.msrb.mxu0 %v4791_v7  ;;  %v5723_v6 = vld [vmem:[%s8523_s5 + $0x4ec] sm:$0xf]  ;;  %v4940_v7 = vld [vmem:[%s8523_s5 + $0x518] sm:$0xf0] }
  0xe6   : > { %2255 = vmatpush.bf16.msra.mxu1 %v4307_v24  ;;  %v4943_v8 = vor.u32 %v5723_v6, %v4940_v7  ;;  %2320 = vmatpush.bf16.msrb.mxu2 %v4939_v4  ;;  %v5579_v4 = vld [vmem:[%s8523_s5 + $0x6c] sm:$0xf] }
  0xe9   : > { %2282 = vmatpush.bf16.msra.mxu3 %v4359_v17  ;;  %2296 = vmatpush.bf16.msrb.mxu0 %v4743_v20  ;;  %v5615_v17 = vld [vmem:[%s8523_s5 + $0x18c] sm:$0xf]  ;;  %v4891_v20 = vor.u32 %v5717_v16, %v4890_v13  ;;  %v644_v13 = vperm.slane %v6665_v44, 2 }
  0xea   : > { %2304 = vmatpush.bf16.msrb.mxu1 %v4651_v37  ;;  %v4511_v21 = vor.u32 %v5615_v17, %v4508_v18  ;;  %v5699_v37 = vld [vmem:[%s8523_s5 + $0x42c] sm:$0xf] }
  0xeb   : > { %2321 = vmatpush.bf16.msrb.mxu2 %v4891_v20 }
  0xed   : > { %2283 = vmatpush.bf16.msra.mxu3 %v4311_v29  ;;  %2297 = vmatpush.bf16.msrb.mxu0 %v4695_v33  ;;  %v5609_v29 = vld [vmem:[%s8523_s5 + $0x154] sm:$0xf0]  ;;  %v5603_v33 = vld [vmem:[%s8523_s5 + $0x12c] sm:$0xf] }
  0xee   : > { %2305 = vmatpush.bf16.msrb.mxu1 %v4603_v49  ;;  %v4459_v30 = vor.u32 %v5609_v29, %v4458_v28  ;;  %v4463_v40 = vor.u32 %v5603_v33, %v4460_v36  ;;  %v5693_v49 = vld [vmem:[%s8523_s5 + $0x3f4] sm:$0xf0]  ;;  %v5567_v28 = vld [vmem:[%s8523_s5 + $0xc] sm:$0xf]  ;;  %v4316_v29 = vld [vmem:[%s8523_s5 + $0x38] sm:$0xf0] }
  0xef   : > { %2322 = vmatpush.bf16.msrb.mxu2 %v4843_v35  ;;  %v4795_v52 = vor.u32 %v5693_v49, %v4794_v48  ;;  %v4319_v33 = vor.u32 %v5567_v28, %v4316_v29  ;;  %v4700_v35 = vld [vmem:[%s8523_s5 + $0x338] sm:$0xf0] }
  0xf1   : > { %2332 = vmatpush.bf16.msrb.mxu3 %v4655_v38  ;;  %2346 = vmatpush.bf16.msra.mxu0 %v5039_v45  ;;  %v4847_v38 = vor.u32 %v5699_v37, %v4844_v41  ;;  %v5597_v45 = vld [vmem:[%s8523_s5 + $0xf4] sm:$0xf0] }
  0xf2   : > { %2306 = vmatpush.bf16.msrb.mxu1 %v4555_v63  ;;  %v4411_v47 = vor.u32 %v5597_v45, %v4410_v43  ;;  %v4362_v63 = vld [vmem:[%s8523_s5 + $0x68] sm:$0xf] }
  0xf3   : > { %2323 = vmatpush.bf16.msrb.mxu2 %v4795_v52  ;;  %v4363_v1 = vor.u32 %v5585_v0, %v4362_v63 }
  0xf5   : > { %2333 = vmatpush.bf16.msrb.mxu3 %v4607_v54  ;;  %2347 = vmatpush.bf16.msra.mxu0 %v4991_v59  ;;  %v5687_v54 = vld [vmem:[%s8523_s5 + $0x3cc] sm:$0xf] }
  0xf6   : > { %2307 = vmatpush.bf16.msrb.mxu1 %v4507_v15  ;;  %v4799_v59 = vor.u32 %v5687_v54, %v4796_v55  ;;  %v4748_v15 = vld [vmem:[%s8523_s5 + $0x398] sm:$0xf0] }
  0xf7   : > { %v4751_v18 = vor.u32 %v5675_v11, %v4748_v15  ;;  %v5658_v15 = vld [vmem:[%s8523_s5 + $0x2dc] sm:$0xf0] }
  0xf9   : > { %2334 = vmatpush.bf16.msrb.mxu3 %v4559_v5  ;;  %2348 = vmatpush.bf16.msra.mxu0 %v4943_v8  ;;  %v646_v8 = vperm.slane %v6665_v44, 4 }
  0xfa   : > { %2308 = vmatpush.bf16.msrb.mxu1 %v4459_v30 }
  0xfd   : > { %2335 = vmatpush.bf16.msrb.mxu3 %v4511_v21  ;;  %2349 = vmatpush.bf16.msra.mxu0 %v4895_v25  ;;  %v5573_v21 = vld [vmem:[%s8523_s5 + $0x34] sm:$0xf0] }
  0xfe   : > { %2309 = vmatpush.bf16.msrb.mxu1 %v4411_v47 }
 0x101   : > { %2336 = vmatpush.bf16.msrb.mxu3 %v4463_v40  ;;  %2350 = vmatpush.bf16.msra.mxu0 %v4847_v38 }
 0x102   : > { %2310 = vmatpush.bf16.msrb.mxu1 %v4363_v1 }
 0x105   : > { %2351 = vmatpush.bf16.msra.mxu0 %v4799_v59 }
 0x109   : > { %2352 = vmatpush.bf16.msra.mxu0 %v4751_v18  ;;  %v5652_v18 = vld [vmem:[%s8523_s5 + $0x2b4] sm:$0xf] }
 0x14c   : > { %v923_v58 = vpop.f32.mrf.mxu0 }
 0x14d   : > { %v924_v9 = vadd.f32 %v923_v58, %v643_v57  ;;  %v4415_v58 = vor.u32 %v5591_v50, %v4412_v53  ;;  %v937_v16 = vpop.f32.mrf.mxu1 }
 0x14e   : > { %v938_v30 = vadd.f32 %v937_v16, %v644_v13  ;;  %v5042_v16 = vld [vmem:[%s8523_s5 + $0x5b0] sm:$0xf] }
 0x14f   : > { %v985_v26 = vmax.f32 %v924_v9, 0.0  ;;  %2337 = vmatpush.bf16.msrb.mxu3 %v4415_v58 }
 0x152   : > { %v909_v14 = vpop.f32.mrf.mxu3 }
 0x153   : > { %v910_v19 = vadd.f32 %v909_v14, %v642_v3  ;;  %v951_v5 = vpop.f32.mrf.mxu2  ;;  %v4367_v14 = vor.u32 %v5579_v4, %v4364_v10 }
 0x154   : > { %v925_v24 = vpop.f32.mrf.mxu0 }
 0x155   : > { %v984_v27 = vmax.f32 %v910_v19, 0.0  ;;  %v926_v42 = vadd.f32 %v925_v24, %v643_v57  ;;  %v4314_v19 = vld [vmem:[%s8523_s5 + $0x8] sm:$0xf]  ;;  %2338 = vmatpush.bf16.msrb.mxu3 %v4367_v14  ;;  %v952_v24 = vadd.f32 %v951_v5, %v645_v56  ;;  %v939_v53 = vpop.f32.mrf.mxu1  ;;  %v4658_v14 = vld [vmem:[%s8523_s5 + $0x2b0] sm:$0xf] }
 0x156   : > { %v4659_v28 = vor.u32 %v5658_v15, %v4658_v14  ;;  %v4418_v15 = vld [vmem:[%s8523_s5 + $0xd0] sm:$0xf] }
 0x157   : > { %v986_v34 = vpack.c.bf16 %v985_v26, %v984_v27  ;;  %v1021_v60 = vmax.f32 %v926_v42, 0.0  ;;  %v4315_v27 = vor.u32 %v5573_v21, %v4314_v19  ;;  %v4660_v19 = vld [vmem:[%s8523_s5 + $0x2e0] sm:$0xf0]  ;;  %v5748_v21 = vld [vmem:[%s8523_s5 + $0x5b4] sm:$0xf] }
 0x159   : > { %987 = vst [vmem:[#allocation3] sm:$0x33] %v986_v34  ;;  %v5663_v34 = vld [vmem:[%s8523_s5 + $0x30c] sm:$0xf]  ;;  %2311 = vmatpush.bf16.msrb.mxu1 %v4315_v27  ;;  %2339 = vmatpush.bf16.msrb.mxu3 %v4319_v33  ;;  %v5047_v33 = vor.u32 %v5748_v21, %v5044_v22  ;;  %v5592_v21 = vld [vmem:[%s8523_s5 + $0xd4] sm:$0xf] }
 0x15a   : > { %v911_v46 = vpop.f32.mrf.mxu3  ;;  %v4703_v42 = vor.u32 %v5663_v34, %v4700_v35  ;;  %v4994_v34 = vld [vmem:[%s8523_s5 + $0x550] sm:$0xf]  ;;  %v5742_v35 = vld [vmem:[%s8523_s5 + $0x57c] sm:$0xf0]  ;;  %v4420_v22 = vld [vmem:[%s8523_s5 + $0x100] sm:$0xf0] }
 0x15b   : > { %v912_v51 = vadd.f32 %v911_v46, %v642_v3  ;;  %v5681_v3 = vld [vmem:[%s8523_s5 + $0x394] sm:$0xf0]  ;;  %v953_v47 = vpop.f32.mrf.mxu2 }
 0x15c   : > { %v979_v57 = vpop.f32.mrf.mxu0  ;;  %v4747_v9 = vor.u32 %v5681_v3, %v4746_v2  ;;  %2353 = vmatpush.bf16.msra.mxu0 %v4703_v42 }
 0x15d   : > { %v1020_v61 = vmax.f32 %v912_v51, 0.0  ;;  %v980_v62 = vadd.f32 %v979_v57, %v647_v39  ;;  %v954_v57 = vadd.f32 %v953_v47, %v645_v56 }
 0x15e   : > { %2324 = vmatpush.bf16.msrb.mxu2 %v4747_v9 }
 0x15f   : > { %v1022_v6 = vpack.c.bf16 %v1021_v60, %v1020_v61  ;;  %v1004_v7 = vmul.f32 %v980_v62, %v6395_v12  ;;  %v991_v17 = vrot.slane %v980_v62, 2  ;;  %v940_v62 = vadd.f32 %v939_v53, %v644_v13  ;;  %v4948_v53 = vld [vmem:[%s8523_s5 + $0x520] sm:$0xf0] }
 0x161   : > { %1023 = vst [vmem:[#allocation3 + $0x8] sm:$0x33] %v1022_v6  ;;  %v1008_v25 = vrot.slane %v1004_v7, 7  ;;  %v995_v36 = vadd.f32 %v991_v17, %v952_v24  ;;  %v5754_v17 = vld [vmem:[%s8523_s5 + $0x5dc] sm:$0xf0] }
 0x162   : > { %v965_v20 = vpop.f32.mrf.mxu3  ;;  %2325 = vmatpush.bf16.msrb.mxu2 %v4699_v32  ;;  %v5043_v29 = vor.u32 %v5754_v17, %v5042_v16  ;;  %v4663_v32 = vor.u32 %v5652_v18, %v4660_v19  ;;  %v5598_v16 = vld [vmem:[%s8523_s5 + $0xfc] sm:$0xf0]  ;;  %v4802_v19 = vld [vmem:[%s8523_s5 + $0x3d0] sm:$0xf] }
 0x163   : > { %v966_v26 = vadd.f32 %v965_v20, %v646_v8  ;;  %v1012_v38 = vadd.f32 %v1008_v25, %v952_v24  ;;  %v997_v48 = vmax.f32 %v995_v36, 0.0  ;;  %v5640_v36 = vld [vmem:[%s8523_s5 + $0x254] sm:$0xf] }
 0x164   : > { %v981_v31 = vpop.f32.mrf.mxu0 }
 0x165   : > { %v990_v37 = vrot.slane %v966_v26, 2  ;;  %v1003_v40 = vmul.f32 %v966_v26, %v6395_v12  ;;  %v982_v41 = vadd.f32 %v981_v31, %v647_v39  ;;  %v1014_v54 = vmax.f32 %v1012_v38, 0.0  ;;  %v5646_v31 = vld [vmem:[%s8523_s5 + $0x27c] sm:$0xf0] }
 0x166   : > { %v4995_v38 = vor.u32 %v5742_v35, %v4994_v34  ;;  %v5682_v34 = vld [vmem:[%s8523_s5 + $0x39c] sm:$0xf0]  ;;  %v5580_v35 = vld [vmem:[%s8523_s5 + $0x74] sm:$0xf] }
 0x167   : > { %v994_v43 = vadd.f32 %v990_v37, %v938_v30  ;;  %v1007_v45 = vrot.slane %v1003_v40, 7  ;;  %v1040_v46 = vmul.f32 %v982_v41, %v6395_v12  ;;  %v1027_v51 = vrot.slane %v982_v41, 2  ;;  %v4612_v37 = vld [vmem:[%s8523_s5 + $0x280] sm:$0xf0]  ;;  %v5736_v40 = vld [vmem:[%s8523_s5 + $0x554] sm:$0xf] }
 0x168   : > { %v4996_v41 = vld [vmem:[%s8523_s5 + $0x580] sm:$0xf0] }
 0x169   : > { %v996_v49 = vmax.f32 %v994_v43, 0.0  ;;  %v1011_v50 = vadd.f32 %v1007_v45, %v938_v30  ;;  %v1044_v58 = vrot.slane %v1040_v46, 7  ;;  %v1031_v63 = vadd.f32 %v1027_v51, %v954_v57  ;;  %v4610_v30 = vld [vmem:[%s8523_s5 + $0x250] sm:$0xf]  ;;  %v5634_v45 = vld [vmem:[%s8523_s5 + $0x21c] sm:$0xf0] }
 0x16a   : > { %v967_v52 = vpop.f32.mrf.mxu3  ;;  %v4611_v42 = vor.u32 %v5646_v31, %v4610_v30  ;;  %v4562_v43 = vld [vmem:[%s8523_s5 + $0x1f0] sm:$0xf]  ;;  %v4615_v46 = vor.u32 %v5640_v36, %v4612_v37  ;;  %v4999_v47 = vor.u32 %v5736_v40, %v4996_v41  ;;  %v4564_v51 = vld [vmem:[%s8523_s5 + $0x220] sm:$0xf0]  ;;  %v5586_v30 = vld [vmem:[%s8523_s5 + $0x9c] sm:$0xf0]  ;;  %v4423_v31 = vor.u32 %v5592_v21, %v4420_v22 }
 0x16b   : > { %v998_v55 = vpack.c.bf16 %v997_v48, %v996_v49  ;;  %v1013_v39 = vmax.f32 %v1011_v50, 0.0  ;;  %v968_v59 = vadd.f32 %v967_v52, %v646_v8  ;;  %v1048_v3 = vadd.f32 %v1044_v58, %v954_v57  ;;  %v4946_v48 = vld [vmem:[%s8523_s5 + $0x4f0] sm:$0xf]  ;;  %v5730_v49 = vld [vmem:[%s8523_s5 + $0x51c] sm:$0xf0] }
 0x16c   : > { %v1033_v6 = vmax.f32 %v1031_v63, 0.0  ;;  %v5628_v50 = vld [vmem:[%s8523_s5 + $0x1f4] sm:$0xf]  ;;  %v5622_v57 = vld [vmem:[%s8523_s5 + $0x1bc] sm:$0xf0] }
 0x16d   : > { %v1000_v60 = vrot.slane %v998_v55, 6  ;;  %v1015_v61 = vpack.c.bf16 %v1014_v54, %v1013_v39  ;;  %v1026_v0 = vrot.slane %v968_v59, 2  ;;  %v1039_v1 = vmul.f32 %v968_v59, %v6395_v12  ;;  %v5724_v52 = vld [vmem:[%s8523_s5 + $0x4f4] sm:$0xf]  ;;  %v4514_v39 = vld [vmem:[%s8523_s5 + $0x190] sm:$0xf] }
 0x16e   : > { %v1050_v44 = vmax.f32 %v1048_v3, 0.0  ;;  %v4563_v54 = vor.u32 %v5634_v45, %v4562_v43  ;;  %v4947_v55 = vor.u32 %v5730_v49, %v4946_v48  ;;  %v4567_v58 = vor.u32 %v5628_v50, %v4564_v51  ;;  %v4516_v63 = vld [vmem:[%s8523_s5 + $0x1c0] sm:$0xf0]  ;;  %v5676_v37 = vld [vmem:[%s8523_s5 + $0x374] sm:$0xf] }
 0x16f   : > { %1002 = vst [vmem:[#allocation3] sm:$0x44] %v1000_v60  ;;  %v1017_v2 = vrot.slane %v1015_v61, 6  ;;  %v1030_v4 = vadd.f32 %v1026_v0, %v940_v62  ;;  %v1043_v5 = vrot.slane %v1039_v1, 7  ;;  %v4951_v59 = vor.u32 %v5724_v52, %v4948_v53  ;;  %v4898_v60 = vld [vmem:[%s8523_s5 + $0x490] sm:$0xf] }
 0x170   : > { %v5718_v61 = vld [vmem:[%s8523_s5 + $0x4bc] sm:$0xf0]  ;;  %v5712_v0 = vld [vmem:[%s8523_s5 + $0x494] sm:$0xf]  ;;  %v4900_v1 = vld [vmem:[%s8523_s5 + $0x4c0] sm:$0xf0] }
 0x171   : > { %1019 = vst [vmem:[#allocation3] sm:$0x88] %v1017_v2  ;;  %v1032_v7 = vmax.f32 %v1030_v4, 0.0  ;;  %v1047_v9 = vadd.f32 %v1043_v5, %v940_v62  ;;  %v5616_v62 = vld [vmem:[%s8523_s5 + $0x194] sm:$0xf]  ;;  %v4515_v2 = vor.u32 %v5622_v57, %v4514_v39  ;;  %v4899_v3 = vor.u32 %v5718_v61, %v4898_v60 }
 0x172   : > { %v4466_v4 = vld [vmem:[%s8523_s5 + $0x130] sm:$0xf]  ;;  %v5610_v5 = vld [vmem:[%s8523_s5 + $0x15c] sm:$0xf0]  ;;  %v4372_v36 = vld [vmem:[%s8523_s5 + $0xa0] sm:$0xf0] }
 0x173   : > { %v1034_v56 = vpack.c.bf16 %v1033_v6, %v1032_v7  ;;  %v1049_v10 = vmax.f32 %v1047_v9, 0.0  ;;  %v4519_v6 = vor.u32 %v5616_v62, %v4516_v63  ;;  %v4903_v7 = vor.u32 %v5712_v0, %v4900_v1  ;;  %v4850_v9 = vld [vmem:[%s8523_s5 + $0x430] sm:$0xf]  ;;  %v4756_v40 = vld [vmem:[%s8523_s5 + $0x3a0] sm:$0xf0] }
 0x174   : > { %v4322_v41 = vld [vmem:[%s8523_s5 + $0x10] sm:$0xf]  ;;  %v5574_v43 = vld [vmem:[%s8523_s5 + $0x3c] sm:$0xf0]  ;;  %v4759_v48 = vor.u32 %v5676_v37, %v4756_v40  ;;  %v5568_v49 = vld [vmem:[%s8523_s5 + $0x14] sm:$0xf] }
 0x175   : > { %v1036_v8 = vrot.slane %v1034_v56, 6  ;;  %v1051_v11 = vpack.c.bf16 %v1050_v44, %v1049_v10  ;;  %v5706_v44 = vld [vmem:[%s8523_s5 + $0x45c] sm:$0xf0]  ;;  %v5604_v56 = vld [vmem:[%s8523_s5 + $0x134] sm:$0xf] }
 0x176   : > { %v4468_v10 = vld [vmem:[%s8523_s5 + $0x160] sm:$0xf0]  ;;  %v4851_v14 = vor.u32 %v5706_v44, %v4850_v9  ;;  %v4706_v45 = vld [vmem:[%s8523_s5 + $0x310] sm:$0xf]  ;;  %v5664_v51 = vld [vmem:[%s8523_s5 + $0x314] sm:$0xf] }
 0x177   : > { %1038 = vst [vmem:[#allocation3 + $0x8] sm:$0x44] %v1036_v8  ;;  %v1053_v13 = vrot.slane %v1051_v11, 6  ;;  %v5700_v8 = vld [vmem:[%s8523_s5 + $0x434] sm:$0xf]  ;;  %v4471_v17 = vor.u32 %v5604_v56, %v4468_v10 }
 0x178   : > { %v5564_v20 = vld [vmem:[#allocation3 + $0x4] sm:$0xf]  ;;  %v4298_v23 = vld [vmem:[#allocation3] sm:$0xf]  ;;  %v4852_v11 = vld [vmem:[%s8523_s5 + $0x460] sm:$0xf0] }
 0x179   : > { %1055 = vst [vmem:[#allocation3 + $0x8] sm:$0x88] %v1053_v13  ;;  %v4467_v13 = vor.u32 %v5610_v5, %v4466_v4  ;;  %v4855_v18 = vor.u32 %v5700_v8, %v4852_v11  ;;  %v4324_v50 = vld [vmem:[%s8523_s5 + $0x40] sm:$0xf0]  ;;  %v4666_v53 = vld [vmem:[%s8523_s5 + $0x2b8] sm:$0xf] }
 0x17a   : > { %v4708_v52 = vld [vmem:[%s8523_s5 + $0x340] sm:$0xf0]  ;;  %v5755_v39 = vld [vmem:[%s8523_s5 + $0x5e4] sm:$0xf0]  ;;  %v5653_v57 = vld [vmem:[%s8523_s5 + $0x2bc] sm:$0xf]  ;;  %v4327_v63 = vor.u32 %v5568_v49, %v4324_v50 }
 0x17b   : > { %v4668_v60 = vld [vmem:[%s8523_s5 + $0x2e8] sm:$0xf0]  ;;  %v5749_v61 = vld [vmem:[%s8523_s5 + $0x5bc] sm:$0xf]  ;;  %v4711_v0 = vor.u32 %v5664_v51, %v4708_v52  ;;  %v5647_v4 = vld [vmem:[%s8523_s5 + $0x284] sm:$0xf0] }
 0x17c   : > { %v5052_v62 = vld [vmem:[%s8523_s5 + $0x5e8] sm:$0xf0]  ;;  %v4671_v5 = vor.u32 %v5653_v57, %v4668_v60  ;;  %v5743_v9 = vld [vmem:[%s8523_s5 + $0x584] sm:$0xf0]  ;;  %v5641_v44 = vld [vmem:[%s8523_s5 + $0x25c] sm:$0xf] }
 0x17d   : > { %v4620_v56 = vld [vmem:[%s8523_s5 + $0x288] sm:$0xf0]  ;;  %v5737_v10 = vld [vmem:[%s8523_s5 + $0x55c] sm:$0xf] }
 0x17e   : > { %v5004_v8 = vld [vmem:[%s8523_s5 + $0x588] sm:$0xf0]  ;;  %v5725_v22 = vld [vmem:[%s8523_s5 + $0x4fc] sm:$0xf] }
 0x17f   : > { %v4572_v21 = vld [vmem:[%s8523_s5 + $0x228] sm:$0xf0]  ;;  %v5701_v50 = vld [vmem:[%s8523_s5 + $0x43c] sm:$0xf] }
 0x180   : > { %v4300_v24 = vld [vmem:[#allocation3 + $0x8] sm:$0xf0]  ;;  %v5565_v25 = vld [vmem:[#allocation3 + $0x4] sm:$0xf0]  ;;  %v4908_v37 = vld [vmem:[%s8523_s5 + $0x4c8] sm:$0xf0] }
 0x181   : > { %v6880_v26 = vor.u32 %v5565_v25, %v4298_v23  ;;  %v6882_v27 = vor.u32 %v5564_v20, %v4300_v24  ;;  %v5694_v20 = vld [vmem:[%s8523_s5 + $0x3fc] sm:$0xf0]  ;;  %v5688_v23 = vld [vmem:[%s8523_s5 + $0x3d4] sm:$0xf]  ;;  %v4804_v24 = vld [vmem:[%s8523_s5 + $0x400] sm:$0xf0]  ;;  %v4419_v25 = vor.u32 %v5598_v16, %v4418_v15  ;;  %v4623_v16 = vor.u32 %v5641_v44, %v4620_v56 }
 0x182   : > { %v5635_v15 = vld [vmem:[%s8523_s5 + $0x224] sm:$0xf0]  ;;  %v4476_v49 = vld [vmem:[%s8523_s5 + $0x168] sm:$0xf0]  ;;  %v5593_v60 = vld [vmem:[%s8523_s5 + $0xdc] sm:$0xf] }
 0x183   : > { %2256 = vmatmul.bf16.vlgmr.msra.gmra.mxu1 %v6880_v26  ;;  %2270 = vmatmul.bf16.vlgmr.msra.gmra.mxu2 %v6882_v27  ;;  %v4860_v51 = vld [vmem:[%s8523_s5 + $0x468] sm:$0xf0]  ;;  %v5677_v56 = vld [vmem:[%s8523_s5 + $0x37c] sm:$0xf] }
 0x184   : > { %2284 = vmatmul.bf16.vlgmr.msra.gmra.mxu3 %v6880_v26  ;;  %2298 = vmatmul.bf16.vlgmr.msrb.gmra.mxu0 %v6882_v27  ;;  %v4863_v57 = vor.u32 %v5701_v50, %v4860_v51  ;;  %v4380_v44 = vld [vmem:[%s8523_s5 + $0xa8] sm:$0xf0]  ;;  %v5012_v50 = vld [vmem:[%s8523_s5 + $0x590] sm:$0xf0] }
 0x185   : > { %2360 = vmatpush.bf16.msra.mxu1 %v4659_v28  ;;  %2374 = vmatpush.bf16.msra.mxu2 %v5043_v29  ;;  %v4803_v28 = vor.u32 %v5694_v20, %v4802_v19  ;;  %v4370_v29 = vld [vmem:[%s8523_s5 + $0x70] sm:$0xf]  ;;  %v5731_v19 = vld [vmem:[%s8523_s5 + $0x524] sm:$0xf0]  ;;  %v5629_v20 = vld [vmem:[%s8523_s5 + $0x1fc] sm:$0xf] }
 0x186   : > { %2388 = vmatpush.bf16.msra.mxu3 %v4663_v32  ;;  %2402 = vmatpush.bf16.msrb.mxu0 %v5047_v33  ;;  %v4807_v32 = vor.u32 %v5688_v23, %v4804_v24  ;;  %v4754_v33 = vld [vmem:[%s8523_s5 + $0x370] sm:$0xf]  ;;  %v4956_v23 = vld [vmem:[%s8523_s5 + $0x528] sm:$0xf0] }
 0x189   : > { %2361 = vmatpush.bf16.msra.mxu1 %v4611_v42  ;;  %2375 = vmatpush.bf16.msra.mxu2 %v4995_v38  ;;  %v4371_v42 = vor.u32 %v5586_v30, %v4370_v29  ;;  %v4755_v38 = vor.u32 %v5682_v34, %v4754_v33  ;;  %v5623_v29 = vld [vmem:[%s8523_s5 + $0x1c4] sm:$0xf0]  ;;  %v4575_v30 = vor.u32 %v5629_v20, %v4572_v21  ;;  %v5617_v34 = vld [vmem:[%s8523_s5 + $0x19c] sm:$0xf]  ;;  %v4332_v20 = vld [vmem:[%s8523_s5 + $0x48] sm:$0xf0] }
 0x18a   : > { %2389 = vmatpush.bf16.msra.mxu3 %v4615_v46  ;;  %2403 = vmatpush.bf16.msrb.mxu0 %v4999_v47  ;;  %v5670_v46 = vld [vmem:[%s8523_s5 + $0x33c] sm:$0xf0]  ;;  %v4375_v47 = vor.u32 %v5580_v35, %v4372_v36  ;;  %v5719_v33 = vld [vmem:[%s8523_s5 + $0x4c4] sm:$0xf0]  ;;  %v4524_v35 = vld [vmem:[%s8523_s5 + $0x1c8] sm:$0xf0] }
 0x18b   : > { %v5713_v36 = vld [vmem:[%s8523_s5 + $0x49c] sm:$0xf] }
 0x18c   : > { %v5665_v21 = vld [vmem:[%s8523_s5 + $0x31c] sm:$0xf] }
 0x18d   : > { %2362 = vmatpush.bf16.msra.mxu1 %v4563_v54  ;;  %2376 = vmatpush.bf16.msra.mxu2 %v4947_v55  ;;  %v5659_v54 = vld [vmem:[%s8523_s5 + $0x2e4] sm:$0xf0]  ;;  %v5050_v55 = vld [vmem:[%s8523_s5 + $0x5b8] sm:$0xf] }
 0x18e   : > { %2390 = vmatpush.bf16.msra.mxu3 %v4567_v58  ;;  %2404 = vmatpush.bf16.msrb.mxu0 %v4951_v59  ;;  %v4323_v58 = vor.u32 %v5574_v43, %v4322_v41  ;;  %v4707_v59 = vor.u32 %v5670_v46, %v4706_v45  ;;  %v4667_v1 = vor.u32 %v5659_v54, %v4666_v53  ;;  %v4858_v46 = vld [vmem:[%s8523_s5 + $0x438] sm:$0xf] }
 0x18f   : > { %v4527_v43 = vor.u32 %v5617_v34, %v4524_v35  ;;  %v4911_v45 = vor.u32 %v5713_v36, %v4908_v37  ;;  %v4426_v54 = vld [vmem:[%s8523_s5 + $0xd8] sm:$0xf]  ;;  %v5060_v34 = vld [vmem:[%s8523_s5 + $0x5f0] sm:$0xf0] }
 0x191   : > { %2363 = vmatpush.bf16.msra.mxu1 %v4515_v2  ;;  %2377 = vmatpush.bf16.msra.mxu2 %v4899_v3  ;;  %v5051_v2 = vor.u32 %v5755_v39, %v5050_v55  ;;  %v4618_v3 = vld [vmem:[%s8523_s5 + $0x258] sm:$0xf]  ;;  %v5599_v55 = vld [vmem:[%s8523_s5 + $0x104] sm:$0xf0] }
 0x192   : > { %2391 = vmatpush.bf16.msra.mxu3 %v4519_v6  ;;  %2405 = vmatpush.bf16.msrb.mxu0 %v4903_v7  ;;  %v5055_v6 = vor.u32 %v5749_v61, %v5052_v62  ;;  %v5002_v7 = vld [vmem:[%s8523_s5 + $0x558] sm:$0xf]  ;;  %v4619_v11 = vor.u32 %v5647_v4, %v4618_v3  ;;  %v4428_v61 = vld [vmem:[%s8523_s5 + $0x108] sm:$0xf0]  ;;  %v5689_v62 = vld [vmem:[%s8523_s5 + $0x3dc] sm:$0xf] }
 0x193   : > { %2312 = vmatmul.bf16.vlgmr.msrb.gmra.mxu1 %v6880_v26  ;;  %2326 = vmatmul.bf16.vlgmr.msrb.gmra.mxu2 %v6882_v27  ;;  %v5587_v3 = vld [vmem:[%s8523_s5 + $0xa4] sm:$0xf0]  ;;  %v4431_v4 = vor.u32 %v5593_v60, %v4428_v61  ;;  %v4580_v60 = vld [vmem:[%s8523_s5 + $0x230] sm:$0xf0]  ;;  %v5726_v61 = vld [vmem:[%s8523_s5 + $0x504] sm:$0xf] }
 0x194   : > { %2340 = vmatmul.bf16.vlgmr.msrb.gmra.mxu3 %v6880_v26  ;;  %2354 = vmatmul.bf16.vlgmr.msra.gmra.mxu0 %v6882_v27 }
 0x195   : > { %2364 = vmatpush.bf16.msra.mxu1 %v4467_v13  ;;  %2378 = vmatpush.bf16.msra.mxu2 %v4851_v14  ;;  %v5003_v13 = vor.u32 %v5743_v9, %v5002_v7  ;;  %v4570_v14 = vld [vmem:[%s8523_s5 + $0x1f8] sm:$0xf]  ;;  %v5683_v7 = vld [vmem:[%s8523_s5 + $0x3a4] sm:$0xf0]  ;;  %v5581_v9 = vld [vmem:[%s8523_s5 + $0x7c] sm:$0xf] }
 0x196   : > { %2392 = vmatpush.bf16.msra.mxu3 %v4471_v17  ;;  %2406 = vmatpush.bf16.msrb.mxu0 %v4855_v18  ;;  %v5007_v17 = vor.u32 %v5737_v10, %v5004_v8  ;;  %v4954_v18 = vld [vmem:[%s8523_s5 + $0x4f8] sm:$0xf]  ;;  %v4571_v24 = vor.u32 %v5635_v15, %v4570_v14  ;;  %v4764_v10 = vld [vmem:[%s8523_s5 + $0x3a8] sm:$0xf0]  ;;  %v5575_v14 = vld [vmem:[%s8523_s5 + $0x44] sm:$0xf0] }
 0x197   : > { %v4330_v8 = vld [vmem:[%s8523_s5 + $0x18] sm:$0xf] }
 0x198   : > { %v4714_v15 = vld [vmem:[%s8523_s5 + $0x318] sm:$0xf] }
 0x199   : > { %2365 = vmatpush.bf16.msra.mxu1 %v4419_v25  ;;  %2379 = vmatpush.bf16.msra.mxu2 %v4803_v28  ;;  %v4955_v25 = vor.u32 %v5731_v19, %v4954_v18  ;;  %v4522_v28 = vld [vmem:[%s8523_s5 + $0x198] sm:$0xf]  ;;  %v4767_v18 = vor.u32 %v5677_v56, %v4764_v10  ;;  %v5569_v19 = vld [vmem:[%s8523_s5 + $0x1c] sm:$0xf]  ;;  %v4916_v56 = vld [vmem:[%s8523_s5 + $0x4d0] sm:$0xf0] }
 0x19a   : > { %2393 = vmatpush.bf16.msra.mxu3 %v4423_v31  ;;  %2407 = vmatpush.bf16.msrb.mxu0 %v4807_v32  ;;  %v4959_v31 = vor.u32 %v5725_v22, %v4956_v23  ;;  %v4906_v32 = vld [vmem:[%s8523_s5 + $0x498] sm:$0xf]  ;;  %v4523_v40 = vor.u32 %v5623_v29, %v4522_v28  ;;  %v4716_v22 = vld [vmem:[%s8523_s5 + $0x348] sm:$0xf0]  ;;  %v4674_v23 = vld [vmem:[%s8523_s5 + $0x2c0] sm:$0xf]  ;;  %v4335_v35 = vor.u32 %v5569_v19, %v4332_v20 }
 0x19b   : > { %v4907_v41 = vor.u32 %v5719_v33, %v4906_v32  ;;  %v5756_v28 = vld [vmem:[%s8523_s5 + $0x5ec] sm:$0xf0]  ;;  %v5654_v29 = vld [vmem:[%s8523_s5 + $0x2c4] sm:$0xf]  ;;  %v4676_v32 = vld [vmem:[%s8523_s5 + $0x2f0] sm:$0xf0]  ;;  %v4719_v36 = vor.u32 %v5665_v21, %v4716_v22 }
 0x19c   : > { %v5750_v33 = vld [vmem:[%s8523_s5 + $0x5c4] sm:$0xf]  ;;  %v4484_v19 = vld [vmem:[%s8523_s5 + $0x170] sm:$0xf0] }
 0x19d   : > { %2366 = vmatpush.bf16.msra.mxu1 %v4371_v42  ;;  %2380 = vmatpush.bf16.msra.mxu2 %v4755_v38  ;;  %v4474_v42 = vld [vmem:[%s8523_s5 + $0x138] sm:$0xf]  ;;  %v5611_v38 = vld [vmem:[%s8523_s5 + $0x164] sm:$0xf0]  ;;  %v5702_v20 = vld [vmem:[%s8523_s5 + $0x444] sm:$0xf] }
 0x19e   : > { %2394 = vmatpush.bf16.msra.mxu3 %v4375_v47  ;;  %2408 = vmatpush.bf16.msrb.mxu0 %v4759_v48  ;;  %v5707_v47 = vld [vmem:[%s8523_s5 + $0x464] sm:$0xf0]  ;;  %v5605_v48 = vld [vmem:[%s8523_s5 + $0x13c] sm:$0xf]  ;;  %v4475_v52 = vor.u32 %v5611_v38, %v4474_v42  ;;  %v5648_v42 = vld [vmem:[%s8523_s5 + $0x28c] sm:$0xf0]  ;;  %v4679_v38 = vor.u32 %v5654_v29, %v4676_v32 }
 0x19f   : > { %v4859_v53 = vor.u32 %v5707_v47, %v4858_v46  ;;  %v4479_v39 = vor.u32 %v5605_v48, %v4476_v49  ;;  %v5744_v46 = vld [vmem:[%s8523_s5 + $0x58c] sm:$0xf0]  ;;  %v5642_v47 = vld [vmem:[%s8523_s5 + $0x264] sm:$0xf]  ;;  %v4628_v48 = vld [vmem:[%s8523_s5 + $0x290] sm:$0xf0] }
 0x1a0   : > { %v5738_v49 = vld [vmem:[%s8523_s5 + $0x564] sm:$0xf]  ;;  %v4868_v21 = vld [vmem:[%s8523_s5 + $0x470] sm:$0xf0] }
 0x1a1   : > { %2367 = vmatpush.bf16.msra.mxu1 %v4323_v58  ;;  %2381 = vmatpush.bf16.msra.mxu2 %v4707_v59  ;;  %v4810_v58 = vld [vmem:[%s8523_s5 + $0x3d8] sm:$0xf]  ;;  %v5695_v59 = vld [vmem:[%s8523_s5 + $0x404] sm:$0xf0]  ;;  %v4871_v29 = vor.u32 %v5702_v20, %v4868_v21  ;;  %v5594_v32 = vld [vmem:[%s8523_s5 + $0xe4] sm:$0xf] }
 0x1a2   : > { %2395 = vmatpush.bf16.msra.mxu3 %v4327_v63  ;;  %2409 = vmatpush.bf16.msrb.mxu0 %v4711_v0  ;;  %v4812_v63 = vld [vmem:[%s8523_s5 + $0x408] sm:$0xf0]  ;;  %v4427_v0 = vor.u32 %v5599_v55, %v4426_v54  ;;  %v5636_v54 = vld [vmem:[%s8523_s5 + $0x22c] sm:$0xf0]  ;;  %v4631_v55 = vor.u32 %v5642_v47, %v4628_v48  ;;  %v4388_v47 = vld [vmem:[%s8523_s5 + $0xb0] sm:$0xf0] }
 0x1a3   : > { %v5678_v48 = vld [vmem:[%s8523_s5 + $0x384] sm:$0xf]  ;;  %v5020_v20 = vld [vmem:[%s8523_s5 + $0x598] sm:$0xf0] }
 0x1a4   : > { %2368 = vmatmul.bf16.vlgmr.msra.gmra.mxu1 %v6880_v26  ;;  %2382 = vmatmul.bf16.vlgmr.msra.gmra.mxu2 %v6882_v27 }
 0x1a5   : > { %2416 = vmatpush.bf16.msrb.mxu1 %v4667_v1  ;;  %2430 = vmatpush.bf16.msrb.mxu2 %v5051_v2  ;;  %v4811_v1 = vor.u32 %v5695_v59, %v4810_v58  ;;  %v4378_v2 = vld [vmem:[%s8523_s5 + $0x78] sm:$0xf]  ;;  %v5732_v58 = vld [vmem:[%s8523_s5 + $0x52c] sm:$0xf0]  ;;  %v5630_v59 = vld [vmem:[%s8523_s5 + $0x204] sm:$0xf] }
 0x1a6   : > { %2444 = vmatpush.bf16.msrb.mxu3 %v4671_v5  ;;  %2458 = vmatpush.bf16.msra.mxu0 %v5055_v6  ;;  %v4815_v5 = vor.u32 %v5689_v62, %v4812_v63  ;;  %v4762_v6 = vld [vmem:[%s8523_s5 + $0x378] sm:$0xf]  ;;  %v4964_v62 = vld [vmem:[%s8523_s5 + $0x530] sm:$0xf0] }
 0x1a7   : > { %2396 = vmatmul.bf16.vlgmr.msra.gmra.mxu3 %v6880_v26  ;;  %2410 = vmatmul.bf16.vlgmr.msrb.gmra.mxu0 %v6882_v27 }
 0x1a9   : > { %2417 = vmatpush.bf16.msrb.mxu1 %v4619_v11  ;;  %2431 = vmatpush.bf16.msrb.mxu2 %v5003_v13  ;;  %v4379_v11 = vor.u32 %v5587_v3, %v4378_v2  ;;  %v4763_v13 = vor.u32 %v5683_v7, %v4762_v6  ;;  %v5624_v2 = vld [vmem:[%s8523_s5 + $0x1cc] sm:$0xf0]  ;;  %v4583_v3 = vor.u32 %v5630_v59, %v4580_v60  ;;  %v5618_v7 = vld [vmem:[%s8523_s5 + $0x1a4] sm:$0xf]  ;;  %v4340_v59 = vld [vmem:[%s8523_s5 + $0x50] sm:$0xf0] }
 0x1aa   : > { %2445 = vmatpush.bf16.msrb.mxu3 %v4623_v16  ;;  %2459 = vmatpush.bf16.msra.mxu0 %v5007_v17  ;;  %v5671_v16 = vld [vmem:[%s8523_s5 + $0x344] sm:$0xf0]  ;;  %v4383_v17 = vor.u32 %v5581_v9, %v4380_v44  ;;  %v5720_v6 = vld [vmem:[%s8523_s5 + $0x4cc] sm:$0xf0]  ;;  %v4532_v9 = vld [vmem:[%s8523_s5 + $0x1d0] sm:$0xf0] }
 0x1ab   : > { %v5714_v44 = vld [vmem:[%s8523_s5 + $0x4a4] sm:$0xf] }
 0x1ac   : > { %v5666_v60 = vld [vmem:[%s8523_s5 + $0x324] sm:$0xf] }
 0x1ad   : > { %2418 = vmatpush.bf16.msrb.mxu1 %v4571_v24  ;;  %2432 = vmatpush.bf16.msrb.mxu2 %v4955_v25  ;;  %v5660_v24 = vld [vmem:[%s8523_s5 + $0x2ec] sm:$0xf0]  ;;  %v5058_v25 = vld [vmem:[%s8523_s5 + $0x5c0] sm:$0xf] }
 0x1ae   : > { %2446 = vmatpush.bf16.msrb.mxu3 %v4575_v30  ;;  %2460 = vmatpush.bf16.msra.mxu0 %v4959_v31  ;;  %v4331_v30 = vor.u32 %v5575_v14, %v4330_v8  ;;  %v4715_v31 = vor.u32 %v5671_v16, %v4714_v15  ;;  %v4675_v37 = vor.u32 %v5660_v24, %v4674_v23  ;;  %v4866_v16 = vld [vmem:[%s8523_s5 + $0x440] sm:$0xf] }
 0x1af   : > { %v4535_v14 = vor.u32 %v5618_v7, %v4532_v9  ;;  %v4919_v15 = vor.u32 %v5714_v44, %v4916_v56  ;;  %v4434_v24 = vld [vmem:[%s8523_s5 + $0xe0] sm:$0xf]  ;;  %v5068_v7 = vld [vmem:[%s8523_s5 + $0x5f8] sm:$0xf0] }
 0x1b1   : > { %2419 = vmatpush.bf16.msrb.mxu1 %v4523_v40  ;;  %2433 = vmatpush.bf16.msrb.mxu2 %v4907_v41  ;;  %v5059_v40 = vor.u32 %v5756_v28, %v5058_v25  ;;  %v4626_v41 = vld [vmem:[%s8523_s5 + $0x260] sm:$0xf]  ;;  %v5600_v25 = vld [vmem:[%s8523_s5 + $0x10c] sm:$0xf0] }
 0x1b2   : > { %2447 = vmatpush.bf16.msrb.mxu3 %v4527_v43  ;;  %2461 = vmatpush.bf16.msra.mxu0 %v4911_v45  ;;  %v5063_v43 = vor.u32 %v5750_v33, %v5060_v34  ;;  %v5010_v45 = vld [vmem:[%s8523_s5 + $0x560] sm:$0xf]  ;;  %v4627_v51 = vor.u32 %v5648_v42, %v4626_v41  ;;  %v4436_v33 = vld [vmem:[%s8523_s5 + $0x110] sm:$0xf0]  ;;  %v5690_v34 = vld [vmem:[%s8523_s5 + $0x3e4] sm:$0xf] }
 0x1b3   : > { %v5588_v41 = vld [vmem:[%s8523_s5 + $0xac] sm:$0xf0]  ;;  %v4439_v42 = vor.u32 %v5594_v32, %v4436_v33  ;;  %v4588_v32 = vld [vmem:[%s8523_s5 + $0x238] sm:$0xf0]  ;;  %v5727_v33 = vld [vmem:[%s8523_s5 + $0x50c] sm:$0xf] }
 0x1b5   : > { %2420 = vmatpush.bf16.msrb.mxu1 %v4475_v52  ;;  %2434 = vmatpush.bf16.msrb.mxu2 %v4859_v53  ;;  %v5011_v52 = vor.u32 %v5744_v46, %v5010_v45  ;;  %v4578_v53 = vld [vmem:[%s8523_s5 + $0x200] sm:$0xf]  ;;  %v5684_v45 = vld [vmem:[%s8523_s5 + $0x3ac] sm:$0xf0]  ;;  %v5582_v46 = vld [vmem:[%s8523_s5 + $0x84] sm:$0xf] }
 0x1b6   : > { %2448 = vmatpush.bf16.msrb.mxu3 %v4479_v39  ;;  %2462 = vmatpush.bf16.msra.mxu0 %v4863_v57  ;;  %v5015_v39 = vor.u32 %v5738_v49, %v5012_v50  ;;  %v4962_v57 = vld [vmem:[%s8523_s5 + $0x500] sm:$0xf]  ;;  %v4579_v63 = vor.u32 %v5636_v54, %v4578_v53  ;;  %v4772_v49 = vld [vmem:[%s8523_s5 + $0x3b0] sm:$0xf0]  ;;  %v5576_v53 = vld [vmem:[%s8523_s5 + $0x4c] sm:$0xf0] }
 0x1b7   : > { %v4338_v50 = vld [vmem:[%s8523_s5 + $0x20] sm:$0xf] }
 0x1b8   : > { %v4722_v54 = vld [vmem:[%s8523_s5 + $0x320] sm:$0xf] }
 0x1b9   : > { %2421 = vmatpush.bf16.msrb.mxu1 %v4427_v0  ;;  %2435 = vmatpush.bf16.msrb.mxu2 %v4811_v1  ;;  %v4963_v0 = vor.u32 %v5732_v58, %v4962_v57  ;;  %v4530_v1 = vld [vmem:[%s8523_s5 + $0x1a0] sm:$0xf]  ;;  %v4775_v57 = vor.u32 %v5678_v48, %v4772_v49  ;;  %v5570_v58 = vld [vmem:[%s8523_s5 + $0x24] sm:$0xf]  ;;  %v4924_v48 = vld [vmem:[%s8523_s5 + $0x4d8] sm:$0xf0] }
 0x1ba   : > { %2449 = vmatpush.bf16.msrb.mxu3 %v4431_v4  ;;  %2463 = vmatpush.bf16.msra.mxu0 %v4815_v5  ;;  %v4967_v4 = vor.u32 %v5726_v61, %v4964_v62  ;;  %v4914_v5 = vld [vmem:[%s8523_s5 + $0x4a0] sm:$0xf]  ;;  %v4531_v10 = vor.u32 %v5624_v2, %v4530_v1  ;;  %v4724_v61 = vld [vmem:[%s8523_s5 + $0x350] sm:$0xf0]  ;;  %v4682_v62 = vld [vmem:[%s8523_s5 + $0x2c8] sm:$0xf]  ;;  %v4343_v9 = vor.u32 %v5570_v58, %v4340_v59 }
 0x1bb   : > { %v4915_v8 = vor.u32 %v5720_v6, %v4914_v5  ;;  %v5757_v1 = vld [vmem:[%s8523_s5 + $0x5f4] sm:$0xf0]  ;;  %v5655_v2 = vld [vmem:[%s8523_s5 + $0x2cc] sm:$0xf]  ;;  %v4684_v5 = vld [vmem:[%s8523_s5 + $0x2f8] sm:$0xf0]  ;;  %v4727_v44 = vor.u32 %v5666_v60, %v4724_v61 }
 0x1bc   : > { %v5751_v6 = vld [vmem:[%s8523_s5 + $0x5cc] sm:$0xf]  ;;  %v4492_v58 = vld [vmem:[%s8523_s5 + $0x178] sm:$0xf0] }
 0x1bd   : > { %2422 = vmatpush.bf16.msrb.mxu1 %v4379_v11  ;;  %2436 = vmatpush.bf16.msrb.mxu2 %v4763_v13  ;;  %v4482_v11 = vld [vmem:[%s8523_s5 + $0x140] sm:$0xf]  ;;  %v5612_v13 = vld [vmem:[%s8523_s5 + $0x16c] sm:$0xf0]  ;;  %v5703_v59 = vld [vmem:[%s8523_s5 + $0x44c] sm:$0xf] }
 0x1be   : > { %2450 = vmatpush.bf16.msrb.mxu3 %v4383_v17  ;;  %2464 = vmatpush.bf16.msra.mxu0 %v4767_v18  ;;  %v5708_v17 = vld [vmem:[%s8523_s5 + $0x46c] sm:$0xf0]  ;;  %v5606_v18 = vld [vmem:[%s8523_s5 + $0x144] sm:$0xf]  ;;  %v4483_v22 = vor.u32 %v5612_v13, %v4482_v11  ;;  %v5649_v11 = vld [vmem:[%s8523_s5 + $0x294] sm:$0xf0]  ;;  %v4687_v13 = vor.u32 %v5655_v2, %v4684_v5 }
 0x1bf   : > { %v4867_v23 = vor.u32 %v5708_v17, %v4866_v16  ;;  %v4487_v28 = vor.u32 %v5606_v18, %v4484_v19  ;;  %v5745_v16 = vld [vmem:[%s8523_s5 + $0x594] sm:$0xf0]  ;;  %v5643_v17 = vld [vmem:[%s8523_s5 + $0x26c] sm:$0xf]  ;;  %v4636_v18 = vld [vmem:[%s8523_s5 + $0x298] sm:$0xf0] }
 0x1c0   : > { %v5739_v19 = vld [vmem:[%s8523_s5 + $0x56c] sm:$0xf]  ;;  %v4876_v60 = vld [vmem:[%s8523_s5 + $0x478] sm:$0xf0] }
 0x1c1   : > { %2423 = vmatpush.bf16.msrb.mxu1 %v4331_v30  ;;  %2437 = vmatpush.bf16.msrb.mxu2 %v4715_v31  ;;  %v4818_v30 = vld [vmem:[%s8523_s5 + $0x3e0] sm:$0xf]  ;;  %v5696_v31 = vld [vmem:[%s8523_s5 + $0x40c] sm:$0xf0]  ;;  %v4879_v2 = vor.u32 %v5703_v59, %v4876_v60  ;;  %v5595_v5 = vld [vmem:[%s8523_s5 + $0xec] sm:$0xf] }
 0x1c2   : > { %2451 = vmatpush.bf16.msrb.mxu3 %v4335_v35  ;;  %2465 = vmatpush.bf16.msra.mxu0 %v4719_v36  ;;  %v4820_v35 = vld [vmem:[%s8523_s5 + $0x410] sm:$0xf0]  ;;  %v4435_v36 = vor.u32 %v5600_v25, %v4434_v24  ;;  %v5637_v24 = vld [vmem:[%s8523_s5 + $0x234] sm:$0xf0]  ;;  %v4639_v25 = vor.u32 %v5643_v17, %v4636_v18  ;;  %v4396_v17 = vld [vmem:[%s8523_s5 + $0xb8] sm:$0xf0] }
 0x1c3   : > { %v5679_v18 = vld [vmem:[%s8523_s5 + $0x38c] sm:$0xf] }
 0x1c4   : > { %2424 = vmatmul.bf16.vlgmr.msrb.gmra.mxu1 %v6880_v26  ;;  %2438 = vmatmul.bf16.vlgmr.msrb.gmra.mxu2 %v6882_v27 }
 0x1c5   : > { %2472 = vmatpush.bf16.msra.mxu1 %v4675_v37  ;;  %2486 = vmatpush.bf16.msra.mxu2 %v5059_v40  ;;  %v4819_v37 = vor.u32 %v5696_v31, %v4818_v30  ;;  %v4386_v40 = vld [vmem:[%s8523_s5 + $0x80] sm:$0xf]  ;;  %v5733_v30 = vld [vmem:[%s8523_s5 + $0x534] sm:$0xf0]  ;;  %v5631_v31 = vld [vmem:[%s8523_s5 + $0x20c] sm:$0xf] }
 0x1c6   : > { %2500 = vmatpush.bf16.msra.mxu3 %v4679_v38  ;;  %2514 = vmatpush.bf16.msrb.mxu0 %v5063_v43  ;;  %v4823_v38 = vor.u32 %v5690_v34, %v4820_v35  ;;  %v4770_v43 = vld [vmem:[%s8523_s5 + $0x380] sm:$0xf]  ;;  %v4972_v34 = vld [vmem:[%s8523_s5 + $0x538] sm:$0xf0] }
 0x1c7   : > { %2452 = vmatmul.bf16.vlgmr.msrb.gmra.mxu3 %v6880_v26  ;;  %2466 = vmatmul.bf16.vlgmr.msra.gmra.mxu0 %v6882_v27 }
 0x1c9   : > { %2473 = vmatpush.bf16.msra.mxu1 %v4627_v51  ;;  %2487 = vmatpush.bf16.msra.mxu2 %v5011_v52  ;;  %v4387_v51 = vor.u32 %v5588_v41, %v4386_v40  ;;  %v4771_v52 = vor.u32 %v5684_v45, %v4770_v43  ;;  %v5625_v40 = vld [vmem:[%s8523_s5 + $0x1d4] sm:$0xf0]  ;;  %v4591_v41 = vor.u32 %v5631_v31, %v4588_v32  ;;  %v5619_v45 = vld [vmem:[%s8523_s5 + $0x1ac] sm:$0xf]  ;;  %v4348_v31 = vld [vmem:[%s8523_s5 + $0x58] sm:$0xf0] }
 0x1ca   : > { %2501 = vmatpush.bf16.msra.mxu3 %v4631_v55  ;;  %2515 = vmatpush.bf16.msrb.mxu0 %v5015_v39  ;;  %v5672_v55 = vld [vmem:[%s8523_s5 + $0x34c] sm:$0xf0]  ;;  %v4391_v39 = vor.u32 %v5582_v46, %v4388_v47  ;;  %v5721_v43 = vld [vmem:[%s8523_s5 + $0x4d4] sm:$0xf0]  ;;  %v4540_v46 = vld [vmem:[%s8523_s5 + $0x1d8] sm:$0xf0] }
 0x1cb   : > { %v5715_v47 = vld [vmem:[%s8523_s5 + $0x4ac] sm:$0xf] }
 0x1cc   : > { %v5667_v32 = vld [vmem:[%s8523_s5 + $0x32c] sm:$0xf] }
 0x1cd   : > { %2474 = vmatpush.bf16.msra.mxu1 %v4579_v63  ;;  %2488 = vmatpush.bf16.msra.mxu2 %v4963_v0  ;;  %v5661_v63 = vld [vmem:[%s8523_s5 + $0x2f4] sm:$0xf0]  ;;  %v5066_v0 = vld [vmem:[%s8523_s5 + $0x5c8] sm:$0xf] }
 0x1ce   : > { %2502 = vmatpush.bf16.msra.mxu3 %v4583_v3  ;;  %2516 = vmatpush.bf16.msrb.mxu0 %v4967_v4  ;;  %v4339_v3 = vor.u32 %v5576_v53, %v4338_v50  ;;  %v4723_v4 = vor.u32 %v5672_v55, %v4722_v54  ;;  %v4683_v56 = vor.u32 %v5661_v63, %v4682_v62  ;;  %v4874_v55 = vld [vmem:[%s8523_s5 + $0x448] sm:$0xf] }
 0x1cf   : > { %v4543_v53 = vor.u32 %v5619_v45, %v4540_v46  ;;  %v4927_v54 = vor.u32 %v5715_v47, %v4924_v48  ;;  %v4442_v63 = vld [vmem:[%s8523_s5 + $0xe8] sm:$0xf] }
 0x1d1   : > { %2475 = vmatpush.bf16.msra.mxu1 %v4531_v10  ;;  %2489 = vmatpush.bf16.msra.mxu2 %v4915_v8  ;;  %v5067_v10 = vor.u32 %v5757_v1, %v5066_v0  ;;  %v4634_v8 = vld [vmem:[%s8523_s5 + $0x268] sm:$0xf]  ;;  %v5601_v0 = vld [vmem:[%s8523_s5 + $0x114] sm:$0xf0] }
 0x1d2   : > { %2503 = vmatpush.bf16.msra.mxu3 %v4535_v14  ;;  %2517 = vmatpush.bf16.msrb.mxu0 %v4919_v15  ;;  %v5071_v14 = vor.u32 %v5751_v6, %v5068_v7  ;;  %v5018_v15 = vld [vmem:[%s8523_s5 + $0x568] sm:$0xf]  ;;  %v4635_v21 = vor.u32 %v5649_v11, %v4634_v8  ;;  %v4444_v6 = vld [vmem:[%s8523_s5 + $0x118] sm:$0xf0]  ;;  %v5691_v7 = vld [vmem:[%s8523_s5 + $0x3ec] sm:$0xf] }
 0x1d3   : > { %v5589_v8 = vld [vmem:[%s8523_s5 + $0xb4] sm:$0xf0]  ;;  %v4447_v11 = vor.u32 %v5595_v5, %v4444_v6 }
 0x1d5   : > { %2476 = vmatpush.bf16.msra.mxu1 %v4483_v22  ;;  %2490 = vmatpush.bf16.msra.mxu2 %v4867_v23  ;;  %v5019_v22 = vor.u32 %v5745_v16, %v5018_v15  ;;  %v4586_v23 = vld [vmem:[%s8523_s5 + $0x208] sm:$0xf]  ;;  %v5685_v15 = vld [vmem:[%s8523_s5 + $0x3b4] sm:$0xf0]  ;;  %v5583_v16 = vld [vmem:[%s8523_s5 + $0x8c] sm:$0xf] }
 0x1d6   : > { %2504 = vmatpush.bf16.msra.mxu3 %v4487_v28  ;;  %2518 = vmatpush.bf16.msrb.mxu0 %v4871_v29  ;;  %v5023_v28 = vor.u32 %v5739_v19, %v5020_v20  ;;  %v4970_v29 = vld [vmem:[%s8523_s5 + $0x508] sm:$0xf]  ;;  %v4587_v35 = vor.u32 %v5637_v24, %v4586_v23  ;;  %v4780_v19 = vld [vmem:[%s8523_s5 + $0x3b8] sm:$0xf0]  ;;  %v5577_v23 = vld [vmem:[%s8523_s5 + $0x54] sm:$0xf0]  ;;  %v4399_v24 = vor.u32 %v5583_v16, %v4396_v17 }
 0x1d9   : > { %2477 = vmatpush.bf16.msra.mxu1 %v4435_v36  ;;  %2491 = vmatpush.bf16.msra.mxu2 %v4819_v37  ;;  %v4971_v36 = vor.u32 %v5733_v30, %v4970_v29  ;;  %v4538_v37 = vld [vmem:[%s8523_s5 + $0x1a8] sm:$0xf]  ;;  %v5673_v29 = vld [vmem:[%s8523_s5 + $0x354] sm:$0xf0]  ;;  %v5571_v30 = vld [vmem:[%s8523_s5 + $0x2c] sm:$0xf] }
 0x1da   : > { %2505 = vmatpush.bf16.msra.mxu3 %v4439_v42  ;;  %2519 = vmatpush.bf16.msrb.mxu0 %v4823_v38  ;;  %v4975_v42 = vor.u32 %v5727_v33, %v4972_v34  ;;  %v4922_v38 = vld [vmem:[%s8523_s5 + $0x4a8] sm:$0xf]  ;;  %v4539_v49 = vor.u32 %v5625_v40, %v4538_v37  ;;  %v4732_v33 = vld [vmem:[%s8523_s5 + $0x358] sm:$0xf0]  ;;  %v7655_v40 = vld [vmem:[%s8524_s6] sm:$0xff] }
 0x1db   : > { %v4923_v50 = vor.u32 %v5721_v43, %v4922_v38  ;;  %v4735_v37 = vor.u32 %v5667_v32, %v4732_v33  ;;  %v1255_v43 = vperm.slane %v7655_v40, 1  ;;  %v5785_v32 = vld [vmem:[%s8525_s7 + $0x98] sm:$0xf0]  ;;  %v5274_v33 = vld [vmem:[%s8525_s7 + $0x150] sm:$0xf] }
 0x1dd   : > { %2478 = vmatpush.bf16.msra.mxu1 %v4387_v51  ;;  %2492 = vmatpush.bf16.msra.mxu2 %v4771_v52  ;;  %v4490_v51 = vld [vmem:[%s8523_s5 + $0x148] sm:$0xf]  ;;  %v5613_v52 = vld [vmem:[%s8523_s5 + $0x174] sm:$0xf0] }
 0x1de   : > { %2506 = vmatpush.bf16.msra.mxu3 %v4391_v39  ;;  %2520 = vmatpush.bf16.msrb.mxu0 %v4775_v57  ;;  %v5709_v39 = vld [vmem:[%s8523_s5 + $0x474] sm:$0xf0]  ;;  %v5607_v57 = vld [vmem:[%s8523_s5 + $0x14c] sm:$0xf]  ;;  %v4491_v61 = vor.u32 %v5613_v52, %v4490_v51 }
 0x1df   : > { %v4875_v62 = vor.u32 %v5709_v39, %v4874_v55  ;;  %v4495_v1 = vor.u32 %v5607_v57, %v4492_v58 }
 0x1e1   : > { %2479 = vmatpush.bf16.msra.mxu1 %v4339_v3  ;;  %2493 = vmatpush.bf16.msra.mxu2 %v4723_v4  ;;  %v4826_v3 = vld [vmem:[%s8523_s5 + $0x3e8] sm:$0xf]  ;;  %v5697_v4 = vld [vmem:[%s8523_s5 + $0x414] sm:$0xf0] }
 0x1e2   : > { %2507 = vmatpush.bf16.msra.mxu3 %v4343_v9  ;;  %2521 = vmatpush.bf16.msrb.mxu0 %v4727_v44  ;;  %v4828_v9 = vld [vmem:[%s8523_s5 + $0x418] sm:$0xf0]  ;;  %v4443_v44 = vor.u32 %v5601_v0, %v4442_v63  ;;  %v1257_v0 = vperm.slane %v7655_v40, 3 }
 0x1e4   : > { %2480 = vmatmul.bf16.vlgmr.msra.gmra.mxu1 %v6880_v26  ;;  %2494 = vmatmul.bf16.vlgmr.msra.gmra.mxu2 %v6882_v27 }
 0x1e5   : > { %2528 = vmatpush.bf16.msrb.mxu1 %v4683_v56  ;;  %2542 = vmatpush.bf16.msrb.mxu2 %v5067_v10  ;;  %v4827_v56 = vor.u32 %v5697_v4, %v4826_v3  ;;  %v4394_v10 = vld [vmem:[%s8523_s5 + $0x88] sm:$0xf] }
 0x1e6   : > { %2556 = vmatpush.bf16.msrb.mxu3 %v4687_v13  ;;  %2570 = vmatpush.bf16.msra.mxu0 %v5071_v14  ;;  %v4831_v13 = vor.u32 %v5691_v7, %v4828_v9  ;;  %v4778_v14 = vld [vmem:[%s8523_s5 + $0x388] sm:$0xf]  ;;  %v4395_v20 = vor.u32 %v5589_v8, %v4394_v10 }
 0x1e7   : > { %2508 = vmatmul.bf16.vlgmr.msra.gmra.mxu3 %v6880_v26  ;;  %2522 = vmatmul.bf16.vlgmr.msrb.gmra.mxu0 %v6882_v27 }
 0x1e9   : > { %2529 = vmatpush.bf16.msrb.mxu1 %v4635_v21  ;;  %2543 = vmatpush.bf16.msrb.mxu2 %v5019_v22  ;;  %v4779_v21 = vor.u32 %v5685_v15, %v4778_v14  ;;  %v4346_v22 = vld [vmem:[%s8523_s5 + $0x28] sm:$0xf] }
 0x1ea   : > { %2557 = vmatpush.bf16.msrb.mxu3 %v4639_v25  ;;  %2571 = vmatpush.bf16.msra.mxu0 %v5023_v28  ;;  %v4783_v25 = vor.u32 %v5679_v18, %v4780_v19  ;;  %v4730_v28 = vld [vmem:[%s8523_s5 + $0x328] sm:$0xf]  ;;  %v4347_v34 = vor.u32 %v5577_v23, %v4346_v22 }
 0x1eb   : > { %v5190_v23 = vld [vmem:[%s8525_s7 + $0xa8] sm:$0xf] }
 0x1ed   : > { %2530 = vmatpush.bf16.msrb.mxu1 %v4587_v35  ;;  %2544 = vmatpush.bf16.msrb.mxu2 %v4971_v36  ;;  %v4731_v35 = vor.u32 %v5673_v29, %v4730_v28  ;;  %v4351_v36 = vor.u32 %v5571_v30, %v4348_v31  ;;  %v5812_v29 = vld [vmem:[%s8525_s7 + $0x170] sm:$0xf0]  ;;  %v5178_v31 = vld [vmem:[%s8525_s7 + $0x90] sm:$0xf] }
 0x1ee   : > { %2558 = vmatpush.bf16.msrb.mxu3 %v4591_v41  ;;  %2572 = vmatpush.bf16.msra.mxu0 %v4975_v42  ;;  %v1254_v42 = vperm.slane %v7655_v40, 0 }
 0x1f1   : > { %2531 = vmatpush.bf16.msrb.mxu1 %v4539_v49  ;;  %2545 = vmatpush.bf16.msrb.mxu2 %v4923_v50 }
 0x1f2   : > { %2559 = vmatpush.bf16.msrb.mxu3 %v4543_v53  ;;  %2573 = vmatpush.bf16.msra.mxu0 %v4927_v54 }
 0x1f5   : > { %2532 = vmatpush.bf16.msrb.mxu1 %v4491_v61  ;;  %2546 = vmatpush.bf16.msrb.mxu2 %v4875_v62  ;;  %v1256_v61 = vperm.slane %v7655_v40, 2 }
 0x1f6   : > { %2560 = vmatpush.bf16.msrb.mxu3 %v4495_v1  ;;  %2574 = vmatpush.bf16.msra.mxu0 %v4879_v2 }
 0x1f9   : > { %2533 = vmatpush.bf16.msrb.mxu1 %v4443_v44  ;;  %2547 = vmatpush.bf16.msrb.mxu2 %v4827_v56 }
 0x1fa   : > { %2561 = vmatpush.bf16.msrb.mxu3 %v4447_v11  ;;  %2575 = vmatpush.bf16.msra.mxu0 %v4831_v13 }
 0x1fd   : > { %2534 = vmatpush.bf16.msrb.mxu1 %v4395_v20  ;;  %2548 = vmatpush.bf16.msrb.mxu2 %v4779_v21 }
 0x1fe   : > { %2562 = vmatpush.bf16.msrb.mxu3 %v4399_v24  ;;  %2576 = vmatpush.bf16.msra.mxu0 %v4783_v25  ;;  %v5788_v24 = vld [vmem:[%s8525_s7 + $0xb0] sm:$0xf0]  ;;  %v5286_v25 = vld [vmem:[%s8525_s7 + $0x168] sm:$0xf] }
 0x1ff   : > { %v5191_v28 = vor.u32 %v5788_v24, %v5190_v23  ;;  %v5287_v30 = vor.u32 %v5812_v29, %v5286_v25  ;;  %v5478_v25 = vld [vmem:[%s8525_s7 + $0x2e8] sm:$0xf]  ;;  %v1259_v29 = vperm.slane %v7655_v40, 5 }
 0x200   : > { %v2257_v41 = vpop.f32.mrf.mxu1 }
 0x201   : > { %2535 = vmatpush.bf16.msrb.mxu1 %v4347_v34  ;;  %2549 = vmatpush.bf16.msrb.mxu2 %v4731_v35  ;;  %v2299_v38 = vpop.f32.mrf.mxu0  ;;  %v2258_v45 = vadd.f32 %v2257_v41, %v1254_v42  ;;  %v5179_v35 = vor.u32 %v5785_v32, %v5178_v31  ;;  %v7801_v31 = vld [vmem:[%s8524_s6 + $0x8] sm:$0xf] }
 0x202   : > { %2563 = vmatpush.bf16.msrb.mxu3 %v4351_v36  ;;  %2577 = vmatpush.bf16.msra.mxu0 %v4735_v37  ;;  %v5809_v36 = vld [vmem:[%s8525_s7 + $0x158] sm:$0xf0] }
 0x204   : > { %2536 = vmatmul.bf16.vlgmr.msrb.gmra.mxu1 %v6880_v26  ;;  %2550 = vmatmul.bf16.vlgmr.msrb.gmra.mxu2 %v6882_v27 }
 0x205   : > { %2564 = vmatmul.bf16.vlgmr.msrb.gmra.mxu3 %v6880_v26  ;;  %2578 = vmatmul.bf16.vlgmr.msra.gmra.mxu0 %v6882_v27 }
 0x206   : > { %v2271_v46 = vpop.f32.mrf.mxu2  ;;  %3440 = vmatpush.bf16.msra.mxu1 %v5191_v28  ;;  %3459 = vmatpush.bf16.msra.mxu2 %v5287_v30  ;;  %v5860_v28 = vld [vmem:[%s8525_s7 + $0x2f0] sm:$0xf0] }
 0x207   : > { %v2285_v47 = vpop.f32.mrf.mxu3  ;;  %v2272_v48 = vadd.f32 %v2271_v46, %v2258_v45  ;;  %v5782_v45 = vld [vmem:[%s8525_s7 + $0x80] sm:$0xf0]  ;;  %v5262_v46 = vld [vmem:[%s8525_s7 + $0x138] sm:$0xf]  ;;  %v5479_v32 = vor.u32 %v5860_v28, %v5478_v25  ;;  %v5264_v25 = vld [vmem:[%s8525_s7 + $0x144] sm:$0xf0] }
 0x208   : > { %v2286_v49 = vadd.f32 %v2285_v47, %v1255_v43  ;;  %v2259_v50 = vpop.f32.mrf.mxu1  ;;  %v5346_v28 = vld [vmem:[%s8525_s7 + $0x1e0] sm:$0xf] }
 0x209   : > { %v2584_v51 = vmax.f32 %v2272_v48, 0.0  ;;  %v2301_v52 = vpop.f32.mrf.mxu0  ;;  %v2260_v54 = vadd.f32 %v2259_v50, %v1254_v42  ;;  %v5275_v42 = vor.u32 %v5809_v36, %v5274_v33  ;;  %v5806_v48 = vld [vmem:[%s8525_s7 + $0x140] sm:$0xf0]  ;;  %v5154_v50 = vld [vmem:[%s8525_s7 + $0x60] sm:$0xf]  ;;  %3497 = vmatpush.bf16.msrb.mxu0 %v5479_v32 }
 0x20a   : > { %v2300_v26 = vadd.f32 %v2299_v38, %v2286_v49  ;;  %3441 = vmatpush.bf16.msra.mxu1 %v5179_v35  ;;  %v5263_v49 = vor.u32 %v5806_v48, %v5262_v46  ;;  %v5787_v36 = vld [vmem:[%s8525_s7 + $0xac] sm:$0xf]  ;;  %v5370_v48 = vld [vmem:[%s8525_s7 + $0x210] sm:$0xf] }
 0x20b   : > { %3460 = vmatpush.bf16.msra.mxu2 %v5275_v42  ;;  %v5192_v42 = vld [vmem:[%s8525_s7 + $0xb4] sm:$0xf0] }
 0x20c   : > { %v2585_v27 = vmax.f32 %v2300_v26, 0.0  ;;  %v5779_v26 = vld [vmem:[%s8525_s7 + $0x68] sm:$0xf0]  ;;  %v5195_v46 = vor.u32 %v5787_v36, %v5192_v42 }
 0x20e   : > { %v2588_v53 = vpack.c.bf16 %v2585_v27, %v2584_v51  ;;  %v2273_v55 = vpop.f32.mrf.mxu2  ;;  %v5250_v51 = vld [vmem:[%s8525_s7 + $0x120] sm:$0xf] }
 0x20f   : > { %v2287_v39 = vpop.f32.mrf.mxu3  ;;  %v2274_v57 = vadd.f32 %v2273_v55, %v2260_v54  ;;  %3461 = vmatpush.bf16.msra.mxu2 %v5263_v49  ;;  %v5833_v49 = vld [vmem:[%s8525_s7 + $0x218] sm:$0xf0] }
 0x210   : > { %2590 = vst [vmem:[#allocation4] sm:$0xff] %v2588_v53  ;;  %v2288_v58 = vadd.f32 %v2287_v39, %v1255_v43  ;;  %v2313_v59 = vpop.f32.mrf.mxu1  ;;  %v5166_v43 = vld [vmem:[%s8525_s7 + $0x78] sm:$0xf]  ;;  %v5803_v53 = vld [vmem:[%s8525_s7 + $0x128] sm:$0xf0] }
 0x211   : > { %v2664_v62 = vmax.f32 %v2274_v57, 0.0  ;;  %v2314_v2 = vadd.f32 %v2313_v59, %v1256_v61  ;;  %v2355_v4 = vpop.f32.mrf.mxu0  ;;  %v5167_v47 = vor.u32 %v5782_v45, %v5166_v43  ;;  %v5251_v39 = vor.u32 %v5803_v53, %v5250_v51  ;;  %v5776_v59 = vld [vmem:[%s8525_s7 + $0x50] sm:$0xf0]  ;;  %v5811_v43 = vld [vmem:[%s8525_s7 + $0x16c] sm:$0xf] }
 0x212   : > { %v2302_v60 = vadd.f32 %v2301_v52, %v2288_v58  ;;  %v5155_v52 = vor.u32 %v5779_v26, %v5154_v50  ;;  %v5142_v58 = vld [vmem:[%s8525_s7 + $0x48] sm:$0xf]  ;;  %v1258_v50 = vperm.slane %v7655_v40, 4  ;;  %v1262_v26 = vperm.slane %v7801_v31, 0  ;;  %v5466_v53 = vld [vmem:[%s8525_s7 + $0x2d0] sm:$0xf] }
 0x213   : > { %3442 = vmatpush.bf16.msra.mxu1 %v5167_v47  ;;  %3462 = vmatpush.bf16.msra.mxu2 %v5251_v39  ;;  %v5288_v47 = vld [vmem:[%s8525_s7 + $0x174] sm:$0xf0]  ;;  %v5857_v39 = vld [vmem:[%s8525_s7 + $0x2d8] sm:$0xf0] }
 0x214   : > { %v2665_v63 = vmax.f32 %v2302_v60, 0.0  ;;  %v5238_v60 = vld [vmem:[%s8525_s7 + $0x108] sm:$0xf]  ;;  %v5291_v51 = vor.u32 %v5811_v43, %v5288_v47  ;;  %v5442_v43 = vld [vmem:[%s8525_s7 + $0x2a0] sm:$0xf] }
 0x216   : > { %v2668_v1 = vpack.c.bf16 %v2665_v63, %v2664_v62  ;;  %v2327_v3 = vpop.f32.mrf.mxu2  ;;  %v5800_v62 = vld [vmem:[%s8525_s7 + $0x110] sm:$0xf0] }
 0x217   : > { %v2341_v5 = vpop.f32.mrf.mxu3  ;;  %v2328_v6 = vadd.f32 %v2327_v3, %v2314_v2  ;;  %3443 = vmatpush.bf16.msra.mxu1 %v5155_v52  ;;  %v5239_v63 = vor.u32 %v5800_v62, %v5238_v60  ;;  %v5226_v2 = vld [vmem:[%s8525_s7 + $0xf0] sm:$0xf]  ;;  %v5371_v52 = vor.u32 %v5833_v49, %v5370_v48  ;;  %v5784_v60 = vld [vmem:[%s8525_s7 + $0x94] sm:$0xf] }
 0x218   : > { %2670 = vst [vmem:[#allocation4 + $0x20] sm:$0xff] %v2668_v1  ;;  %v2342_v7 = vadd.f32 %v2341_v5, %v1257_v0  ;;  %v2315_v44 = vpop.f32.mrf.mxu1  ;;  %v5773_v1 = vld [vmem:[%s8525_s7 + $0x38] sm:$0xf0]  ;;  %v5808_v62 = vld [vmem:[%s8525_s7 + $0x154] sm:$0xf] }
 0x219   : > { %v2586_v56 = vmax.f32 %v2328_v6, 0.0  ;;  %v2316_v11 = vadd.f32 %v2315_v44, %v1256_v61  ;;  %v2357_v17 = vpop.f32.mrf.mxu0  ;;  %v5143_v61 = vor.u32 %v5776_v59, %v5142_v58  ;;  %3463 = vmatpush.bf16.msra.mxu2 %v5239_v63  ;;  %v5797_v5 = vld [vmem:[%s8525_s7 + $0xf8] sm:$0xf0]  ;;  %v5118_v44 = vld [vmem:[%s8525_s7 + $0x18] sm:$0xf]  ;;  %v5467_v58 = vor.u32 %v5857_v39, %v5466_v53 }
 0x21a   : > { %v2356_v9 = vadd.f32 %v2355_v4, %v2342_v7  ;;  %v1260_v63 = vperm.slane %v7655_v40, 6  ;;  %v1264_v53 = vperm.slane %v7801_v31, 2  ;;  %v5778_v39 = vld [vmem:[%s8525_s7 + $0x64] sm:$0xf] }
 0x21b   : > { %3444 = vmatpush.bf16.msra.mxu1 %v5143_v61  ;;  %v5180_v61 = vld [vmem:[%s8525_s7 + $0x9c] sm:$0xf0]  ;;  %3498 = vmatpush.bf16.msrb.mxu0 %v5467_v58  ;;  %v5156_v58 = vld [vmem:[%s8525_s7 + $0x6c] sm:$0xf0] }
 0x21c   : > { %v2587_v10 = vmax.f32 %v2356_v9, 0.0  ;;  %v5227_v9 = vor.u32 %v5797_v5, %v5226_v2  ;;  %v5358_v2 = vld [vmem:[%s8525_s7 + $0x1f8] sm:$0xf] }
 0x21e   : > { %v2589_v8 = vpack.c.bf16 %v2587_v10, %v2586_v56  ;;  %v2329_v13 = vpop.f32.mrf.mxu2  ;;  %3464 = vmatpush.bf16.msra.mxu2 %v5227_v9  ;;  %v5770_v56 = vld [vmem:[%s8525_s7 + $0x20] sm:$0xf0]  ;;  %v5214_v10 = vld [vmem:[%s8525_s7 + $0xd8] sm:$0xf] }
 0x21f   : > { %v2343_v14 = vpop.f32.mrf.mxu3  ;;  %v2330_v15 = vadd.f32 %v2329_v13, %v2316_v11  ;;  %v5119_v11 = vor.u32 %v5770_v56, %v5118_v44  ;;  %v5794_v13 = vld [vmem:[%s8525_s7 + $0xe0] sm:$0xf0] }
 0x220   : > { %2591 = vst [vmem:[#allocation4 + $0x8] sm:$0xff] %v2589_v8  ;;  %v2344_v16 = vadd.f32 %v2343_v14, %v1257_v0  ;;  %v5130_v0 = vld [vmem:[%s8525_s7 + $0x30] sm:$0xf]  ;;  %v5215_v14 = vor.u32 %v5794_v13, %v5214_v10  ;;  %v5830_v56 = vld [vmem:[%s8525_s7 + $0x200] sm:$0xf0] }
 0x221   : > { %v2666_v19 = vmax.f32 %v2330_v15, 0.0  ;;  %v7661_v22 = vpop.f32.mrf.mxu1  ;;  %v5131_v4 = vor.u32 %v5773_v1, %v5130_v0  ;;  %v5106_v15 = vld [vmem:[%s8525_s7] sm:$0xf]  ;;  %v1263_v0 = vperm.slane %v7801_v31, 1  ;;  %v5454_v10 = vld [vmem:[%s8525_s7 + $0x2b8] sm:$0xf] }
 0x222   : > { %v2358_v18 = vadd.f32 %v2357_v17, %v2344_v16  ;;  %3465 = vmatpush.bf16.msra.mxu2 %v5215_v14  ;;  %v5767_v16 = vld [vmem:[%s8525_s7 + $0x8] sm:$0xf0]  ;;  %v5202_v17 = vld [vmem:[%s8525_s7 + $0xc0] sm:$0xf]  ;;  %v5359_v14 = vor.u32 %v5830_v56, %v5358_v2  ;;  %v5824_v56 = vld [vmem:[%s8525_s7 + $0x1d0] sm:$0xf0] }
 0x223   : > { %3445 = vmatpush.bf16.msra.mxu1 %v5131_v4  ;;  %v5276_v1 = vld [vmem:[%s8525_s7 + $0x15c] sm:$0xf0]  ;;  %v2370_v4 = vadd.f32 %v7661_v22, %v1258_v50 }
 0x224   : > { %v2667_v20 = vmax.f32 %v2358_v18, 0.0  ;;  %v7689_v37 = vpop.f32.mrf.mxu0  ;;  %v5107_v18 = vor.u32 %v5767_v16, %v5106_v15  ;;  %v5279_v44 = vor.u32 %v5808_v62, %v5276_v1  ;;  %v5159_v62 = vor.u32 %v5778_v39, %v5156_v58  ;;  %v5252_v1 = vld [vmem:[%s8525_s7 + $0x12c] sm:$0xf0] }
 0x226   : > { %v2669_v21 = vpack.c.bf16 %v2667_v20, %v2666_v19  ;;  %v5791_v19 = vld [vmem:[%s8525_s7 + $0xc8] sm:$0xf0]  ;;  %v5382_v20 = vld [vmem:[%s8525_s7 + $0x228] sm:$0xf] }
 0x227   : > { %v7684_v34 = vpop.f32.mrf.mxu2  ;;  %3446 = vmatpush.bf16.msra.mxu1 %v5119_v11  ;;  %v5203_v23 = vor.u32 %v5791_v19, %v5202_v17  ;;  %v5854_v11 = vld [vmem:[%s8525_s7 + $0x2c0] sm:$0xf0] }
 0x228   : > { %2671 = vst [vmem:[#allocation4 + $0x28] sm:$0xff] %v2669_v21  ;;  %v5836_v21 = vld [vmem:[%s8525_s7 + $0x230] sm:$0xf0]  ;;  %v5455_v15 = vor.u32 %v5854_v11, %v5454_v10  ;;  %v2384_v16 = vadd.f32 %v7684_v34, %v2370_v4 }
 0x229   : > { %v7693_v38 = vpop.f32.mrf.mxu1  ;;  %v5383_v24 = vor.u32 %v5836_v21, %v5382_v20  ;;  %3466 = vmatpush.bf16.msra.mxu2 %v5203_v23  ;;  %v5781_v21 = vld [vmem:[%s8525_s7 + $0x7c] sm:$0xf] }
 0x22a   : > { %v7691_v41 = vpop.f32.mrf.mxu3  ;;  %v2372_v22 = vadd.f32 %v7693_v38, %v1258_v50  ;;  %v5168_v38 = vld [vmem:[%s8525_s7 + $0x84] sm:$0xf0]  ;;  %v5805_v23 = vld [vmem:[%s8525_s7 + $0x13c] sm:$0xf]  ;;  %3499 = vmatpush.bf16.msrb.mxu0 %v5455_v15  ;;  %v5848_v15 = vld [vmem:[%s8525_s7 + $0x290] sm:$0xf0] }
 0x22b   : > { %3447 = vmatpush.bf16.msra.mxu1 %v5107_v18  ;;  %3478 = vmatpush.bf16.msra.mxu3 %v5383_v24  ;;  %v2398_v59 = vadd.f32 %v7691_v41, %v1259_v29  ;;  %v5183_v41 = vor.u32 %v5784_v60, %v5180_v61  ;;  %v5171_v24 = vor.u32 %v5781_v21, %v5168_v38  ;;  %v5775_v38 = vld [vmem:[%s8525_s7 + $0x4c] sm:$0xf] }
 0x22c   : > { %v7721_v54 = vpop.f32.mrf.mxu0  ;;  %v5267_v48 = vor.u32 %v5805_v23, %v5264_v25  ;;  %v5144_v23 = vld [vmem:[%s8525_s7 + $0x54] sm:$0xf0] }
 0x22d   : > { %3535 = vmatpush.bf16.msrb.mxu2 %v5291_v51  ;;  %v7868_v17 = vadd.f32 %v7689_v37, %v2398_v59 }
 0x22f   : > { %v7716_v27 = vpop.f32.mrf.mxu2  ;;  %3516 = vmatpush.bf16.msrb.mxu1 %v5195_v46  ;;  %3479 = vmatpush.bf16.msra.mxu3 %v5371_v52 }
 0x230   : > { %v7880_v34 = vadd.f32 %v7716_v27, %v2372_v22 }
 0x231   : > { %3536 = vmatpush.bf16.msrb.mxu2 %v5279_v44  ;;  %v5334_v44 = vld [vmem:[%s8525_s7 + $0x1c8] sm:$0xf] }
 0x232   : > { %v7723_v55 = vpop.f32.mrf.mxu3 }
 0x233   : > { %v2400_v5 = vadd.f32 %v7723_v55, %v1259_v29  ;;  %v1261_v55 = vperm.slane %v7655_v40, 7  ;;  %3517 = vmatpush.bf16.msrb.mxu1 %v5183_v41  ;;  %3480 = vmatpush.bf16.msra.mxu3 %v5359_v14  ;;  %v5827_v29 = vld [vmem:[%s8525_s7 + $0x1e8] sm:$0xf0]  ;;  %v5802_v41 = vld [vmem:[%s8525_s7 + $0x124] sm:$0xf]  ;;  %v5335_v14 = vor.u32 %v5824_v56, %v5334_v44  ;;  %v1265_v44 = vperm.slane %v7801_v31, 3 }
 0x234   : > { %v5347_v49 = vor.u32 %v5827_v29, %v5346_v28  ;;  %v5799_v29 = vld [vmem:[%s8525_s7 + $0x10c] sm:$0xf] }
 0x235   : > { %v7894_v27 = vadd.f32 %v7721_v54, %v2400_v5  ;;  %3537 = vmatpush.bf16.msrb.mxu2 %v5267_v48  ;;  %v5847_v31 = vld [vmem:[%s8525_s7 + $0x28c] sm:$0xf] }
 0x237   : > { %3518 = vmatpush.bf16.msrb.mxu1 %v5171_v24  ;;  %3481 = vmatpush.bf16.msra.mxu3 %v5347_v49 }
 0x23b   : > { %3519 = vmatpush.bf16.msrb.mxu1 %v5159_v62  ;;  %3482 = vmatpush.bf16.msra.mxu3 %v5335_v14 }
 0x241   : > { %v7725_v57 = vpop.f32.mrf.mxu1 }
 0x244   : > { %v7753_v6 = vpop.f32.mrf.mxu0 }
 0x247   : > { %v7748_v3 = vpop.f32.mrf.mxu2 }
 0x249   : > { %v7766_v8 = vpop.f32.mrf.mxu1 }
 0x24a   : > { %v7755_v7 = vpop.f32.mrf.mxu3 }
 0x24c   : > { %v7803_v33 = vpop.f32.mrf.mxu0 }
 0x24f   : > { %v7796_v30 = vpop.f32.mrf.mxu2 }
 0x252   : > { %v7805_v35 = vpop.f32.mrf.mxu3 }
 0x261   : > { %v2481_v45 = vpop.f32.mrf.mxu1 }
 0x262   : > { %v2482_v9 = vadd.f32 %v2481_v45, %v1262_v26  ;;  %v5851_v45 = vld [vmem:[%s8525_s7 + $0x2a8] sm:$0xf0] }
 0x263   : > { %v5443_v50 = vor.u32 %v5851_v45, %v5442_v43 }
 0x264   : > { %v2523_v18 = vpop.f32.mrf.mxu0 }
 0x265   : > { %3500 = vmatpush.bf16.msrb.mxu0 %v5443_v50 }
 0x267   : > { %v2495_v13 = vpop.f32.mrf.mxu2 }
 0x268   : > { %v2496_v19 = vadd.f32 %v2495_v13, %v2482_v9  ;;  %v5255_v9 = vor.u32 %v5802_v41, %v5252_v1 }
 0x269   : > { %v2483_v47 = vpop.f32.mrf.mxu1 }
 0x26a   : > { %v2509_v20 = vpop.f32.mrf.mxu3  ;;  %v2596_v32 = vrot.slane %v2496_v19, 4  ;;  %v2616_v36 = vrot.slane %v2496_v19, 6  ;;  %v2636_v42 = vmul.f32 %v2496_v19, %v6395_v12  ;;  %v2484_v5 = vadd.f32 %v2483_v47, %v1262_v26  ;;  %v5430_v26 = vld [vmem:[%s8525_s7 + $0x288] sm:$0xf]  ;;  %3538 = vmatpush.bf16.msrb.mxu2 %v5255_v9 }
 0x26b   : > { %v2510_v37 = vadd.f32 %v2509_v20, %v1263_v0  ;;  %v5431_v21 = vor.u32 %v5848_v15, %v5430_v26  ;;  %v5310_v26 = vld [vmem:[%s8525_s7 + $0x198] sm:$0xf] }
 0x26c   : > { %v2604_v54 = vadd.f32 %v2596_v32, %v2384_v16  ;;  %v2624_v51 = vadd.f32 %v2616_v36, %v2384_v16  ;;  %v2644_v52 = vrot.slane %v2636_v42, 3  ;;  %v5240_v32 = vld [vmem:[%s8525_s7 + $0x114] sm:$0xf0]  ;;  %v2525_v36 = vpop.f32.mrf.mxu0 }
 0x26d   : > { %v2524_v46 = vadd.f32 %v2523_v18, %v2510_v37  ;;  %3501 = vmatpush.bf16.msrb.mxu0 %v5431_v21 }
 0x26e   : > { %v2608_v2 = vmax.f32 %v2604_v54, 0.0  ;;  %v2652_v4 = vadd.f32 %v2644_v52, %v2384_v16  ;;  %v2628_v16 = vmax.f32 %v2624_v51, 0.0  ;;  %v5418_v54 = vld [vmem:[%s8525_s7 + $0x270] sm:$0xf]  ;;  %v5845_v51 = vld [vmem:[%s8525_s7 + $0x278] sm:$0xf0] }
 0x26f   : > { %v2597_v59 = vrot.slane %v2524_v46, 4  ;;  %v2617_v60 = vrot.slane %v2524_v46, 6  ;;  %v2637_v61 = vmul.f32 %v2524_v46, %v6395_v12  ;;  %v2497_v13 = vpop.f32.mrf.mxu2  ;;  %v5821_v46 = vld [vmem:[%s8525_s7 + $0x1b8] sm:$0xf0]  ;;  %v5419_v14 = vor.u32 %v5845_v51, %v5418_v54  ;;  %v5839_v54 = vld [vmem:[%s8525_s7 + $0x248] sm:$0xf0] }
 0x270   : > { %v2656_v18 = vmax.f32 %v2652_v4, 0.0  ;;  %v2498_v19 = vadd.f32 %v2497_v13, %v2484_v5  ;;  %v5796_v4 = vld [vmem:[%s8525_s7 + $0xf4] sm:$0xf]  ;;  %v5766_v51 = vld [vmem:[%s8525_s7 + $0x4] sm:$0xf] }
 0x271   : > { %v2605_v10 = vadd.f32 %v2597_v59, %v7868_v17  ;;  %v2625_v11 = vadd.f32 %v2617_v60, %v7868_v17  ;;  %v2645_v22 = vrot.slane %v2637_v61, 3  ;;  %v5243_v59 = vor.u32 %v5799_v29, %v5240_v32  ;;  %v5772_v60 = vld [vmem:[%s8525_s7 + $0x34] sm:$0xf]  ;;  %v5132_v61 = vld [vmem:[%s8525_s7 + $0x3c] sm:$0xf0]  ;;  %3502 = vmatpush.bf16.msrb.mxu0 %v5419_v14 }
 0x272   : > { %v2511_v20 = vpop.f32.mrf.mxu3  ;;  %v2676_v42 = vrot.slane %v2498_v19, 4  ;;  %v2696_v43 = vrot.slane %v2498_v19, 6  ;;  %v2716_v45 = vmul.f32 %v2498_v19, %v6395_v12  ;;  %v5818_v19 = vld [vmem:[%s8525_s7 + $0x1a0] sm:$0xf0]  ;;  %v5120_v29 = vld [vmem:[%s8525_s7 + $0x24] sm:$0xf0] }
 0x273   : > { %v2609_v37 = vmax.f32 %v2605_v10, 0.0  ;;  %v2629_v24 = vmax.f32 %v2625_v11, 0.0  ;;  %v2653_v25 = vadd.f32 %v2645_v22, %v7868_v17  ;;  %v2512_v28 = vadd.f32 %v2511_v20, %v1263_v0  ;;  %v5322_v0 = vld [vmem:[%s8525_s7 + $0x1b0] sm:$0xf]  ;;  %3539 = vmatpush.bf16.msrb.mxu2 %v5243_v59  ;;  %v5228_v10 = vld [vmem:[%s8525_s7 + $0xfc] sm:$0xf0] }
 0x274   : > { %v5147_v17 = vor.u32 %v5775_v38, %v5144_v23  ;;  %v2684_v52 = vadd.f32 %v2676_v42, %v7880_v34  ;;  %v2704_v39 = vadd.f32 %v2696_v43, %v7880_v34  ;;  %v2724_v58 = vrot.slane %v2716_v45, 3  ;;  %v5406_v20 = vld [vmem:[%s8525_s7 + $0x258] sm:$0xf]  ;;  %v5216_v32 = vld [vmem:[%s8525_s7 + $0xe4] sm:$0xf0] }
 0x275   : > { %v2612_v47 = vpack.c.bf16 %v2609_v37, %v2608_v2  ;;  %v2632_v48 = vpack.c.bf16 %v2629_v24, %v2628_v16  ;;  %v2657_v49 = vmax.f32 %v2653_v25, 0.0  ;;  %v2526_v50 = vadd.f32 %v2525_v36, %v2512_v28  ;;  %v5842_v24 = vld [vmem:[%s8525_s7 + $0x260] sm:$0xf0]  ;;  %v5769_v25 = vld [vmem:[%s8525_s7 + $0x1c] sm:$0xf] }
 0x276   : > { %3520 = vmatpush.bf16.msrb.mxu1 %v5147_v17  ;;  %v2688_v5 = vmax.f32 %v2684_v52, 0.0  ;;  %v2732_v9 = vadd.f32 %v2724_v58, %v7880_v34  ;;  %v5323_v56 = vor.u32 %v5821_v46, %v5322_v0  ;;  %v2708_v34 = vmax.f32 %v2704_v39, 0.0  ;;  %v5298_v17 = vld [vmem:[%s8525_s7 + $0x180] sm:$0xf]  ;;  %v5815_v0 = vld [vmem:[%s8525_s7 + $0x188] sm:$0xf0] }
 0x277   : > { %2614 = vst [vmem:[#allocation4 + $0x10] sm:$0x33] %v2612_v47  ;;  %v2660_v62 = vpack.c.bf16 %v2657_v49, %v2656_v18  ;;  %v2677_v41 = vrot.slane %v2526_v50, 4  ;;  %v2697_v1 = vrot.slane %v2526_v50, 6  ;;  %v2717_v2 = vmul.f32 %v2526_v50, %v6395_v12  ;;  %v5074_v46 = vld [vmem:[#allocation4] sm:$0xf] }
 0x278   : > { %2634 = vst [vmem:[#allocation4 + $0x10] sm:$0x44] %v2632_v48  ;;  %v2736_v15 = vmax.f32 %v2732_v9, 0.0  ;;  %3483 = vmatpush.bf16.msra.mxu3 %v5323_v56  ;;  %v5135_v16 = vor.u32 %v5772_v60, %v5132_v61  ;;  %v5231_v18 = vor.u32 %v5796_v4, %v5228_v10  ;;  %v5311_v37 = vor.u32 %v5818_v19, %v5310_v26  ;;  %v5758_v47 = vld [vmem:[#allocation4 + $0x4] sm:$0xf] }
 0x279   : > { %2662 = vst [vmem:[#allocation4 + $0x10] sm:$0x88] %v2660_v62  ;;  %v2685_v11 = vadd.f32 %v2677_v41, %v7894_v27  ;;  %v2705_v22 = vadd.f32 %v2697_v1, %v7894_v27  ;;  %v2725_v13 = vrot.slane %v2717_v2, 3  ;;  %v5407_v28 = vor.u32 %v5842_v24, %v5406_v20  ;;  %v5394_v50 = vld [vmem:[%s8525_s7 + $0x240] sm:$0xf] }
 0x27a   : > { %3521 = vmatpush.bf16.msrb.mxu1 %v5135_v16  ;;  %3540 = vmatpush.bf16.msrb.mxu2 %v5231_v18  ;;  %v5123_v45 = vor.u32 %v5769_v25, %v5120_v29  ;;  %v5299_v49 = vor.u32 %v5815_v0, %v5298_v17  ;;  %v5108_v39 = vld [vmem:[%s8525_s7 + $0xc] sm:$0xf0]  ;;  %v5790_v58 = vld [vmem:[%s8525_s7 + $0xc4] sm:$0xf]  ;;  %v5395_v62 = vor.u32 %v5839_v54, %v5394_v50  ;;  %v5384_v56 = vld [vmem:[%s8525_s7 + $0x234] sm:$0xf0] }
 0x27b   : > { %v2689_v21 = vmax.f32 %v2685_v11, 0.0  ;;  %v2709_v38 = vmax.f32 %v2705_v22, 0.0  ;;  %v2733_v23 = vadd.f32 %v2725_v13, %v7894_v27  ;;  %v5793_v27 = vld [vmem:[%s8525_s7 + $0xdc] sm:$0xf]  ;;  %3503 = vmatpush.bf16.msrb.mxu0 %v5407_v28  ;;  %v5111_v41 = vor.u32 %v5766_v51, %v5108_v39  ;;  %v5204_v4 = vld [vmem:[%s8525_s7 + $0xcc] sm:$0xf0] }
 0x27c   : > { %3484 = vmatpush.bf16.msra.mxu3 %v5311_v37  ;;  %v5219_v48 = vor.u32 %v5793_v27, %v5216_v32  ;;  %v5207_v9 = vor.u32 %v5790_v58, %v5204_v4  ;;  %v5859_v10 = vld [vmem:[%s8525_s7 + $0x2ec] sm:$0xf]  ;;  %v5480_v11 = vld [vmem:[%s8525_s7 + $0x2f4] sm:$0xf0]  ;;  %v2454_v22 = vadd.f32 %v7755_v7, %v1261_v55  ;;  %v5832_v26 = vld [vmem:[%s8525_s7 + $0x214] sm:$0xf]  ;;  %v2426_v7 = vadd.f32 %v7725_v57, %v1260_v63 }
 0x27d   : > { %v2692_v36 = vpack.c.bf16 %v2689_v21, %v2688_v5  ;;  %v2712_v42 = vpack.c.bf16 %v2709_v38, %v2708_v34  ;;  %v2737_v43 = vmax.f32 %v2733_v23, 0.0  ;;  %v5835_v5 = vld [vmem:[%s8525_s7 + $0x22c] sm:$0xf]  ;;  %v5483_v14 = vor.u32 %v5859_v10, %v5480_v11  ;;  %v5372_v34 = vld [vmem:[%s8525_s7 + $0x21c] sm:$0xf0] }
 0x27e   : > { %3522 = vmatpush.bf16.msrb.mxu1 %v5123_v45  ;;  %3541 = vmatpush.bf16.msrb.mxu2 %v5219_v48  ;;  %v5387_v13 = vor.u32 %v5835_v5, %v5384_v56  ;;  %v2456_v16 = vadd.f32 %v7805_v35, %v1261_v55  ;;  %v5789_v19 = vld [vmem:[%s8525_s7 + $0xb8] sm:$0xf0]  ;;  %v5294_v20 = vld [vmem:[%s8525_s7 + $0x170] sm:$0xf]  ;;  %v5375_v35 = vor.u32 %v5832_v26, %v5372_v34  ;;  %v5856_v38 = vld [vmem:[%s8525_s7 + $0x2d4] sm:$0xf] }
 0x27f   : > { %2694 = vst [vmem:[#allocation4 + $0x30] sm:$0x33] %v2692_v36  ;;  %v2740_v52 = vpack.c.bf16 %v2737_v43, %v2736_v15  ;;  %v5198_v15 = vld [vmem:[%s8525_s7 + $0xb0] sm:$0xf]  ;;  %3504 = vmatpush.bf16.msrb.mxu0 %v5395_v62  ;;  %v5813_v57 = vld [vmem:[%s8525_s7 + $0x178] sm:$0xf0]  ;;  %v2440_v24 = vadd.f32 %v7748_v3, %v2426_v7  ;;  %v2428_v25 = vadd.f32 %v7766_v8, %v1260_v63 }
 0x280   : > { %2714 = vst [vmem:[#allocation4 + $0x30] sm:$0x44] %v2712_v42  ;;  %v5760_v60 = vld [vmem:[#allocation4 + $0xc] sm:$0xf0]  ;;  %v5076_v61 = vld [vmem:[#allocation4 + $0x10] sm:$0xf0]  ;;  %3485 = vmatpush.bf16.msra.mxu3 %v5299_v49  ;;  %v5199_v55 = vor.u32 %v5789_v19, %v5198_v15  ;;  %v5295_v21 = vor.u32 %v5813_v57, %v5294_v20  ;;  %v8099_v3 = vadd.f32 %v7753_v6, %v2454_v22 }
 0x281   : > { %v2537_v59 = vpop.f32.mrf.mxu1  ;;  %2742 = vst [vmem:[#allocation4 + $0x30] sm:$0x88] %v2740_v52  ;;  %v8026_v1 = vor.u32 %v5760_v60, %v5074_v46  ;;  %v8028_v2 = vor.u32 %v5758_v47, %v5076_v61  ;;  %v5468_v23 = vld [vmem:[%s8525_s7 + $0x2dc] sm:$0xf0]  ;;  %v5829_v37 = vld [vmem:[%s8525_s7 + $0x1fc] sm:$0xf]  ;;  %v8111_v0 = vadd.f32 %v7796_v30, %v2428_v25  ;;  %v8114_v46 = vadd.f32 %v7803_v33, %v2456_v16 }
 0x282   : > { %v2538_v18 = vadd.f32 %v2537_v59, %v1264_v53  ;;  %3523 = vmatpush.bf16.msrb.mxu1 %v5111_v41  ;;  %3542 = vmatpush.bf16.msrb.mxu2 %v5207_v9  ;;  %v5471_v29 = vor.u32 %v5856_v38, %v5468_v23  ;;  %v5360_v27 = vld [vmem:[%s8525_s7 + $0x204] sm:$0xf0]  ;;  %v5186_v32 = vld [vmem:[%s8525_s7 + $0x98] sm:$0xf]  ;;  %v5786_v36 = vld [vmem:[%s8525_s7 + $0xa0] sm:$0xf0]  ;;  %v2579_v40 = vpop.f32.mrf.mxu0 }
 0x283   : > { %3448 = vmatmul.bf16.vlgmr.msra.gmra.mxu1 %v8026_v1  ;;  %3467 = vmatmul.bf16.vlgmr.msra.gmra.mxu2 %v8028_v2  ;;  %v5090_v42 = vld [vmem:[#allocation4 + $0x20] sm:$0xf]  ;;  %v5187_v43 = vor.u32 %v5786_v36, %v5186_v32  ;;  %v5810_v17 = vld [vmem:[%s8525_s7 + $0x160] sm:$0xf0]  ;;  %v5853_v6 = vld [vmem:[%s8525_s7 + $0x2bc] sm:$0xf]  ;;  %v5363_v59 = vor.u32 %v5829_v37, %v5360_v27 }
 0x284   : > { %3554 = vmatpush.bf16.msrb.mxu3 %v5387_v13  ;;  %3573 = vmatpush.bf16.msra.mxu0 %v5483_v14  ;;  %v5282_v45 = vld [vmem:[%s8525_s7 + $0x158] sm:$0xf]  ;;  %v5762_v50 = vld [vmem:[#allocation4 + $0x24] sm:$0xf]  ;;  %v5456_v52 = vld [vmem:[%s8525_s7 + $0x2c4] sm:$0xf0] }
 0x285   : > { %v5283_v51 = vor.u32 %v5810_v17, %v5282_v45  ;;  %v5826_v33 = vld [vmem:[%s8525_s7 + $0x1e4] sm:$0xf]  ;;  %v5348_v60 = vld [vmem:[%s8525_s7 + $0x1ec] sm:$0xf0]  ;;  %v5459_v4 = vor.u32 %v5853_v6, %v5456_v52  ;;  %v5174_v5 = vld [vmem:[%s8525_s7 + $0x80] sm:$0xf] }
 0x286   : > { %3592 = vmatpush.bf16.msra.mxu1 %v5199_v55  ;;  %3611 = vmatpush.bf16.msra.mxu2 %v5295_v21  ;;  %v5783_v9 = vld [vmem:[%s8525_s7 + $0x88] sm:$0xf0]  ;;  %v5270_v56 = vld [vmem:[%s8525_s7 + $0x140] sm:$0xf]  ;;  %v5850_v14 = vld [vmem:[%s8525_s7 + $0x2a4] sm:$0xf]  ;;  %v5351_v20 = vor.u32 %v5826_v33, %v5348_v60 }
 0x287   : > { %v2551_v28 = vpop.f32.mrf.mxu2  ;;  %v5807_v13 = vld [vmem:[%s8525_s7 + $0x148] sm:$0xf0]  ;;  %v5175_v7 = vor.u32 %v5783_v9, %v5174_v5  ;;  %v5444_v16 = vld [vmem:[%s8525_s7 + $0x2ac] sm:$0xf0]  ;;  %v5162_v37 = vld [vmem:[%s8525_s7 + $0x68] sm:$0xf] }
 0x288   : > { %v2552_v8 = vadd.f32 %v2551_v28, %v2538_v18  ;;  %v2565_v63 = vpop.f32.mrf.mxu3  ;;  %v5764_v49 = vld [vmem:[#allocation4 + $0x2c] sm:$0xf0]  ;;  %v5092_v54 = vld [vmem:[#allocation4 + $0x30] sm:$0xf0]  ;;  %3555 = vmatpush.bf16.msrb.mxu3 %v5375_v35  ;;  %3574 = vmatpush.bf16.msra.mxu0 %v5471_v29  ;;  %v5271_v57 = vor.u32 %v5807_v13, %v5270_v56  ;;  %v5447_v23 = vor.u32 %v5850_v14, %v5444_v16  ;;  %v5780_v25 = vld [vmem:[%s8525_s7 + $0x70] sm:$0xf0] }
 0x289   : > { %v2566_v47 = vadd.f32 %v2565_v63, %v1265_v44  ;;  %v2539_v48 = vpop.f32.mrf.mxu1  ;;  %v8130_v41 = vor.u32 %v5764_v49, %v5090_v42  ;;  %v5823_v32 = vld [vmem:[%s8525_s7 + $0x1cc] sm:$0xf]  ;;  %v5336_v36 = vld [vmem:[%s8525_s7 + $0x1d4] sm:$0xf0]  ;;  %v5258_v45 = vld [vmem:[%s8525_s7 + $0x128] sm:$0xf] }
 0x28a   : > { %v2598_v39 = vrot.slane %v2552_v8, 4  ;;  %v2618_v58 = vrot.slane %v2552_v8, 6  ;;  %v2638_v30 = vmul.f32 %v2552_v8, %v6395_v12  ;;  %v2540_v62 = vadd.f32 %v2539_v48, %v1264_v53  ;;  %3593 = vmatpush.bf16.msra.mxu1 %v5187_v43  ;;  %3612 = vmatpush.bf16.msra.mxu2 %v5283_v51  ;;  %v5804_v17 = vld [vmem:[%s8525_s7 + $0x130] sm:$0xf0]  ;;  %v2581_v6 = vpop.f32.mrf.mxu0  ;;  %v5801_v14 = vld [vmem:[%s8525_s7 + $0x118] sm:$0xf0] }
 0x28b   : > { %v2580_v61 = vadd.f32 %v2579_v40, %v2566_v47  ;;  %v8141_v53 = vor.u32 %v5762_v50, %v5092_v54  ;;  %v5163_v40 = vor.u32 %v5780_v25, %v5162_v37  ;;  %v5339_v50 = vor.u32 %v5823_v32, %v5336_v36  ;;  %v5844_v16 = vld [vmem:[%s8525_s7 + $0x274] sm:$0xf]  ;;  %v5312_v37 = vld [vmem:[%s8525_s7 + $0x1a4] sm:$0xf0]  ;;  %v5138_v25 = vld [vmem:[%s8525_s7 + $0x38] sm:$0xf] }
 0x28c   : > { %v2606_v10 = vadd.f32 %v2598_v39, %v2440_v24  ;;  %v2626_v11 = vadd.f32 %v2618_v58, %v2440_v24  ;;  %v2646_v22 = vrot.slane %v2638_v30, 3  ;;  %3556 = vmatpush.bf16.msrb.mxu3 %v5363_v59  ;;  %3575 = vmatpush.bf16.msra.mxu0 %v5459_v4  ;;  %v5150_v39 = vld [vmem:[%s8525_s7 + $0x50] sm:$0xf]  ;;  %v5777_v58 = vld [vmem:[%s8525_s7 + $0x58] sm:$0xf0]  ;;  %v5259_v60 = vor.u32 %v5804_v17, %v5258_v45 }
 0x28d   : > { %v2599_v26 = vrot.slane %v2580_v61, 4  ;;  %v2619_v34 = vrot.slane %v2580_v61, 6  ;;  %v2639_v15 = vmul.f32 %v2580_v61, %v6395_v12  ;;  %v5820_v61 = vld [vmem:[%s8525_s7 + $0x1b4] sm:$0xf] }
 0x28e   : > { %v2610_v18 = vmax.f32 %v2606_v10, 0.0  ;;  %v2654_v19 = vadd.f32 %v2646_v22, %v2440_v24  ;;  %v2630_v24 = vmax.f32 %v2626_v11, 0.0  ;;  %3594 = vmatpush.bf16.msra.mxu1 %v5175_v7  ;;  %3613 = vmatpush.bf16.msra.mxu2 %v5271_v57  ;;  %v5246_v10 = vld [vmem:[%s8525_s7 + $0x110] sm:$0xf]  ;;  %v5420_v57 = vld [vmem:[%s8525_s7 + $0x27c] sm:$0xf0] }
 0x28f   : > { %v2607_v35 = vadd.f32 %v2599_v26, %v8099_v3  ;;  %v2627_v55 = vadd.f32 %v2619_v34, %v8099_v3  ;;  %v2647_v21 = vrot.slane %v2639_v15, 3  ;;  %v2553_v38 = vpop.f32.mrf.mxu2 }
 0x290   : > { %v2658_v28 = vmax.f32 %v2654_v19, 0.0  ;;  %v2554_v29 = vadd.f32 %v2553_v38, %v2540_v62  ;;  %v2567_v27 = vpop.f32.mrf.mxu3  ;;  %3557 = vmatpush.bf16.msrb.mxu3 %v5351_v20  ;;  %3576 = vmatpush.bf16.msra.mxu0 %v5447_v23  ;;  %v5324_v62 = vld [vmem:[%s8525_s7 + $0x1bc] sm:$0xf0]  ;;  %v5151_v19 = vor.u32 %v5777_v58, %v5150_v39  ;;  %v5247_v20 = vor.u32 %v5801_v14, %v5246_v10  ;;  %v5795_v58 = vld [vmem:[%s8525_s7 + $0xe8] sm:$0xf0] }
 0x291   : > { %v2611_v8 = vmax.f32 %v2607_v35, 0.0  ;;  %v2631_v63 = vmax.f32 %v2627_v55, 0.0  ;;  %v2655_v42 = vadd.f32 %v2647_v21, %v8099_v3  ;;  %v2568_v43 = vadd.f32 %v2567_v27, %v1265_v44  ;;  %v5432_v44 = vld [vmem:[%s8525_s7 + $0x294] sm:$0xf0]  ;;  %v5817_v35 = vld [vmem:[%s8525_s7 + $0x19c] sm:$0xf] }
 0x292   : > { %v2678_v47 = vrot.slane %v2554_v29, 4  ;;  %v2698_v48 = vrot.slane %v2554_v29, 6  ;;  %v2718_v49 = vmul.f32 %v2554_v29, %v6395_v12  ;;  %3595 = vmatpush.bf16.msra.mxu1 %v5163_v40  ;;  %3614 = vmatpush.bf16.msra.mxu2 %v5259_v60  ;;  %v5435_v13 = vor.u32 %v5847_v31, %v5432_v44  ;;  %v5798_v29 = vld [vmem:[%s8525_s7 + $0x100] sm:$0xf0]  ;;  %v5222_v31 = vld [vmem:[%s8525_s7 + $0xe0] sm:$0xf] }
 0x293   : > { %v2613_v3 = vpack.c.bf16 %v2611_v8, %v2610_v18  ;;  %v2633_v54 = vpack.c.bf16 %v2631_v63, %v2630_v24  ;;  %v2659_v51 = vmax.f32 %v2655_v42, 0.0  ;;  %v2582_v52 = vadd.f32 %v2581_v6, %v2568_v43  ;;  %3453 = vmatmul.bf16.gmra.mxu1 %v8130_v41  ;;  %3472 = vmatmul.bf16.gmra.mxu2 %v8141_v53  ;;  %v5841_v8 = vld [vmem:[%s8525_s7 + $0x25c] sm:$0xf]  ;;  %v5408_v63 = vld [vmem:[%s8525_s7 + $0x264] sm:$0xf0] }
 0x294   : > { %v2686_v30 = vadd.f32 %v2678_v47, %v8111_v0  ;;  %v2706_v59 = vadd.f32 %v2698_v48, %v8111_v0  ;;  %v2726_v33 = vrot.slane %v2718_v49, 3  ;;  %3558 = vmatpush.bf16.msrb.mxu3 %v5339_v50  ;;  %v5327_v7 = vor.u32 %v5820_v61, %v5324_v62  ;;  %3577 = vmatpush.bf16.msra.mxu0 %v5435_v13  ;;  %v5082_v42 = vld [vmem:[#allocation4 + $0x8] sm:$0xf]  ;;  %v5759_v43 = vld [vmem:[#allocation4 + $0xc] sm:$0xf] }
 0x295   : > { %2615 = vst [vmem:[#allocation4 + $0x18] sm:$0x33] %v2613_v3  ;;  %v2661_v4 = vpack.c.bf16 %v2659_v51, %v2658_v28  ;;  %v2679_v5 = vrot.slane %v2582_v52, 4  ;;  %v2699_v9 = vrot.slane %v2582_v52, 6  ;;  %v2719_v56 = vmul.f32 %v2582_v52, %v6395_v12  ;;  %v5774_v28 = vld [vmem:[%s8525_s7 + $0x40] sm:$0xf0] }
 0x296   : > { %2635 = vst [vmem:[#allocation4 + $0x18] sm:$0x44] %v2633_v54  ;;  %v2690_v11 = vmax.f32 %v2686_v30, 0.0  ;;  %v2734_v22 = vadd.f32 %v2726_v33, %v8111_v0  ;;  %v2710_v18 = vmax.f32 %v2706_v59, 0.0  ;;  %v5423_v23 = vor.u32 %v5844_v16, %v5420_v57  ;;  %3596 = vmatpush.bf16.msra.mxu1 %v5151_v19  ;;  %3615 = vmatpush.bf16.msra.mxu2 %v5247_v20  ;;  %v5814_v6 = vld [vmem:[%s8525_s7 + $0x184] sm:$0xf] }
 0x297   : > { %2663 = vst [vmem:[#allocation4 + $0x18] sm:$0x88] %v2661_v4  ;;  %v2687_v26 = vadd.f32 %v2679_v5, %v8114_v46  ;;  %v2707_v34 = vadd.f32 %v2699_v9, %v8114_v46  ;;  %v2727_v15 = vrot.slane %v2719_v56, 3  ;;  %v5315_v24 = vor.u32 %v5817_v35, %v5312_v37  ;;  %v5300_v47 = vld [vmem:[%s8525_s7 + $0x18c] sm:$0xf0] }
 0x298   : > { %v2738_v0 = vmax.f32 %v2734_v22, 0.0  ;;  %3559 = vmatpush.bf16.msrb.mxu3 %v5327_v7  ;;  %v5139_v40 = vor.u32 %v5774_v28, %v5138_v25  ;;  %3578 = vmatpush.bf16.msra.mxu0 %v5423_v23  ;;  %v5411_v17 = vor.u32 %v5841_v8, %v5408_v63  ;;  %v5126_v48 = vld [vmem:[%s8525_s7 + $0x20] sm:$0xf]  ;;  %v5771_v50 = vld [vmem:[%s8525_s7 + $0x28] sm:$0xf0]  ;;  %v5303_v54 = vor.u32 %v5814_v6, %v5300_v47 }
 0x299   : > { %v2691_v55 = vmax.f32 %v2687_v26, 0.0  ;;  %v2711_v21 = vmax.f32 %v2707_v34, 0.0  ;;  %v2735_v38 = vadd.f32 %v2727_v15, %v8114_v46  ;;  %v5234_v46 = vld [vmem:[%s8525_s7 + $0xf8] sm:$0xf]  ;;  %v5127_v51 = vor.u32 %v5771_v50, %v5126_v48  ;;  %v5838_v30 = vld [vmem:[%s8525_s7 + $0x244] sm:$0xf] }
 0x29a   : > { %v5235_v45 = vor.u32 %v5798_v29, %v5234_v46  ;;  %3597 = vmatpush.bf16.msra.mxu1 %v5139_v40  ;;  %v5223_v59 = vor.u32 %v5795_v58, %v5222_v31  ;;  %v5396_v33 = vld [vmem:[%s8525_s7 + $0x24c] sm:$0xf0]  ;;  %v5114_v60 = vld [vmem:[%s8525_s7 + $0x8] sm:$0xf]  ;;  %v5768_v61 = vld [vmem:[%s8525_s7 + $0x10] sm:$0xf0] }
 0x29b   : > { %v2693_v27 = vpack.c.bf16 %v2691_v55, %v2690_v11  ;;  %v2713_v32 = vpack.c.bf16 %v2711_v21, %v2710_v18  ;;  %v2739_v36 = vmax.f32 %v2735_v38, 0.0  ;;  %v5399_v62 = vor.u32 %v5838_v30, %v5396_v33  ;;  %v5210_v4 = vld [vmem:[%s8525_s7 + $0xc8] sm:$0xf]  ;;  %v5792_v5 = vld [vmem:[%s8525_s7 + $0xd0] sm:$0xf0] }
 0x29c   : > { %3560 = vmatpush.bf16.msrb.mxu3 %v5315_v24  ;;  %3616 = vmatpush.bf16.msra.mxu2 %v5235_v45  ;;  %v5390_v9 = vld [vmem:[%s8525_s7 + $0x230] sm:$0xf]  ;;  %v5115_v56 = vor.u32 %v5768_v61, %v5114_v60  ;;  %v5837_v10 = vld [vmem:[%s8525_s7 + $0x238] sm:$0xf0]  ;;  %v5211_v13 = vor.u32 %v5792_v5, %v5210_v4  ;;  %v5378_v34 = vld [vmem:[%s8525_s7 + $0x218] sm:$0xf] }
 0x29d   : > { %2695 = vst [vmem:[#allocation4 + $0x38] sm:$0x33] %v2693_v27  ;;  %v2741_v49 = vpack.c.bf16 %v2739_v36, %v2738_v0  ;;  %3579 = vmatpush.bf16.msra.mxu0 %v5411_v17  ;;  %v5486_v11 = vld [vmem:[%s8525_s7 + $0x2f0] sm:$0xf]  ;;  %v5861_v22 = vld [vmem:[%s8525_s7 + $0x2f8] sm:$0xf0]  ;;  %v5391_v14 = vor.u32 %v5837_v10, %v5390_v9 }
 0x29e   : > { %2715 = vst [vmem:[#allocation4 + $0x38] sm:$0x44] %v2713_v32  ;;  %v5761_v44 = vld [vmem:[#allocation4 + $0x14] sm:$0xf0]  ;;  %v5084_v3 = vld [vmem:[#allocation4 + $0x18] sm:$0xf0]  ;;  %3598 = vmatpush.bf16.msra.mxu1 %v5127_v51  ;;  %v5487_v26 = vor.u32 %v5861_v22, %v5486_v11 }
 0x29f   : > { %2743 = vst [vmem:[#allocation4 + $0x38] sm:$0x88] %v2741_v49  ;;  %v8255_v52 = vor.u32 %v5761_v44, %v5082_v42  ;;  %v8257_v39 = vor.u32 %v5759_v43, %v5084_v3  ;;  %v5834_v15 = vld [vmem:[%s8525_s7 + $0x220] sm:$0xf0]  ;;  %v5474_v7 = vld [vmem:[%s8525_s7 + $0x2d8] sm:$0xf] }
 0x2a0   : > { %3561 = vmatpush.bf16.msrb.mxu3 %v5303_v54  ;;  %3617 = vmatpush.bf16.msra.mxu2 %v5223_v59  ;;  %v5379_v16 = vor.u32 %v5834_v15, %v5378_v34  ;;  %v5858_v18 = vld [vmem:[%s8525_s7 + $0x2e0] sm:$0xf0]  ;;  %v5366_v19 = vld [vmem:[%s8525_s7 + $0x200] sm:$0xf]  ;;  %v5831_v20 = vld [vmem:[%s8525_s7 + $0x208] sm:$0xf0] }
 0x2a1   : > { %3486 = vmatmul.bf16.vlgmr.msra.gmra.mxu3 %v8255_v52  ;;  %3505 = vmatmul.bf16.vlgmr.msrb.gmra.mxu0 %v8257_v39  ;;  %v5475_v0 = vor.u32 %v5858_v18, %v5474_v7  ;;  %v5462_v57 = vld [vmem:[%s8525_s7 + $0x2c0] sm:$0xf]  ;;  %v5855_v35 = vld [vmem:[%s8525_s7 + $0x2c8] sm:$0xf0]  ;;  %v5367_v55 = vor.u32 %v5831_v20, %v5366_v19  ;;  %v5354_v38 = vld [vmem:[%s8525_s7 + $0x1e8] sm:$0xf] }
 0x2a2   : > { %3580 = vmatpush.bf16.msra.mxu0 %v5399_v62  ;;  %3599 = vmatpush.bf16.msra.mxu1 %v5115_v56  ;;  %v5463_v21 = vor.u32 %v5855_v35, %v5462_v57  ;;  %v5828_v23 = vld [vmem:[%s8525_s7 + $0x1f0] sm:$0xf0]  ;;  %v5450_v37 = vld [vmem:[%s8525_s7 + $0x2a8] sm:$0xf]  ;;  %v5098_v46 = vld [vmem:[#allocation4 + $0x28] sm:$0xf] }
 0x2a3   : > { %3524 = vmatmul.bf16.vlgmr.msrb.gmra.mxu1 %v8026_v1  ;;  %3543 = vmatmul.bf16.vlgmr.msrb.gmra.mxu2 %v8028_v2  ;;  %v5852_v25 = vld [vmem:[%s8525_s7 + $0x2b0] sm:$0xf0]  ;;  %v5763_v29 = vld [vmem:[#allocation4 + $0x2c] sm:$0xf]  ;;  %v5355_v27 = vor.u32 %v5828_v23, %v5354_v38  ;;  %v5342_v8 = vld [vmem:[%s8525_s7 + $0x1d0] sm:$0xf] }
 0x2a4   : > { %3630 = vmatpush.bf16.msra.mxu3 %v5391_v14  ;;  %3618 = vmatpush.bf16.msra.mxu2 %v5211_v13  ;;  %v5451_v32 = vor.u32 %v5852_v25, %v5450_v37  ;;  %v5825_v63 = vld [vmem:[%s8525_s7 + $0x1d8] sm:$0xf0]  ;;  %v5438_v42 = vld [vmem:[%s8525_s7 + $0x290] sm:$0xf]  ;;  %v5330_v6 = vld [vmem:[%s8525_s7 + $0x1b8] sm:$0xf] }
 0x2a5   : > { %v5849_v43 = vld [vmem:[%s8525_s7 + $0x298] sm:$0xf0]  ;;  %v5343_v45 = vor.u32 %v5825_v63, %v5342_v8  ;;  %v5822_v47 = vld [vmem:[%s8525_s7 + $0x1c0] sm:$0xf0]  ;;  %v5426_v48 = vld [vmem:[%s8525_s7 + $0x278] sm:$0xf] }
 0x2a6   : > { %3649 = vmatpush.bf16.msrb.mxu0 %v5487_v26  ;;  %5862 = vmatpush.bf16.msrb.mxu1 %v5487_v26  ;;  %v5765_v24 = vld [vmem:[#allocation4 + $0x34] sm:$0xf0]  ;;  %v5100_v28 = vld [vmem:[#allocation4 + $0x38] sm:$0xf0]  ;;  %v5439_v17 = vor.u32 %v5849_v43, %v5438_v42  ;;  %v5846_v49 = vld [vmem:[%s8525_s7 + $0x280] sm:$0xf0]  ;;  %v5331_v50 = vor.u32 %v5822_v47, %v5330_v6 }
 0x2a7   : > { %v5099_v36 = vor.u32 %v5765_v24, %v5098_v46  ;;  %v5103_v40 = vor.u32 %v5763_v29, %v5100_v28  ;;  %v5427_v31 = vor.u32 %v5846_v49, %v5426_v48  ;;  %v5318_v44 = vld [vmem:[%s8525_s7 + $0x1a0] sm:$0xf]  ;;  %v5819_v3 = vld [vmem:[%s8525_s7 + $0x1a8] sm:$0xf0]  ;;  %v5306_v59 = vld [vmem:[%s8525_s7 + $0x188] sm:$0xf] }
 0x2a8   : > { %3631 = vmatpush.bf16.msra.mxu3 %v5379_v16  ;;  %v5414_v54 = vld [vmem:[%s8525_s7 + $0x260] sm:$0xf]  ;;  %v5843_v51 = vld [vmem:[%s8525_s7 + $0x268] sm:$0xf0]  ;;  %v5319_v58 = vor.u32 %v5819_v3, %v5318_v44  ;;  %v5816_v33 = vld [vmem:[%s8525_s7 + $0x190] sm:$0xf0] }
 0x2a9   : > { %v5415_v30 = vor.u32 %v5843_v51, %v5414_v54  ;;  %v5402_v60 = vld [vmem:[%s8525_s7 + $0x248] sm:$0xf]  ;;  %v5840_v61 = vld [vmem:[%s8525_s7 + $0x250] sm:$0xf0]  ;;  %v5307_v62 = vor.u32 %v5816_v33, %v5306_v59 }
 0x2aa   : > { %3650 = vmatpush.bf16.msrb.mxu0 %v5475_v0  ;;  %5863 = vmatpush.bf16.msrb.mxu1 %v5475_v0  ;;  %v5403_v4 = vor.u32 %v5840_v61, %v5402_v60 }
 0x2ac   : > { %3632 = vmatpush.bf16.msra.mxu3 %v5367_v55 }
 0x2ae   : > { %3651 = vmatpush.bf16.msrb.mxu0 %v5463_v21  ;;  %5864 = vmatpush.bf16.msrb.mxu1 %v5463_v21 }
 0x2b0   : > { %3633 = vmatpush.bf16.msra.mxu3 %v5355_v27 }
 0x2b1   : > { %3491 = vmatmul.bf16.gmra.mxu3 %v5099_v36  ;;  %3510 = vmatmul.bf16.gmra.mxu0 %v5103_v40 }
 0x2b2   : > { %3652 = vmatpush.bf16.msrb.mxu0 %v5451_v32  ;;  %5865 = vmatpush.bf16.msrb.mxu1 %v5451_v32 }
 0x2b3   : > { %3529 = vmatmul.bf16.gmra.mxu1 %v8130_v41  ;;  %3548 = vmatmul.bf16.gmra.mxu2 %v8141_v53 }
 0x2b4   : > { %3634 = vmatpush.bf16.msra.mxu3 %v5343_v45 }
 0x2b6   : > { %3653 = vmatpush.bf16.msrb.mxu0 %v5439_v17  ;;  %5866 = vmatpush.bf16.msrb.mxu1 %v5439_v17 }
 0x2b8   : > { %3635 = vmatpush.bf16.msra.mxu3 %v5331_v50 }
 0x2ba   : > { %3654 = vmatpush.bf16.msrb.mxu0 %v5427_v31  ;;  %5867 = vmatpush.bf16.msrb.mxu1 %v5427_v31 }
 0x2bc   : > { %3636 = vmatpush.bf16.msra.mxu3 %v5319_v58 }
 0x2be   : > { %3655 = vmatpush.bf16.msrb.mxu0 %v5415_v30  ;;  %5868 = vmatpush.bf16.msrb.mxu1 %v5415_v30 }
 0x2c0   : > { %3637 = vmatpush.bf16.msra.mxu3 %v5307_v62 }
 0x2c1   : > { %3562 = vmatmul.bf16.vlgmr.msrb.gmra.mxu3 %v8255_v52  ;;  %3581 = vmatmul.bf16.vlgmr.msra.gmra.mxu0 %v8257_v39 }
 0x2c2   : > { %3656 = vmatpush.bf16.msrb.mxu0 %v5403_v4  ;;  %5869 = vmatpush.bf16.msrb.mxu1 %v5403_v4 }
 0x2c3   : > { %3600 = vmatmul.bf16.vlgmr.msra.gmra.mxu1 %v8026_v1  ;;  %3619 = vmatmul.bf16.vlgmr.msra.gmra.mxu2 %v8028_v2  ;;  %v8393_v1 = vld [vmem:[%s8526_s8] sm:$0x7] }
 0x2d1   : > { %3567 = vmatmul.bf16.gmra.mxu3 %v5099_v36  ;;  %3586 = vmatmul.bf16.gmra.mxu0 %v5103_v40 }
 0x2d3   : > { %3605 = vmatmul.bf16.gmra.mxu1 %v8130_v41  ;;  %3624 = vmatmul.bf16.gmra.mxu2 %v8141_v53  ;;  %v2882_v41 = vperm.slane %v8393_v1, 0 }
 0x2e1   : > { %3638 = vmatmul.bf16.vlgmr.msra.gmra.mxu3 %v8255_v52  ;;  %3657 = vmatmul.bf16.vlgmr.msrb.gmra.mxu0 %v8257_v39 }
 0x2e3   : > { %3662 = vmatmul.bf16.vlgmr.msrb.gmra.mxu1 %v5103_v40 }
 0x2f1   : > { %3643 = vmatmul.bf16.gmra.mxu3 %v5099_v36 }
 0x300   : > { %v3449_v5 = vpop.f32.mrf.mxu1 }
 0x301   : > { %v3450_v52 = vadd.f32 %v3449_v5, %v2882_v41 }
 0x306   : > { %v3468_v56 = vpop.f32.mrf.mxu2 }
 0x307   : > { %v3469_v13 = vadd.f32 %v3468_v56, %v3450_v52 }
 0x308   : > { %v3451_v9 = vpop.f32.mrf.mxu1 }
 0x309   : > { %v3452_v7 = vadd.f32 %v3451_v9, %v2882_v41 }
 0x30e   : > { %v3470_v11 = vpop.f32.mrf.mxu2 }
 0x30f   : > { %v3471_v0 = vadd.f32 %v3470_v11, %v3452_v7 }
 0x310   : > { %v3454_v10 = vpop.f32.mrf.mxu1 }
 0x311   : > { %v3455_v38 = vadd.f32 %v3454_v10, %v2882_v41 }
 0x316   : > { %v3473_v22 = vpop.f32.mrf.mxu2 }
 0x317   : > { %v3474_v25 = vadd.f32 %v3473_v22, %v3455_v38 }
 0x318   : > { %v3456_v2 = vpop.f32.mrf.mxu1 }
 0x319   : > { %v3457_v40 = vadd.f32 %v3456_v2, %v2882_v41 }
 0x31e   : > { %v3506_v53 = vpop.f32.mrf.mxu0  ;;  %v3475_v18 = vpop.f32.mrf.mxu2 }
 0x31f   : > { %v3476_v43 = vadd.f32 %v3475_v18, %v3457_v40 }
 0x320   : > { %v8396_v26 = vpop.f32.mrf.mxu1 }
 0x324   : > { %v3487_v39 = vpop.f32.mrf.mxu3 }
 0x325   : > { %v3488_v14 = vadd.f32 %v3487_v39, %v3469_v13 }
 0x326   : > { %v3508_v34 = vpop.f32.mrf.mxu0  ;;  %v8400_v46 = vpop.f32.mrf.mxu2 }
 0x327   : > { %v3507_v15 = vadd.f32 %v3506_v53, %v3488_v14 }
 0x328   : > { %v8398_v21 = vpop.f32.mrf.mxu1 }
 0x329   : > { %v3668_v16 = vsub.f32 0.0, %v3507_v15 }
 0x32b   : > { %v3670_v19 = vmul.f32 1.442695, %v3668_v16 }
 0x32c   : > { %v3489_v20 = vpop.f32.mrf.mxu3 }
 0x32d   : > { %5879 = vpow2.f32 %v3670_v19  ;;  %v3490_v57 = vadd.f32 %v3489_v20, %v3471_v0 }
 0x32e   : > { %v3511_v35 = vpop.f32.mrf.mxu0  ;;  %v8406_v50 = vpop.f32.mrf.mxu2 }
 0x32f   : > { %v3509_v55 = vadd.f32 %v3508_v34, %v3490_v57 }
 0x330   : > { %v8404_v63 = vpop.f32.mrf.mxu1 }
 0x331   : > { %v3669_v23 = vsub.f32 0.0, %v3509_v55 }
 0x333   : > { %v5880_v37 = vpop.eup %5879  ;;  %v3672_v24 = vmul.f32 1.442695, %v3669_v23 }
 0x334   : > { %v3674_v28 = vadd.f32 1.0, %v5880_v37  ;;  %v3492_v29 = vpop.f32.mrf.mxu3 }
 0x335   : > { %5881 = vpow2.f32 %v3672_v24  ;;  %v3493_v27 = vadd.f32 %v3492_v29, %v3474_v25 }
 0x336   : > { %5883 = vrcp.f32 %v3674_v28  ;;  %v3513_v32 = vpop.f32.mrf.mxu0  ;;  %v3687_v54 = vand.u32 2147483648, %v3674_v28  ;;  %v3685_v58 = vand.u32 2147483647, %v3674_v28  ;;  %vm3681_vm2 = vweird.f32 %v3674_v28  ;;  %v8422_v22 = vpop.f32.mrf.mxu2 }
 0x337   : > { %v3512_v36 = vadd.f32 %v3511_v35, %v3493_v27 }
 0x338   : > { %v3688_v62 = vor.u32 1.1754944e-38, %v3687_v54  ;;  %v8415_v5 = vpop.f32.mrf.mxu1  ;;  %vm3686_vm4 = vcmp.eq.f32.partialorder %v3685_v58, 8.507059e+37 }
 0x339   : > { %v3801_v8 = vsub.f32 0.0, %v3512_v36 }
 0x33b   : > { %v5882_v42 = vpop.eup %5881  ;;  %v3803_v45 = vmul.f32 1.442695, %v3801_v8 }
 0x33c   : > { %v5884_v17 = vpop.eup %5883  ;;  %v3675_v6 = vadd.f32 1.0, %v5882_v42  ;;  %v3494_v47 = vpop.f32.mrf.mxu3 }
 0x33d   : > { %v3677_v48 = vmul.f32 %v5884_v17, %v3674_v28  ;;  %5885 = vpow2.f32 %v3803_v45  ;;  %v3495_v49 = vadd.f32 %v3494_v47, %v3476_v43  ;;  %vm3682_vm1 = vweird.f32 %v5884_v17 }
 0x33e   : > { %5887 = vrcp.f32 %v3675_v6  ;;  %v8408_v31 = vpop.f32.mrf.mxu0  ;;  %vm3683_vm3 = vmor %vm3681_vm2, %vm3682_vm1  ;;  %v3702_v53 = vand.u32 2147483648, %v3675_v6  ;;  %v3700_v13 = vand.u32 2147483647, %v3675_v6  ;;  %vm3696_vm6 = vweird.f32 %v3675_v6  ;;  %v8427_v37 = vpop.f32.mrf.mxu2 }
 0x33f   : > { %v3678_v44 = vsub.f32 1.0, %v3677_v48  ;;  %v3514_v3 = vadd.f32 %v3513_v32, %v3495_v49 }
 0x340   : > { %v3703_v15 = vor.u32 1.1754944e-38, %v3702_v53  ;;  %vm3701_vm8 = vcmp.eq.f32.partialorder %v3700_v13, 8.507059e+37  ;;  %v3601_v20 = vpop.f32.mrf.mxu1 }
 0x341   : > { %v3679_v51 = vmul.f32 %v5884_v17, %v3678_v44  ;;  %v3802_v30 = vsub.f32 0.0, %v3514_v3  ;;  %v8435_v3 = vperm.slane %v8393_v1, 2 }
 0x343   : > { %v5886_v59 = vpop.eup %5885  ;;  %v3680_v33 = vadd.f32 %v5884_v17, %v3679_v51  ;;  %v3805_v60 = vmul.f32 1.442695, %v3802_v30  ;;  %v2883_v51 = vperm.slane %v8393_v1, 1  ;;  %v3602_v30 = vadd.f32 %v3601_v20, %v8435_v3 }
 0x344   : > { %v5888_v61 = vpop.eup %5887  ;;  %v3807_v4 = vadd.f32 1.0, %v5886_v59  ;;  %v8417_v9 = vpop.f32.mrf.mxu3 }
 0x345   : > { %v3684_v56 = vsel %vm3683_vm3, %v5884_v17, %v3680_v33  ;;  %v3692_v10 = vmul.f32 %v5888_v61, %v3675_v6  ;;  %5889 = vpow2.f32 %v3805_v60  ;;  %vm3697_vm5 = vweird.f32 %v5888_v61 }
 0x346   : > { %v3689_v11 = vsel %vm3686_vm4, %v3688_v62, %v3684_v56  ;;  %5891 = vrcp.f32 %v3807_v4  ;;  %v8419_v2 = vpop.f32.mrf.mxu0  ;;  %vm3698_vm7 = vmor %vm3696_vm6, %vm3697_vm5  ;;  %v3820_v35 = vand.u32 2147483648, %v3807_v4  ;;  %v3818_v23 = vand.u32 2147483647, %v3807_v4  ;;  %v3620_v48 = vpop.f32.mrf.mxu2 }
 0x347   : > { %3706 = vst [vmem:[%s8413_s26] sm:$0xff] %v3689_v11  ;;  %v3693_v41 = vsub.f32 1.0, %v3692_v10  ;;  %vm3814_vm10 = vweird.f32 %v3807_v4  ;;  %v3528_v58 = vadd.f32 %v8398_v21, %v2883_v51  ;;  %v3621_v60 = vadd.f32 %v3620_v48, %v3602_v30 }
 0x348   : > { %v3821_v28 = vor.u32 1.1754944e-38, %v3820_v35  ;;  %vm3819_vm12 = vcmp.eq.f32.partialorder %v3818_v23, 8.507059e+37  ;;  %v3603_v42 = vpop.f32.mrf.mxu1  ;;  %v3526_v10 = vadd.f32 %v8396_v26, %v2883_v51 }
 0x349   : > { %v3694_v52 = vmul.f32 %v5888_v61, %v3693_v41  ;;  %v3547_v33 = vadd.f32 %v8406_v50, %v3528_v58  ;;  %v3604_v1 = vadd.f32 %v3603_v42, %v8435_v3 }
 0x34a   : > { %v3545_v53 = vadd.f32 %v8400_v46, %v3526_v10 }
 0x34b   : > { %v5890_v39 = vpop.eup %5889  ;;  %v3695_v14 = vadd.f32 %v5888_v61, %v3694_v52 }
 0x34c   : > { %v5892_v34 = vpop.eup %5891  ;;  %v3808_v7 = vadd.f32 1.0, %v5890_v39  ;;  %v3565_v16 = vpop.f32.mrf.mxu3  ;;  %v3564_v50 = vadd.f32 %v8417_v9, %v3545_v53 }
 0x34d   : > { %v3699_v18 = vsel %vm3698_vm7, %v5888_v61, %v3695_v14  ;;  %v3810_v0 = vmul.f32 %v5892_v34, %v3807_v4  ;;  %vm3815_vm9 = vweird.f32 %v5892_v34  ;;  %v3566_v4 = vadd.f32 %v3565_v16, %v3547_v33 }
 0x34e   : > { %v3704_v19 = vsel %vm3701_vm8, %v3703_v15, %v3699_v18  ;;  %5893 = vrcp.f32 %v3808_v7  ;;  %v8425_v55 = vpop.f32.mrf.mxu0  ;;  %vm3816_vm11 = vmor %vm3814_vm10, %vm3815_vm9  ;;  %v3835_v8 = vand.u32 2147483648, %v3808_v7  ;;  %v3833_v45 = vand.u32 2147483647, %v3808_v7  ;;  %v3622_v11 = vpop.f32.mrf.mxu2 }
 0x34f   : > { %3707 = vst [vmem:[%s8413_s26 + $0x8] sm:$0xff] %v3704_v19  ;;  %v3811_v57 = vsub.f32 1.0, %v3810_v0  ;;  %vm3829_vm14 = vweird.f32 %v3808_v7  ;;  %v3585_v21 = vadd.f32 %v8419_v2, %v3566_v4  ;;  %v3623_v14 = vadd.f32 %v3622_v11, %v3604_v1 }
 0x350   : > { %v3836_v47 = vor.u32 1.1754944e-38, %v3835_v8  ;;  %vm3834_vm0 = vcmp.eq.f32.partialorder %v3833_v45, 8.507059e+37  ;;  %v3606_v59 = vpop.f32.mrf.mxu1  ;;  %v3583_v20 = vadd.f32 %v8408_v31, %v3564_v50 }
 0x351   : > { %v3812_v38 = vmul.f32 %v5892_v34, %v3811_v57  ;;  %v3607_v9 = vadd.f32 %v3606_v59, %v8435_v3 }
 0x353   : > { %v3813_v25 = vadd.f32 %v5892_v34, %v3812_v38 }
 0x354   : > { %v5894_v24 = vpop.eup %5893  ;;  %v8429_v29 = vpop.f32.mrf.mxu3 }
 0x355   : > { %v3817_v27 = vsel %vm3816_vm11, %v5892_v34, %v3813_v25  ;;  %v3825_v32 = vmul.f32 %v5894_v24, %v3808_v7  ;;  %vm3830_vm13 = vweird.f32 %v5894_v24 }
 0x356   : > { %v3822_v36 = vsel %vm3819_vm12, %v3821_v28, %v3817_v27  ;;  %v8432_v17 = vpop.f32.mrf.mxu0  ;;  %vm3831_vm15 = vmor %vm3829_vm14, %vm3830_vm13  ;;  %v3625_v25 = vpop.f32.mrf.mxu2  ;;  %v3533_v27 = vadd.f32 %v8415_v5, %v2883_v51 }
 0x357   : > { %3839 = vst [vmem:[%s8413_s26 + $0x20] sm:$0xff] %v3822_v36  ;;  %v3826_v40 = vsub.f32 1.0, %v3825_v32  ;;  %v3626_v32 = vadd.f32 %v3625_v25, %v3607_v9 }
 0x358   : > { %v3608_v16 = vpop.f32.mrf.mxu1 }
 0x359   : > { %v3827_v43 = vmul.f32 %v5894_v24, %v3826_v40  ;;  %v3552_v40 = vadd.f32 %v8427_v37, %v3533_v27 }
 0x35b   : > { %v3828_v6 = vadd.f32 %v5894_v24, %v3827_v43 }
 0x35c   : > { %v3570_v49 = vpop.f32.mrf.mxu3 }
 0x35d   : > { %v3832_v44 = vsel %vm3831_vm15, %v5894_v24, %v3828_v6  ;;  %v3571_v43 = vadd.f32 %v3570_v49, %v3552_v40 }
 0x35e   : > { %v3837_v54 = vsel %vm3834_vm0, %v3836_v47, %v3832_v44  ;;  %v3658_v61 = vpop.f32.mrf.mxu0  ;;  %v3531_v44 = vadd.f32 %v8404_v63, %v2883_v51 }
 0x35f   : > { %3840 = vst [vmem:[%s8413_s26 + $0x28] sm:$0xff] %v3837_v54  ;;  %v3590_v49 = vadd.f32 %v8432_v17, %v3571_v43 }
 0x360   : > { %v3663_v45 = vpop.f32.mrf.mxu1  ;;  %v3550_v33 = vadd.f32 %v8422_v22, %v3531_v44 }
 0x362   : > { %v3569_v63 = vadd.f32 %v8429_v29, %v3550_v33 }
 0x364   : > { %v3639_v62 = vpop.f32.mrf.mxu3 }
 0x365   : > { %v3640_v56 = vadd.f32 %v3639_v62, %v3621_v60  ;;  %v3627_v60 = vpop.f32.mrf.mxu2 }
 0x366   : > { %v3660_v57 = vpop.f32.mrf.mxu0 }
 0x367   : > { %v3659_v41 = vadd.f32 %v3658_v61, %v3640_v56  ;;  %v3609_v61 = vadd.f32 %v3608_v16, %v8435_v3 }
 0x369   : > { %v3730_v52 = vrot.slane %v3659_v41, 4  ;;  %v3753_v13 = vrot.slane %v3659_v41, 6  ;;  %v3776_v39 = vmul.f32 %v3659_v41, %v6395_v12  ;;  %v3628_v56 = vadd.f32 %v3627_v60, %v3609_v61 }
 0x36b   : > { %v3732_v34 = vadd.f32 %v3730_v52, %v3585_v21  ;;  %v3755_v15 = vadd.f32 %v3753_v13, %v3585_v21  ;;  %v3778_v7 = vrot.slane %v3776_v39, 3  ;;  %v3588_v52 = vadd.f32 %v8425_v55, %v3569_v63 }
 0x36c   : > { %v3641_v26 = vpop.f32.mrf.mxu3 }
 0x36d   : > { %v3733_v18 = vsub.f32 0.0, %v3732_v34  ;;  %v3756_v0 = vsub.f32 0.0, %v3755_v15  ;;  %v3780_v19 = vadd.f32 %v3778_v7, %v3585_v21  ;;  %v3642_v46 = vadd.f32 %v3641_v26, %v3623_v14  ;;  %v3665_v26 = vpop.f32.mrf.mxu1 }
 0x36f   : > { %v3734_v2 = vmul.f32 1.442695, %v3733_v18  ;;  %v3757_v35 = vmul.f32 1.442695, %v3756_v0  ;;  %v3781_v38 = vsub.f32 0.0, %v3780_v19  ;;  %v3661_v23 = vadd.f32 %v3660_v57, %v3642_v46 }
 0x371   : > { %5895 = vpow2.f32 %v3734_v2  ;;  %v3782_v24 = vmul.f32 1.442695, %v3781_v38  ;;  %v3708_v28 = vadd.f32 %v3661_v23, %v3583_v20 }
 0x372   : > { %5897 = vpow2.f32 %v3757_v35 }
 0x373   : > { %5899 = vpow2.f32 %v3782_v24  ;;  %v3709_v36 = vsub.f32 0.0, %v3708_v28 }
 0x374   : > { %v3644_v31 = vpop.f32.mrf.mxu3 }
 0x375   : > { %v3710_v8 = vmul.f32 1.442695, %v3709_v36  ;;  %v3645_v42 = vadd.f32 %v3644_v31, %v3626_v32 }
 0x377   : > { %v5896_v6 = vpop.eup %5895  ;;  %5901 = vpow2.f32 %v3710_v8  ;;  %v3664_v47 = vadd.f32 %v3663_v45, %v3645_v42 }
 0x378   : > { %v5898_v48 = vpop.eup %5897  ;;  %v8453_v54 = vadd.f32 1.0, %v5896_v6 }
 0x379   : > { %v5900_v5 = vpop.eup %5899  ;;  %v8455_v58 = vadd.f32 1.0, %v5898_v48  ;;  %v3863_v30 = vrot.slane %v3664_v47, 4  ;;  %v3886_v59 = vrot.slane %v3664_v47, 6  ;;  %v3909_v37 = vmul.f32 %v3664_v47, %v6395_v12 }
 0x37a   : > { %5903 = vrcp.f32 %v8453_v54  ;;  %v8464_v51 = vadd.f32 1.0, %v5900_v5  ;;  %v3746_v22 = vand.u32 2147483647, %v8453_v54  ;;  %v3748_v17 = vand.u32 2147483648, %v8453_v54 }
 0x37b   : > { %5905 = vrcp.f32 %v8455_v58  ;;  %v3865_v62 = vadd.f32 %v3863_v30, %v3590_v49  ;;  %v3888_v10 = vadd.f32 %v3886_v59, %v3590_v49  ;;  %v3911_v12 = vrot.slane %v3909_v37, 3 }
 0x37c   : > { %v3646_v11 = vpop.f32.mrf.mxu3  ;;  %v3769_v41 = vand.u32 2147483647, %v8455_v58  ;;  %5907 = vrcp.f32 %v8464_v51  ;;  %vm3742_vm1 = vweird.f32 %v8453_v54  ;;  %vm3765_vm2 = vweird.f32 %v8455_v58 }
 0x37d   : > { %v5902_v4 = vpop.eup %5901  ;;  %v3866_v53 = vsub.f32 0.0, %v3865_v62  ;;  %v3889_v29 = vsub.f32 0.0, %v3888_v10  ;;  %v3913_v1 = vadd.f32 %v3911_v12, %v3590_v49  ;;  %v3647_v13 = vadd.f32 %v3646_v11, %v3628_v56 }
 0x37e   : > { %v8470_v3 = vadd.f32 1.0, %v5902_v4  ;;  %v3771_v14 = vand.u32 2147483648, %v8455_v58  ;;  %vm8478_vm3 = vcmp.eq.f32.partialorder %v3746_v22, 8.507059e+37  ;;  %v3749_v15 = vor.u32 1.1754944e-38, %v3748_v17 }
 0x37f   : > { %vm8483_vm4 = vcmp.eq.f32.partialorder %v3769_v41, 8.507059e+37  ;;  %v3867_v18 = vmul.f32 1.442695, %v3866_v53  ;;  %v3890_v0 = vmul.f32 1.442695, %v3889_v29  ;;  %v3914_v19 = vsub.f32 0.0, %v3913_v1 }
 0x380   : > { %v5904_v21 = vpop.eup %5903  ;;  %5909 = vrcp.f32 %v8470_v3  ;;  %v3796_v57 = vand.u32 2147483648, %v8464_v51  ;;  %v3666_v2 = vadd.f32 %v3665_v26, %v3647_v13  ;;  %v3772_v27 = vor.u32 1.1754944e-38, %v3771_v14 }
 0x381   : > { %v5906_v39 = vpop.eup %5905  ;;  %v3738_v50 = vmul.f32 %v5904_v21, %v8453_v54  ;;  %vm3743_vm5 = vweird.f32 %v5904_v21  ;;  %5911 = vpow2.f32 %v3867_v18  ;;  %v3915_v25 = vmul.f32 1.442695, %v3914_v19 }
 0x382   : > { %v3761_v7 = vmul.f32 %v5906_v39, %v8455_v58  ;;  %v5908_v46 = vpop.eup %5907  ;;  %vm3766_vm6 = vweird.f32 %v5906_v39  ;;  %5913 = vpow2.f32 %v3890_v0  ;;  %v3841_v9 = vadd.f32 %v3666_v2, %v3588_v52  ;;  %vm3744_vm8 = vmor %vm3742_vm1, %vm3743_vm5 }
 0x383   : > { %v3739_v16 = vsub.f32 1.0, %v3738_v50  ;;  %v3786_v38 = vmul.f32 %v5908_v46, %v8464_v51  ;;  %vm3790_vm7 = vweird.f32 %v8464_v51  ;;  %v3794_v40 = vand.u32 2147483647, %v8464_v51  ;;  %vm3767_vm9 = vmor %vm3765_vm2, %vm3766_vm6 }
 0x384   : > { %v3762_v20 = vsub.f32 1.0, %v3761_v7  ;;  %5915 = vpow2.f32 %v3915_v25  ;;  %vm3791_vm10 = vweird.f32 %v5908_v46  ;;  %v3842_v43 = vsub.f32 0.0, %v3841_v9 }
 0x385   : > { %v3740_v35 = vmul.f32 %v5904_v21, %v3739_v16  ;;  %v3787_v32 = vsub.f32 1.0, %v3786_v38  ;;  %v3797_v47 = vor.u32 1.1754944e-38, %v3796_v57  ;;  %v3724_v30 = vand.u32 2147483648, %v8470_v3  ;;  %vm3792_vm11 = vmor %vm3790_vm7, %vm3791_vm10 }
 0x386   : > { %v3763_v23 = vmul.f32 %v5906_v39, %v3762_v20  ;;  %v5910_v24 = vpop.eup %5909  ;;  %v3843_v58 = vmul.f32 1.442695, %v3842_v43  ;;  %v3722_v33 = vand.u32 2147483647, %v8470_v3  ;;  %vm3795_vm13 = vcmp.eq.f32.partialorder %v3794_v40, 8.507059e+37 }
 0x387   : > { %v3741_v28 = vadd.f32 %v5904_v21, %v3740_v35  ;;  %v3714_v31 = vmul.f32 %v5910_v24, %v8470_v3  ;;  %v3788_v42 = vmul.f32 %v5908_v46, %v3787_v32  ;;  %v5912_v44 = vpop.eup %5911  ;;  %vm3719_vm12 = vweird.f32 %v5910_v24 }
 0x388   : > { %v3764_v36 = vadd.f32 %v5906_v39, %v3763_v23  ;;  %v5914_v59 = vpop.eup %5913  ;;  %v3869_v49 = vadd.f32 1.0, %v5912_v44  ;;  %5917 = vpow2.f32 %v3843_v58  ;;  %vm3718_vm14 = vweird.f32 %v8470_v3 }
 0x389   : > { %v3745_v8 = vsel %vm3744_vm8, %v5904_v21, %v3741_v28  ;;  %v3715_v48 = vsub.f32 1.0, %v3714_v31  ;;  %v3789_v5 = vadd.f32 %v5908_v46, %v3788_v42  ;;  %v3892_v61 = vadd.f32 1.0, %v5914_v59  ;;  %vm3720_vm15 = vmor %vm3718_vm14, %vm3719_vm12 }
 0x38a   : > { %v3750_v45 = vsel %vm8478_vm3, %v3749_v15, %v3745_v8  ;;  %v3768_v6 = vsel %vm3767_vm9, %v5906_v39, %v3764_v36  ;;  %v5916_v63 = vpop.eup %5915  ;;  %5919 = vrcp.f32 %v3869_v49  ;;  %v3725_v51 = vor.u32 1.1754944e-38, %v3724_v30 }
 0x38b   : > { %3752 = vst [vmem:[%s8413_s26 + $0x18] sm:$0xf] %v3750_v45  ;;  %v3773_v54 = vsel %vm8483_vm4, %v3772_v27, %v3768_v6  ;;  %v3716_v37 = vmul.f32 %v5910_v24, %v3715_v48  ;;  %v3793_v60 = vsel %vm3792_vm11, %v5908_v46, %v3789_v5  ;;  %5921 = vrcp.f32 %v3892_v61 }
 0x38c   : > { %3775 = vst [vmem:[%s8413_s26 + $0x18] sm:$0x30] %v3773_v54  ;;  %v3798_v62 = vsel %vm3795_vm13, %v3797_v47, %v3793_v60  ;;  %vm3723_vm0 = vcmp.eq.f32.partialorder %v3722_v33, 8.507059e+37  ;;  %v3917_v10 = vadd.f32 1.0, %v5916_v63  ;;  %v3879_v3 = vand.u32 2147483647, %v3869_v49 }
 0x38d   : > { %v3717_v4 = vadd.f32 %v5910_v24, %v3716_v37  ;;  %3800 = vst [vmem:[%s8413_s26 + $0x18] sm:$0xc0] %v3798_v62  ;;  %v3881_v21 = vand.u32 2147483648, %v3869_v49  ;;  %v3904_v39 = vand.u32 2147483648, %v3892_v61  ;;  %vm3875_vm1 = vweird.f32 %v3869_v49 }
 0x38e   : > { %5923 = vrcp.f32 %v3917_v10  ;;  %v5918_v11 = vpop.eup %5917  ;;  %vm3898_vm3 = vweird.f32 %v3892_v61  ;;  %v3902_v15 = vand.u32 2147483647, %v3892_v61  ;;  %vm3880_vm5 = vcmp.eq.f32.partialorder %v3879_v3, 8.507059e+37 }
 0x38f   : > { %v3721_v56 = vsel %vm3720_vm15, %v5910_v24, %v3717_v4  ;;  %v3845_v17 = vadd.f32 1.0, %v5918_v11  ;;  %v3882_v55 = vor.u32 1.1754944e-38, %v3881_v21  ;;  %v3905_v0 = vor.u32 1.1754944e-38, %v3904_v39 }
 0x390   : > { %v3726_v12 = vsel %vm3723_vm0, %v3725_v51, %v3721_v56  ;;  %v5920_v22 = vpop.eup %5919  ;;  %v3927_v19 = vand.u32 2147483647, %v3917_v10  ;;  %v3929_v46 = vand.u32 2147483648, %v3917_v10  ;;  %vm3903_vm9 = vcmp.eq.f32.partialorder %v3902_v15, 8.507059e+37 }
 0x391   : > { %3728 = vst [vmem:[%s8413_s26 + $0x10] sm:$0xff] %v3726_v12  ;;  %v5922_v41 = vpop.eup %5921  ;;  %v3871_v53 = vmul.f32 %v5920_v22, %v3869_v49  ;;  %5925 = vrcp.f32 %v3845_v17  ;;  %vm3876_vm2 = vweird.f32 %v5920_v22  ;;  %vm3923_vm10 = vweird.f32 %v3917_v10 }
 0x392   : > { %v3894_v29 = vmul.f32 %v5922_v41, %v3892_v61  ;;  %vm3899_vm4 = vweird.f32 %v5922_v41  ;;  %vm3877_vm6 = vmor %vm3875_vm1, %vm3876_vm2  ;;  %vm3928_vm12 = vcmp.eq.f32.partialorder %v3927_v19, 8.507059e+37  ;;  %v3930_v24 = vor.u32 1.1754944e-38, %v3929_v46 }
 0x393   : > { %v3872_v1 = vsub.f32 1.0, %v3871_v53  ;;  %vm3900_vm7 = vmor %vm3898_vm3, %vm3899_vm4  ;;  %v3857_v28 = vand.u32 2147483648, %v3845_v17  ;;  %v3855_v36 = vand.u32 2147483647, %v3845_v17  ;;  %vm3851_vm14 = vweird.f32 %v3845_v17 }
 0x394   : > { %v5924_v52 = vpop.eup %5923  ;;  %v3895_v13 = vsub.f32 1.0, %v3894_v29 }
 0x395   : > { %v3873_v50 = vmul.f32 %v5920_v22, %v3872_v1  ;;  %v3919_v14 = vmul.f32 %v5924_v52, %v3917_v10  ;;  %vm3924_vm8 = vweird.f32 %v5924_v52  ;;  %v3858_v8 = vor.u32 1.1754944e-38, %v3857_v28 }
 0x396   : > { %v3896_v34 = vmul.f32 %v5922_v41, %v3895_v13  ;;  %vm3925_vm11 = vmor %vm3923_vm10, %vm3924_vm8  ;;  %vm3856_vm0 = vcmp.eq.f32.partialorder %v3855_v36, 8.507059e+37 }
 0x397   : > { %v3874_v7 = vadd.f32 %v5920_v22, %v3873_v50  ;;  %v3920_v16 = vsub.f32 1.0, %v3919_v14  ;;  %v5926_v26 = vpop.eup %5925 }
 0x398   : > { %v3897_v18 = vadd.f32 %v5922_v41, %v3896_v34  ;;  %v3847_v2 = vmul.f32 %v5926_v26, %v3845_v17  ;;  %vm3852_vm13 = vweird.f32 %v5926_v26 }
 0x399   : > { %v3878_v20 = vsel %vm3877_vm6, %v5920_v22, %v3874_v7  ;;  %v3921_v57 = vmul.f32 %v5924_v52, %v3920_v16  ;;  %vm3853_vm15 = vmor %vm3851_vm14, %vm3852_vm13 }
 0x39a   : > { %v3883_v35 = vsel %vm3880_vm5, %v3882_v55, %v3878_v20  ;;  %v3901_v38 = vsel %vm3900_vm7, %v5922_v41, %v3897_v18  ;;  %v3848_v9 = vsub.f32 1.0, %v3847_v2 }
 0x39b   : > { %3885 = vst [vmem:[%s8413_s26 + $0x38] sm:$0xf] %v3883_v35  ;;  %v3906_v23 = vsel %vm3903_vm9, %v3905_v0, %v3901_v38  ;;  %v3922_v25 = vadd.f32 %v5924_v52, %v3921_v57 }
 0x39c   : > { %3908 = vst [vmem:[%s8413_s26 + $0x38] sm:$0x30] %v3906_v23  ;;  %v3849_v32 = vmul.f32 %v5926_v26, %v3848_v9 }
 0x39d   : > { %v3926_v27 = vsel %vm3925_vm11, %v5924_v52, %v3922_v25 }
 0x39e   : > { %v3931_v40 = vsel %vm3928_vm12, %v3930_v24, %v3926_v27  ;;  %v3850_v31 = vadd.f32 %v5926_v26, %v3849_v32 }
 0x39f   : > { %3933 = vst [vmem:[%s8413_s26 + $0x38] sm:$0xc0] %v3931_v40 }
 0x3a0   : > { %v3854_v42 = vsel %vm3853_vm15, %v5926_v26, %v3850_v31 }
 0x3a1   : > { %v3859_v43 = vsel %vm3856_vm0, %v3858_v8, %v3854_v42 }
 0x3a2   : > { %3861 = vst [vmem:[%s8413_s26 + $0x30] sm:$0xff] %v3859_v43 }
 0x3a3 PF: > { %s19_s30 = sadd.s32 1, %s5933_s30  }
 0x3a4   : > { %p16_p5 = scmp.ge.s32.totalorder %s19_s30, 4  }
 0x3a6   :  { %18 = sbr.rel (!%p16_p5) target bundleno = 1 (0x1), region = 86 }

</bundles_post_ra>
